<compile_context>
chip_gen: v6e
topology: v6e:2x2x1
jax: 0.10.0
libtpu: 0.0.40
codegen_flags: <defaults>
</compile_context>

<pallas_src>
import math
import functools

import jax
import jax.numpy as jnp
from jax import lax
from jax.experimental import pallas as pl
from jax.experimental.pallas import tpu as pltpu

NHEAD = 4
NUM_LAYERS = 4
DIM_FF = 2048          # nn.TransformerDecoderLayer default dim_feedforward
LN_EPS = 1e-5          # nn.LayerNorm default eps

# Ordering of the stacked per-layer parameter arrays fed to the fused kernel.
_PER_LAYER_KEYS = (
    "sa_qkv_w", "sa_qkv_b", "sa_ow", "sa_ob",
    "ca_q_w", "ca_q_b", "ca_kv_w", "ca_kv_b", "ca_ow", "ca_ob",
    "lin1_w", "lin1_b", "lin2_w", "lin2_b",
    "n1_w", "n1_b", "n2_w", "n2_b", "n3_w", "n3_b",
)


# ----------------------------- Pallas kernel -----------------------------

def _eeg_decoder_kernel(
        x0_ref, mem_enc_ref, init_w_ref, init_b_ref,
        sa_qkv_w, sa_qkv_b, sa_ow, sa_ob,
        ca_q_w, ca_q_b, ca_kv_w, ca_kv_b, ca_ow, ca_ob,
        lin1_w, lin1_b, lin2_w, lin2_b,
        n1_w, n1_b, n2_w, n2_b, n3_w, n3_b,
        last_w, last_b,
        out_ref,
        x_sc, mem_sc,
        *, do_corr_init):
    """One grid step == one post-norm TransformerDecoderLayer.

    Step 0 additionally builds the decoder memory (corr-scaler + Linear_init on the
    `transformer_decode_first=False` path) and loads tgt into the carried scratch.
    The last step additionally applies temporal_transform_last into out_ref.
    """
    l = pl.program_id(0)

    @pl.when(l == 0)
    def _init():
        x_sc[...] = x0_ref[...]
        if do_corr_init:
            m = mem_enc_ref[...]                                        # (S, F)
            c = lax.dot_general(m, m, (((1,), (1,)), ((), ())),
                                preferred_element_type=jnp.float32)     # (S, S)
            mn = jnp.min(c, keepdims=True)
            mx = jnp.max(c, keepdims=True)
            denom = jnp.maximum(mx - mn, 1e-12)   # eps-guard vs. reference NaN when max==min
            scaled = (c - mn) / denom
            mem_sc[...] = (jnp.dot(scaled, init_w_ref[...],
                                   preferred_element_type=jnp.float32)
                           + init_b_ref[...])
        else:
            mem_sc[...] = mem_enc_ref[...]

    x = x_sc[...]                        # (rows, D) f32, carried across grid steps
    mem = mem_sc[...]                    # (S, D)  f32
    D = x.shape[-1]
    hd = D // NHEAD

    def layer_norm(v, g, b):
        mu = jnp.mean(v, axis=-1, keepdims=True)
        var = jnp.mean(v * v, axis=-1, keepdims=True) - mu * mu
        return (v - mu) * lax.rsqrt(var + LN_EPS) * g + b

    def attention(q, k, v, ow, ob):
        # q/k/v hold all heads concatenated along lanes (PyTorch head order).  The
        # softmax 1/sqrt(hd) scale is already folded into the Q projection weights.
        # Out-proj is decomposed as sum_h o_h @ W_o.T[h*hd:(h+1)*hd, :]  == concat @ W_o.T.
        out = None
        for h in range(NHEAD):
            q_h = q[:, h * hd:(h + 1) * hd]
            k_h = k[:, h * hd:(h + 1) * hd]
            v_h = v[:, h * hd:(h + 1) * hd]
            # scores = q_h @ k_h.T  (trans_b natively via dot_general)
            s = lax.dot_general(q_h, k_h, (((1,), (1,)), ((), ())),
                                preferred_element_type=jnp.float32)
            s = s - jnp.max(s, axis=-1, keepdims=True)
            p = jnp.exp(s)
            p = p * pl.reciprocal(jnp.sum(p, axis=-1, keepdims=True), approx=True)
            o_h = jnp.dot(p, v_h, preferred_element_type=jnp.float32)
            contrib = jnp.dot(o_h, ow[h * hd:(h + 1) * hd, :],
                              preferred_element_type=jnp.float32)
            out = contrib if out is None else out + contrib
        return out + ob

    # --- self attention (fused QKV projection) + add & norm1 ---
    qkv = jnp.dot(x, sa_qkv_w[...], preferred_element_type=jnp.float32) + sa_qkv_b[...]
    sa = attention(qkv[:, :D], qkv[:, D:2 * D], qkv[:, 2 * D:], sa_ow[...], sa_ob[...])
    x = layer_norm(x + sa, n1_w[...], n1_b[...])

    # --- cross attention over memory (fused KV projection) + add & norm2 ---
    q = jnp.dot(x, ca_q_w[...], preferred_element_type=jnp.float32) + ca_q_b[...]
    kv = jnp.dot(mem, ca_kv_w[...], preferred_element_type=jnp.float32) + ca_kv_b[...]
    ca = attention(q, kv[:, :D], kv[:, D:], ca_ow[...], ca_ob[...])
    x = layer_norm(x + ca, n2_w[...], n2_b[...])

    # --- feed-forward (relu), bf16 weights, f32 accumulation + add & norm3 ---
    h1 = (jnp.dot(x.astype(jnp.bfloat16), lin1_w[...],
                  preferred_element_type=jnp.float32) + lin1_b[...])
    h1 = jnp.maximum(h1, 0.0)
    ff = (jnp.dot(h1.astype(jnp.bfloat16), lin2_w[...],
                  preferred_element_type=jnp.float32) + lin2_b[...])
    x = layer_norm(x + ff, n3_w[...], n3_b[...])

    x_sc[...] = x

    @pl.when(l == pl.num_programs(0) - 1)
    def _finalize():
        # temporal_transform_last (lane-padded to a multiple of 128 for dense stores).
        out_ref[...] = (jnp.dot(x, last_w[...], preferred_element_type=jnp.float32)
                        + last_b[...])


# ----------------------------- host wrapper -----------------------------

def _eeg_decoder_pallas(params, x0, memory_enc, *, transformer_decode_first):
    rows = x0.shape[0]
    D = params["n1_w"].shape[-1]
    s_mem = memory_enc.shape[0]
    n_out_pad = params["last_w"].shape[-1]

    const_in = [x0, memory_enc, params["init_w"], params["init_b"]]
    layer_in = [params[k] for k in _PER_LAYER_KEYS]
    tail_in = [params["last_w"], params["last_b"]]

    def const_spec(a):          # fetched once (block index constant across the grid)
        return pl.BlockSpec(a.shape, lambda l: (0, 0))

    def layer_spec(a):          # per-layer slab, leading L dim squeezed out
        return pl.BlockSpec((None,) + a.shape[1:], lambda l: (l, 0, 0))

    in_specs = ([const_spec(a) for a in const_in]
                + [layer_spec(a) for a in layer_in]
                + [const_spec(a) for a in tail_in])

    kernel = functools.partial(_eeg_decoder_kernel,
                               do_corr_init=not transformer_decode_first)

    return pl.pallas_call(
        kernel,
        out_shape=jax.ShapeDtypeStruct((rows, n_out_pad), jnp.float32),
        grid_spec=pltpu.PrefetchScalarGridSpec(
            num_scalar_prefetch=0,
            grid=(NUM_LAYERS,),
            in_specs=in_specs,
            out_specs=pl.BlockSpec((rows, n_out_pad), lambda l: (0, 0)),
            scratch_shapes=[
                pltpu.VMEM((rows, D), jnp.float32),     # activation carry
                pltpu.VMEM((s_mem, D), jnp.float32),    # decoder memory carry
            ],
        ),
        compiler_params=pltpu.CompilerParams(
            dimension_semantics=("arbitrary",)),
    )(*const_in, *layer_in, *tail_in)


@functools.partial(jax.jit,
                   static_argnames=("transformer_decode_first", "n_eeg_timesteps"))
def eeg_decoder_v2_forward(params, tgt, memory_enc, *,
                           transformer_decode_first, n_eeg_timesteps):
    D = params["n1_w"].shape[-1]
    memory_enc = memory_enc.astype(jnp.float32)
    if tgt is None:
        # transformer_decode_first=True : zeros_like(memory_enc)  -> (S, D)
        # transformer_decode_first=False: zeros_like(spt_features) -> (S, D)
        x0 = jnp.zeros((memory_enc.shape[0], D), jnp.float32)
    else:
        x0 = tgt.astype(jnp.float32)
    out_pad = _eeg_decoder_pallas(params, x0, memory_enc,
                                  transformer_decode_first=transformer_decode_first)
    return out_pad[:, :n_eeg_timesteps]


# ------------------------ deterministic parameter init ------------------------

def init_params(key, feature_dim, n_eeg_timesteps):
    """Random params generated in PyTorch layout, converted ONCE to kernel layout:
    weights stored (in, out) so y = x @ W (no in-kernel transpose), QKV / KV fused
    along lanes, softmax scale folded into Q, FFN weights in bf16, last Linear
    zero-padded to a 128-lane multiple."""
    D, H = feature_dim, NHEAD
    hd = D // H
    q_scale = 1.0 / math.sqrt(hd)
    n_out_pad = ((n_eeg_timesteps + 127) // 128) * 128

    state = {"key": key}

    def rnd(shape, scale=0.05):
        state["key"], sub = jax.random.split(state["key"])
        return scale * jax.random.normal(sub, shape, dtype=jnp.float32)

    acc = {k: [] for k in _PER_LAYER_KEYS}
    for _ in range(NUM_LAYERS):
        for prefix in ("sa", "ca"):
            in_w = rnd((3 * D, D))          # nn.MultiheadAttention.in_proj_weight
            in_b = rnd((3 * D,))            # in_proj_bias
            out_w = rnd((D, D))             # out_proj.weight
            out_b = rnd((D,))               # out_proj.bias
            qw = in_w[:D].T * q_scale       # (D, D), softmax scale folded in
            qb = in_b[:D] * q_scale
            kw, kb = in_w[D:2 * D].T, in_b[D:2 * D]
            vw, vb = in_w[2 * D:].T, in_b[2 * D:]
            ow = out_w.T                    # concat_heads @ out_w.T
            ob = out_b.reshape(1, D)
            if prefix == "sa":
                acc["sa_qkv_w"].append(jnp.concatenate([qw, kw, vw], axis=1))  # (D, 3D)
                acc["sa_qkv_b"].append(
                    jnp.concatenate([qb, kb, vb]).reshape(1, 3 * D))
                acc["sa_ow"].append(ow)
                acc["sa_ob"].append(ob)
            else:
                acc["ca_q_w"].append(qw)
                acc["ca_q_b"].append(qb.reshape(1, D))
                acc["ca_kv_w"].append(jnp.concatenate([kw, vw], axis=1))       # (D, 2D)
                acc["ca_kv_b"].append(jnp.concatenate([kb, vb]).reshape(1, 2 * D))
                acc["ca_ow"].append(ow)
                acc["ca_ob"].append(ob)
        acc["lin1_w"].append(rnd((DIM_FF, D)).T.astype(jnp.bfloat16))   # (D, FF) bf16
        acc["lin1_b"].append(rnd((DIM_FF,)).reshape(1, DIM_FF))
        acc["lin2_w"].append(rnd((D, DIM_FF)).T.astype(jnp.bfloat16))   # (FF, D) bf16
        acc["lin2_b"].append(rnd((D,)).reshape(1, D))
        for n in ("n1", "n2", "n3"):
            acc[f"{n}_w"].append(jnp.ones((1, D), jnp.float32))
            acc[f"{n}_b"].append(jnp.zeros((1, D), jnp.float32))

    params = {k: jnp.stack(v, axis=0) for k, v in acc.items()}          # (L, ...)

    # temporal_transform_last: Linear(feature_dim, n_eeg_timesteps), lane-padded.
    lw = rnd((n_eeg_timesteps, D)).T                                     # (D, n_eeg)
    lb = rnd((n_eeg_timesteps,))
    params["last_w"] = jnp.zeros((D, n_out_pad), jnp.float32).at[:, :n_eeg_timesteps].set(lw)
    params["last_b"] = jnp.zeros((1, n_out_pad), jnp.float32).at[:, :n_eeg_timesteps].set(lb)
    # temporal_transform_initial: Linear(32, feature_dim)
    params["init_w"] = rnd((D, 32)).T                                    # (32, D)
    params["init_b"] = rnd((D,)).reshape(1, D)
    return params


# ----------------------------------- main -----------------------------------

if __name__ == "__main__":
    feature_dim = 32          # d_model (nhead=4 -> head_dim=8)
    n_eeg_timesteps = 64
    T = 16                    # tgt sequence length
    S = 32                    # memory rows; corr matrix is (32, 32) -> Linear(32, D)

    key = jax.random.PRNGKey(0)
    k_params, k_tgt, k_mem = jax.random.split(key, 3)
    params = init_params(k_params, feature_dim, n_eeg_timesteps)

    tgt = jax.random.normal(k_tgt, (T, feature_dim), dtype=jnp.float32)
    memory_enc = jax.random.normal(k_mem, (S, feature_dim), dtype=jnp.float32)

    # transformer_decode_first=False: corr scaler + Linear_init + decoder + Linear_last,
    # all in ONE pallas_call.
    out = eeg_decoder_v2_forward(params, tgt, memory_enc,
                                 transformer_decode_first=False,
                                 n_eeg_timesteps=n_eeg_timesteps)
    out = jax.block_until_ready(out)
    assert out.shape == (T, n_eeg_timesteps), out.shape
    assert bool(jnp.all(jnp.isfinite(out)))

    # transformer_decode_first=True with tgt=None (also one pallas_call).
    out2 = eeg_decoder_v2_forward(params, None, memory_enc,
                                  transformer_decode_first=True,
                                  n_eeg_timesteps=n_eeg_timesteps)
    out2 = jax.block_until_ready(out2)
    assert out2.shape == (S, n_eeg_timesteps), out2.shape
    assert bool(jnp.all(jnp.isfinite(out2)))

    print("KERNEL_OK")
</pallas_src>

<mosaic_0001>
module attributes {stable_mosaic.version = 11 : i64} {
  func.func @_eeg_decoder_kernel(%arg0: i32, %arg1: memref<16x32xf32, #tpu.memory_space<vmem>>, %arg2: memref<32x32xf32, #tpu.memory_space<vmem>>, %arg3: memref<32x32xf32, #tpu.memory_space<vmem>>, %arg4: memref<1x32xf32, #tpu.memory_space<vmem>>, %arg5: memref<1x32x96xf32, #tpu.memory_space<vmem>>, %arg6: memref<1x1x96xf32, #tpu.memory_space<vmem>>, %arg7: memref<1x32x32xf32, #tpu.memory_space<vmem>>, %arg8: memref<1x1x32xf32, #tpu.memory_space<vmem>>, %arg9: memref<1x32x32xf32, #tpu.memory_space<vmem>>, %arg10: memref<1x1x32xf32, #tpu.memory_space<vmem>>, %arg11: memref<1x32x64xf32, #tpu.memory_space<vmem>>, %arg12: memref<1x1x64xf32, #tpu.memory_space<vmem>>, %arg13: memref<1x32x32xf32, #tpu.memory_space<vmem>>, %arg14: memref<1x1x32xf32, #tpu.memory_space<vmem>>, %arg15: memref<1x32x2048xbf16, #tpu.memory_space<vmem>>, %arg16: memref<1x1x2048xf32, #tpu.memory_space<vmem>>, %arg17: memref<1x2048x32xbf16, #tpu.memory_space<vmem>>, %arg18: memref<1x1x32xf32, #tpu.memory_space<vmem>>, %arg19: memref<1x1x32xf32, #tpu.memory_space<vmem>>, %arg20: memref<1x1x32xf32, #tpu.memory_space<vmem>>, %arg21: memref<1x1x32xf32, #tpu.memory_space<vmem>>, %arg22: memref<1x1x32xf32, #tpu.memory_space<vmem>>, %arg23: memref<1x1x32xf32, #tpu.memory_space<vmem>>, %arg24: memref<1x1x32xf32, #tpu.memory_space<vmem>>, %arg25: memref<32x128xf32, #tpu.memory_space<vmem>>, %arg26: memref<1x128xf32, #tpu.memory_space<vmem>>, %arg27: memref<16x128xf32, #tpu.memory_space<vmem>>, %arg28: memref<16x32xf32, #tpu.memory_space<vmem>>, %arg29: memref<32x32xf32, #tpu.memory_space<vmem>>) attributes {dimension_semantics = [#tpu.dimension_semantics<arbitrary>], iteration_bounds = array<i64: 4>, scalar_prefetch = 0 : i64, scratch_operands = 2 : i64, tpu.core_type = #tpu.core_type<tc>, window_params = [{pipeline_mode = #tpu.pipeline_mode<synchronous>, transform_indices = @transform_0, window_bounds = array<i64: 16, 32>}, {pipeline_mode = #tpu.pipeline_mode<synchronous>, transform_indices = @transform_1, window_bounds = array<i64: 32, 32>}, {pipeline_mode = #tpu.pipeline_mode<synchronous>, transform_indices = @transform_2, window_bounds = array<i64: 32, 32>}, {pipeline_mode = #tpu.pipeline_mode<synchronous>, transform_indices = @transform_3, window_bounds = array<i64: 1, 32>}, {transform_indices = @transform_4, window_bounds = array<i64: 1, 32, 96>}, {transform_indices = @transform_5, window_bounds = array<i64: 1, 1, 96>}, {transform_indices = @transform_6, window_bounds = array<i64: 1, 32, 32>}, {transform_indices = @transform_7, window_bounds = array<i64: 1, 1, 32>}, {transform_indices = @transform_8, window_bounds = array<i64: 1, 32, 32>}, {transform_indices = @transform_9, window_bounds = array<i64: 1, 1, 32>}, {transform_indices = @transform_10, window_bounds = array<i64: 1, 32, 64>}, {transform_indices = @transform_11, window_bounds = array<i64: 1, 1, 64>}, {transform_indices = @transform_12, window_bounds = array<i64: 1, 32, 32>}, {transform_indices = @transform_13, window_bounds = array<i64: 1, 1, 32>}, {transform_indices = @transform_14, window_bounds = array<i64: 1, 32, 2048>}, {transform_indices = @transform_15, window_bounds = array<i64: 1, 1, 2048>}, {transform_indices = @transform_16, window_bounds = array<i64: 1, 2048, 32>}, {transform_indices = @transform_17, window_bounds = array<i64: 1, 1, 32>}, {transform_indices = @transform_18, window_bounds = array<i64: 1, 1, 32>}, {transform_indices = @transform_19, window_bounds = array<i64: 1, 1, 32>}, {transform_indices = @transform_20, window_bounds = array<i64: 1, 1, 32>}, {transform_indices = @transform_21, window_bounds = array<i64: 1, 1, 32>}, {transform_indices = @transform_22, window_bounds = array<i64: 1, 1, 32>}, {transform_indices = @transform_23, window_bounds = array<i64: 1, 1, 32>}, {pipeline_mode = #tpu.pipeline_mode<synchronous>, transform_indices = @transform_24, window_bounds = array<i64: 32, 128>}, {pipeline_mode = #tpu.pipeline_mode<synchronous>, transform_indices = @transform_25, window_bounds = array<i64: 1, 128>}, {pipeline_mode = #tpu.pipeline_mode<synchronous>, transform_indices = @transform_26, window_bounds = array<i64: 16, 128>}]} {
    %c0_i32 = arith.constant 0 : i32
    %0 = arith.cmpi eq, %arg0, %c0_i32 : i32
    %1 = arith.extui %0 : i1 to i32
    %c0_i32_0 = arith.constant 0 : i32
    %2 = arith.cmpi ne, %1, %c0_i32_0 : i32
    scf.if %2 {
      %c0_127 = arith.constant 0 : index
      %c0_128 = arith.constant 0 : index
      %288 = vector.load %arg1[%c0_127, %c0_128] : memref<16x32xf32, #tpu.memory_space<vmem>>, vector<16x32xf32>
      %c0_129 = arith.constant 0 : index
      %c0_130 = arith.constant 0 : index
      %289 = vector.load %arg28[%c0_129, %c0_130] : memref<16x32xf32, #tpu.memory_space<vmem>>, vector<16x32xf32>
      tpu.vector_store %arg28[%c0_129, %c0_130], %288 {strides = array<i32>} : memref<16x32xf32, #tpu.memory_space<vmem>>, vector<16x32xf32>,
      %c0_131 = arith.constant 0 : index
      %c0_132 = arith.constant 0 : index
      %290 = vector.load %arg2[%c0_131, %c0_132] : memref<32x32xf32, #tpu.memory_space<vmem>>, vector<32x32xf32>
      %cst_133 = arith.constant dense<0.000000e+00> : vector<32x32xf32>
      %291 = tpu.matmul %290, %290, %cst_133 {dimension_numbers = #tpu.dot_dimension_numbers<[1], [1], [0], [0], [0, 0, 1, 0], [], []>} : vector<32x32xf32>, vector<32x32xf32>, vector<32x32xf32> -> vector<32x32xf32>
      %292 = vector.shape_cast %291 : vector<32x32xf32> to vector<1x32x32xf32>
      %cst_134 = arith.constant dense<0x7F800000> : vector<1xf32>
      %293 = vector.multi_reduction <minimumf>, %292, %cst_134 [1, 2] : vector<1x32x32xf32> to vector<1xf32>
      %294 = vector.shape_cast %293 : vector<1xf32> to vector<1x1x1xf32>
      %295 = vector.extract %294[0, 0, 0] : f32 from vector<1x1x1xf32>
      %296 = vector.broadcast %295 : f32 to vector<1x1xf32>
      %297 = vector.shape_cast %291 : vector<32x32xf32> to vector<1x32x32xf32>
      %cst_135 = arith.constant dense<0xFF800000> : vector<1xf32>
      %298 = vector.multi_reduction <maximumf>, %297, %cst_135 [1, 2] : vector<1x32x32xf32> to vector<1xf32>
      %299 = vector.shape_cast %298 : vector<1xf32> to vector<1x1x1xf32>
      %300 = vector.extract %299[0, 0, 0] : f32 from vector<1x1x1xf32>
      %301 = vector.broadcast %300 : f32 to vector<1x1xf32>
      %302 = arith.subf %301, %296 : vector<1x1xf32>
      %cst_136 = arith.constant 9.99999996E-13 : f32
      %303 = vector.broadcast %cst_136 : f32 to vector<1x1xf32>
      %304 = arith.maximumf %302, %303 : vector<1x1xf32>
      %305 = vector.broadcast %296 : vector<1x1xf32> to vector<32x32xf32>
      %306 = arith.subf %291, %305 : vector<32x32xf32>
      %307 = vector.broadcast %304 : vector<1x1xf32> to vector<32x32xf32>
      %308 = arith.divf %306, %307 : vector<32x32xf32>
      %c0_137 = arith.constant 0 : index
      %c0_138 = arith.constant 0 : index
      %309 = vector.load %arg3[%c0_137, %c0_138] : memref<32x32xf32, #tpu.memory_space<vmem>>, vector<32x32xf32>
      %cst_139 = arith.constant dense<0.000000e+00> : vector<32x32xf32>
      %310 = tpu.matmul %308, %309, %cst_139 {dimension_numbers = #tpu.dot_dimension_numbers<[1], [0], [0], [1], [0, 0, 1, 1], [], []>} : vector<32x32xf32>, vector<32x32xf32>, vector<32x32xf32> -> vector<32x32xf32>
      %c0_140 = arith.constant 0 : index
      %c0_141 = arith.constant 0 : index
      %311 = vector.load %arg4[%c0_140, %c0_141] : memref<1x32xf32, #tpu.memory_space<vmem>>, vector<1x32xf32>
      %312 = vector.broadcast %311 : vector<1x32xf32> to vector<32x32xf32>
      %313 = arith.addf %310, %312 : vector<32x32xf32>
      %c0_142 = arith.constant 0 : index
      %c0_143 = arith.constant 0 : index
      %314 = vector.load %arg29[%c0_142, %c0_143] : memref<32x32xf32, #tpu.memory_space<vmem>>, vector<32x32xf32>
      tpu.vector_store %arg29[%c0_142, %c0_143], %313 {strides = array<i32>} : memref<32x32xf32, #tpu.memory_space<vmem>>, vector<32x32xf32>,
    } else {
    }
    %c0 = arith.constant 0 : index
    %c0_1 = arith.constant 0 : index
    %3 = vector.load %arg28[%c0, %c0_1] : memref<16x32xf32, #tpu.memory_space<vmem>>, vector<16x32xf32>
    %c0_2 = arith.constant 0 : index
    %c0_3 = arith.constant 0 : index
    %4 = vector.load %arg29[%c0_2, %c0_3] : memref<32x32xf32, #tpu.memory_space<vmem>>, vector<32x32xf32>
    %c0_4 = arith.constant 0 : index
    %c0_5 = arith.constant 0 : index
    %c0_6 = arith.constant 0 : index
    %5 = vector.load %arg5[%c0_4, %c0_5, %c0_6] : memref<1x32x96xf32, #tpu.memory_space<vmem>>, vector<1x32x96xf32>
    %6 = vector.shape_cast %5 : vector<1x32x96xf32> to vector<32x96xf32>
    %cst = arith.constant dense<0.000000e+00> : vector<16x96xf32>
    %7 = tpu.matmul %3, %6, %cst {dimension_numbers = #tpu.dot_dimension_numbers<[1], [0], [0], [1], [0, 0, 1, 1], [], []>} : vector<16x32xf32>, vector<32x96xf32>, vector<16x96xf32> -> vector<16x96xf32>
    %c0_7 = arith.constant 0 : index
    %c0_8 = arith.constant 0 : index
    %c0_9 = arith.constant 0 : index
    %8 = vector.load %arg6[%c0_7, %c0_8, %c0_9] : memref<1x1x96xf32, #tpu.memory_space<vmem>>, vector<1x1x96xf32>
    %9 = vector.shape_cast %8 : vector<1x1x96xf32> to vector<1x96xf32>
    %10 = vector.broadcast %9 : vector<1x96xf32> to vector<16x96xf32>
    %11 = arith.addf %7, %10 : vector<16x96xf32>
    %12 = vector.extract_strided_slice %11 {offsets = [0, 0], sizes = [16, 32], strides = [1, 1]} : vector<16x96xf32> to vector<16x32xf32>
    %13 = vector.extract_strided_slice %11 {offsets = [0, 32], sizes = [16, 32], strides = [1, 1]} : vector<16x96xf32> to vector<16x32xf32>
    %14 = vector.extract_strided_slice %11 {offsets = [0, 64], sizes = [16, 32], strides = [1, 1]} : vector<16x96xf32> to vector<16x32xf32>
    %c0_10 = arith.constant 0 : index
    %c0_11 = arith.constant 0 : index
    %c0_12 = arith.constant 0 : index
    %15 = vector.load %arg7[%c0_10, %c0_11, %c0_12] : memref<1x32x32xf32, #tpu.memory_space<vmem>>, vector<1x32x32xf32>
    %16 = vector.shape_cast %15 : vector<1x32x32xf32> to vector<32x32xf32>
    %c0_13 = arith.constant 0 : index
    %c0_14 = arith.constant 0 : index
    %c0_15 = arith.constant 0 : index
    %17 = vector.load %arg8[%c0_13, %c0_14, %c0_15] : memref<1x1x32xf32, #tpu.memory_space<vmem>>, vector<1x1x32xf32>
    %18 = vector.shape_cast %17 : vector<1x1x32xf32> to vector<1x32xf32>
    %19 = vector.extract_strided_slice %12 {offsets = [0, 0], sizes = [16, 8], strides = [1, 1]} : vector<16x32xf32> to vector<16x8xf32>
    %20 = vector.extract_strided_slice %13 {offsets = [0, 0], sizes = [16, 8], strides = [1, 1]} : vector<16x32xf32> to vector<16x8xf32>
    %21 = vector.extract_strided_slice %14 {offsets = [0, 0], sizes = [16, 8], strides = [1, 1]} : vector<16x32xf32> to vector<16x8xf32>
    %cst_16 = arith.constant dense<0.000000e+00> : vector<16x16xf32>
    %22 = tpu.matmul %19, %20, %cst_16 {dimension_numbers = #tpu.dot_dimension_numbers<[1], [1], [0], [0], [0, 0, 1, 0], [], []>} : vector<16x8xf32>, vector<16x8xf32>, vector<16x16xf32> -> vector<16x16xf32>
    %cst_17 = arith.constant dense<0xFF800000> : vector<16xf32>
    %23 = vector.multi_reduction <maximumf>, %22, %cst_17 [1] : vector<16x16xf32> to vector<16xf32>
    %24 = vector.shape_cast %23 : vector<16xf32> to vector<16x1xf32>
    %25 = vector.broadcast %24 : vector<16x1xf32> to vector<16x16xf32>
    %26 = arith.subf %22, %25 : vector<16x16xf32>
    %27 = math.exp %26 : vector<16x16xf32>
    %cst_18 = arith.constant dense<0.000000e+00> : vector<16xf32>
    %28 = vector.multi_reduction <add>, %27, %cst_18 [1] : vector<16x16xf32> to vector<16xf32>
    %29 = vector.shape_cast %28 : vector<16xf32> to vector<16x1xf32>
    %30 = tpu.reciprocal %29 {approx = true} : vector<16x1xf32> -> vector<16x1xf32>
    %31 = vector.broadcast %30 : vector<16x1xf32> to vector<16x16xf32>
    %32 = arith.mulf %27, %31 : vector<16x16xf32>
    %cst_19 = arith.constant dense<0.000000e+00> : vector<16x8xf32>
    %33 = tpu.matmul %32, %21, %cst_19 {dimension_numbers = #tpu.dot_dimension_numbers<[1], [0], [0], [1], [0, 0, 1, 1], [], []>} : vector<16x16xf32>, vector<16x8xf32>, vector<16x8xf32> -> vector<16x8xf32>
    %34 = vector.extract_strided_slice %16 {offsets = [0, 0], sizes = [8, 32], strides = [1, 1]} : vector<32x32xf32> to vector<8x32xf32>
    %cst_20 = arith.constant dense<0.000000e+00> : vector<16x32xf32>
    %35 = tpu.matmul %33, %34, %cst_20 {dimension_numbers = #tpu.dot_dimension_numbers<[1], [0], [0], [1], [0, 0, 1, 1], [], []>} : vector<16x8xf32>, vector<8x32xf32>, vector<16x32xf32> -> vector<16x32xf32>
    %36 = vector.extract_strided_slice %12 {offsets = [0, 8], sizes = [16, 8], strides = [1, 1]} : vector<16x32xf32> to vector<16x8xf32>
    %37 = vector.extract_strided_slice %13 {offsets = [0, 8], sizes = [16, 8], strides = [1, 1]} : vector<16x32xf32> to vector<16x8xf32>
    %38 = vector.extract_strided_slice %14 {offsets = [0, 8], sizes = [16, 8], strides = [1, 1]} : vector<16x32xf32> to vector<16x8xf32>
    %cst_21 = arith.constant dense<0.000000e+00> : vector<16x16xf32>
    %39 = tpu.matmul %36, %37, %cst_21 {dimension_numbers = #tpu.dot_dimension_numbers<[1], [1], [0], [0], [0, 0, 1, 0], [], []>} : vector<16x8xf32>, vector<16x8xf32>, vector<16x16xf32> -> vector<16x16xf32>
    %cst_22 = arith.constant dense<0xFF800000> : vector<16xf32>
    %40 = vector.multi_reduction <maximumf>, %39, %cst_22 [1] : vector<16x16xf32> to vector<16xf32>
    %41 = vector.shape_cast %40 : vector<16xf32> to vector<16x1xf32>
    %42 = vector.broadcast %41 : vector<16x1xf32> to vector<16x16xf32>
    %43 = arith.subf %39, %42 : vector<16x16xf32>
    %44 = math.exp %43 : vector<16x16xf32>
    %cst_23 = arith.constant dense<0.000000e+00> : vector<16xf32>
    %45 = vector.multi_reduction <add>, %44, %cst_23 [1] : vector<16x16xf32> to vector<16xf32>
    %46 = vector.shape_cast %45 : vector<16xf32> to vector<16x1xf32>
    %47 = tpu.reciprocal %46 {approx = true} : vector<16x1xf32> -> vector<16x1xf32>
    %48 = vector.broadcast %47 : vector<16x1xf32> to vector<16x16xf32>
    %49 = arith.mulf %44, %48 : vector<16x16xf32>
    %cst_24 = arith.constant dense<0.000000e+00> : vector<16x8xf32>
    %50 = tpu.matmul %49, %38, %cst_24 {dimension_numbers = #tpu.dot_dimension_numbers<[1], [0], [0], [1], [0, 0, 1, 1], [], []>} : vector<16x16xf32>, vector<16x8xf32>, vector<16x8xf32> -> vector<16x8xf32>
    %51 = vector.extract_strided_slice %16 {offsets = [8, 0], sizes = [8, 32], strides = [1, 1]} : vector<32x32xf32> to vector<8x32xf32>
    %cst_25 = arith.constant dense<0.000000e+00> : vector<16x32xf32>
    %52 = tpu.matmul %50, %51, %cst_25 {dimension_numbers = #tpu.dot_dimension_numbers<[1], [0], [0], [1], [0, 0, 1, 1], [], []>} : vector<16x8xf32>, vector<8x32xf32>, vector<16x32xf32> -> vector<16x32xf32>
    %53 = arith.addf %35, %52 : vector<16x32xf32>
    %54 = vector.extract_strided_slice %12 {offsets = [0, 16], sizes = [16, 8], strides = [1, 1]} : vector<16x32xf32> to vector<16x8xf32>
    %55 = vector.extract_strided_slice %13 {offsets = [0, 16], sizes = [16, 8], strides = [1, 1]} : vector<16x32xf32> to vector<16x8xf32>
    %56 = vector.extract_strided_slice %14 {offsets = [0, 16], sizes = [16, 8], strides = [1, 1]} : vector<16x32xf32> to vector<16x8xf32>
    %cst_26 = arith.constant dense<0.000000e+00> : vector<16x16xf32>
    %57 = tpu.matmul %54, %55, %cst_26 {dimension_numbers = #tpu.dot_dimension_numbers<[1], [1], [0], [0], [0, 0, 1, 0], [], []>} : vector<16x8xf32>, vector<16x8xf32>, vector<16x16xf32> -> vector<16x16xf32>
    %cst_27 = arith.constant dense<0xFF800000> : vector<16xf32>
    %58 = vector.multi_reduction <maximumf>, %57, %cst_27 [1] : vector<16x16xf32> to vector<16xf32>
    %59 = vector.shape_cast %58 : vector<16xf32> to vector<16x1xf32>
    %60 = vector.broadcast %59 : vector<16x1xf32> to vector<16x16xf32>
    %61 = arith.subf %57, %60 : vector<16x16xf32>
    %62 = math.exp %61 : vector<16x16xf32>
    %cst_28 = arith.constant dense<0.000000e+00> : vector<16xf32>
    %63 = vector.multi_reduction <add>, %62, %cst_28 [1] : vector<16x16xf32> to vector<16xf32>
    %64 = vector.shape_cast %63 : vector<16xf32> to vector<16x1xf32>
    %65 = tpu.reciprocal %64 {approx = true} : vector<16x1xf32> -> vector<16x1xf32>
    %66 = vector.broadcast %65 : vector<16x1xf32> to vector<16x16xf32>
    %67 = arith.mulf %62, %66 : vector<16x16xf32>
    %cst_29 = arith.constant dense<0.000000e+00> : vector<16x8xf32>
    %68 = tpu.matmul %67, %56, %cst_29 {dimension_numbers = #tpu.dot_dimension_numbers<[1], [0], [0], [1], [0, 0, 1, 1], [], []>} : vector<16x16xf32>, vector<16x8xf32>, vector<16x8xf32> -> vector<16x8xf32>
    %69 = vector.extract_strided_slice %16 {offsets = [16, 0], sizes = [8, 32], strides = [1, 1]} : vector<32x32xf32> to vector<8x32xf32>
    %cst_30 = arith.constant dense<0.000000e+00> : vector<16x32xf32>
    %70 = tpu.matmul %68, %69, %cst_30 {dimension_numbers = #tpu.dot_dimension_numbers<[1], [0], [0], [1], [0, 0, 1, 1], [], []>} : vector<16x8xf32>, vector<8x32xf32>, vector<16x32xf32> -> vector<16x32xf32>
    %71 = arith.addf %53, %70 : vector<16x32xf32>
    %72 = vector.extract_strided_slice %12 {offsets = [0, 24], sizes = [16, 8], strides = [1, 1]} : vector<16x32xf32> to vector<16x8xf32>
    %73 = vector.extract_strided_slice %13 {offsets = [0, 24], sizes = [16, 8], strides = [1, 1]} : vector<16x32xf32> to vector<16x8xf32>
    %74 = vector.extract_strided_slice %14 {offsets = [0, 24], sizes = [16, 8], strides = [1, 1]} : vector<16x32xf32> to vector<16x8xf32>
    %cst_31 = arith.constant dense<0.000000e+00> : vector<16x16xf32>
    %75 = tpu.matmul %72, %73, %cst_31 {dimension_numbers = #tpu.dot_dimension_numbers<[1], [1], [0], [0], [0, 0, 1, 0], [], []>} : vector<16x8xf32>, vector<16x8xf32>, vector<16x16xf32> -> vector<16x16xf32>
    %cst_32 = arith.constant dense<0xFF800000> : vector<16xf32>
    %76 = vector.multi_reduction <maximumf>, %75, %cst_32 [1] : vector<16x16xf32> to vector<16xf32>
    %77 = vector.shape_cast %76 : vector<16xf32> to vector<16x1xf32>
    %78 = vector.broadcast %77 : vector<16x1xf32> to vector<16x16xf32>
    %79 = arith.subf %75, %78 : vector<16x16xf32>
    %80 = math.exp %79 : vector<16x16xf32>
    %cst_33 = arith.constant dense<0.000000e+00> : vector<16xf32>
    %81 = vector.multi_reduction <add>, %80, %cst_33 [1] : vector<16x16xf32> to vector<16xf32>
    %82 = vector.shape_cast %81 : vector<16xf32> to vector<16x1xf32>
    %83 = tpu.reciprocal %82 {approx = true} : vector<16x1xf32> -> vector<16x1xf32>
    %84 = vector.broadcast %83 : vector<16x1xf32> to vector<16x16xf32>
    %85 = arith.mulf %80, %84 : vector<16x16xf32>
    %cst_34 = arith.constant dense<0.000000e+00> : vector<16x8xf32>
    %86 = tpu.matmul %85, %74, %cst_34 {dimension_numbers = #tpu.dot_dimension_numbers<[1], [0], [0], [1], [0, 0, 1, 1], [], []>} : vector<16x16xf32>, vector<16x8xf32>, vector<16x8xf32> -> vector<16x8xf32>
    %87 = vector.extract_strided_slice %16 {offsets = [24, 0], sizes = [8, 32], strides = [1, 1]} : vector<32x32xf32> to vector<8x32xf32>
    %cst_35 = arith.constant dense<0.000000e+00> : vector<16x32xf32>
    %88 = tpu.matmul %86, %87, %cst_35 {dimension_numbers = #tpu.dot_dimension_numbers<[1], [0], [0], [1], [0, 0, 1, 1], [], []>} : vector<16x8xf32>, vector<8x32xf32>, vector<16x32xf32> -> vector<16x32xf32>
    %89 = arith.addf %71, %88 : vector<16x32xf32>
    %90 = vector.broadcast %18 : vector<1x32xf32> to vector<16x32xf32>
    %91 = arith.addf %89, %90 : vector<16x32xf32>
    %92 = arith.addf %3, %91 : vector<16x32xf32>
    %c0_36 = arith.constant 0 : index
    %c0_37 = arith.constant 0 : index
    %c0_38 = arith.constant 0 : index
    %93 = vector.load %arg19[%c0_36, %c0_37, %c0_38] : memref<1x1x32xf32, #tpu.memory_space<vmem>>, vector<1x1x32xf32>
    %94 = vector.shape_cast %93 : vector<1x1x32xf32> to vector<1x32xf32>
    %c0_39 = arith.constant 0 : index
    %c0_40 = arith.constant 0 : index
    %c0_41 = arith.constant 0 : index
    %95 = vector.load %arg20[%c0_39, %c0_40, %c0_41] : memref<1x1x32xf32, #tpu.memory_space<vmem>>, vector<1x1x32xf32>
    %96 = vector.shape_cast %95 : vector<1x1x32xf32> to vector<1x32xf32>
    %cst_42 = arith.constant dense<0.000000e+00> : vector<16xf32>
    %97 = vector.multi_reduction <add>, %92, %cst_42 [1] : vector<16x32xf32> to vector<16xf32>
    %98 = vector.shape_cast %97 : vector<16xf32> to vector<16x1xf32>
    %cst_43 = arith.constant 3.200000e+01 : f32
    %99 = vector.broadcast %cst_43 : f32 to vector<16x1xf32>
    %100 = arith.divf %98, %99 : vector<16x1xf32>
    %101 = arith.mulf %92, %92 : vector<16x32xf32>
    %cst_44 = arith.constant dense<0.000000e+00> : vector<16xf32>
    %102 = vector.multi_reduction <add>, %101, %cst_44 [1] : vector<16x32xf32> to vector<16xf32>
    %103 = vector.shape_cast %102 : vector<16xf32> to vector<16x1xf32>
    %cst_45 = arith.constant 3.200000e+01 : f32
    %104 = vector.broadcast %cst_45 : f32 to vector<16x1xf32>
    %105 = arith.divf %103, %104 : vector<16x1xf32>
    %106 = arith.mulf %100, %100 : vector<16x1xf32>
    %107 = arith.subf %105, %106 : vector<16x1xf32>
    %108 = vector.broadcast %100 : vector<16x1xf32> to vector<16x32xf32>
    %109 = arith.subf %92, %108 : vector<16x32xf32>
    %cst_46 = arith.constant 9.99999974E-6 : f32
    %110 = vector.broadcast %cst_46 : f32 to vector<16x1xf32>
    %111 = arith.addf %107, %110 : vector<16x1xf32>
    %112 = math.rsqrt %111 : vector<16x1xf32>
    %113 = vector.broadcast %112 : vector<16x1xf32> to vector<16x32xf32>
    %114 = arith.mulf %109, %113 : vector<16x32xf32>
    %115 = vector.broadcast %94 : vector<1x32xf32> to vector<16x32xf32>
    %116 = arith.mulf %114, %115 : vector<16x32xf32>
    %117 = vector.broadcast %96 : vector<1x32xf32> to vector<16x32xf32>
    %118 = arith.addf %116, %117 : vector<16x32xf32>
    %c0_47 = arith.constant 0 : index
    %c0_48 = arith.constant 0 : index
    %c0_49 = arith.constant 0 : index
    %119 = vector.load %arg9[%c0_47, %c0_48, %c0_49] : memref<1x32x32xf32, #tpu.memory_space<vmem>>, vector<1x32x32xf32>
    %120 = vector.shape_cast %119 : vector<1x32x32xf32> to vector<32x32xf32>
    %cst_50 = arith.constant dense<0.000000e+00> : vector<16x32xf32>
    %121 = tpu.matmul %118, %120, %cst_50 {dimension_numbers = #tpu.dot_dimension_numbers<[1], [0], [0], [1], [0, 0, 1, 1], [], []>} : vector<16x32xf32>, vector<32x32xf32>, vector<16x32xf32> -> vector<16x32xf32>
    %c0_51 = arith.constant 0 : index
    %c0_52 = arith.constant 0 : index
    %c0_53 = arith.constant 0 : index
    %122 = vector.load %arg10[%c0_51, %c0_52, %c0_53] : memref<1x1x32xf32, #tpu.memory_space<vmem>>, vector<1x1x32xf32>
    %123 = vector.shape_cast %122 : vector<1x1x32xf32> to vector<1x32xf32>
    %124 = vector.broadcast %123 : vector<1x32xf32> to vector<16x32xf32>
    %125 = arith.addf %121, %124 : vector<16x32xf32>
    %c0_54 = arith.constant 0 : index
    %c0_55 = arith.constant 0 : index
    %c0_56 = arith.constant 0 : index
    %126 = vector.load %arg11[%c0_54, %c0_55, %c0_56] : memref<1x32x64xf32, #tpu.memory_space<vmem>>, vector<1x32x64xf32>
    %127 = vector.shape_cast %126 : vector<1x32x64xf32> to vector<32x64xf32>
    %cst_57 = arith.constant dense<0.000000e+00> : vector<32x64xf32>
    %128 = tpu.matmul %4, %127, %cst_57 {dimension_numbers = #tpu.dot_dimension_numbers<[1], [0], [0], [1], [0, 0, 1, 1], [], []>} : vector<32x32xf32>, vector<32x64xf32>, vector<32x64xf32> -> vector<32x64xf32>
    %c0_58 = arith.constant 0 : index
    %c0_59 = arith.constant 0 : index
    %c0_60 = arith.constant 0 : index
    %129 = vector.load %arg12[%c0_58, %c0_59, %c0_60] : memref<1x1x64xf32, #tpu.memory_space<vmem>>, vector<1x1x64xf32>
    %130 = vector.shape_cast %129 : vector<1x1x64xf32> to vector<1x64xf32>
    %131 = vector.broadcast %130 : vector<1x64xf32> to vector<32x64xf32>
    %132 = arith.addf %128, %131 : vector<32x64xf32>
    %133 = vector.extract_strided_slice %132 {offsets = [0, 0], sizes = [32, 32], strides = [1, 1]} : vector<32x64xf32> to vector<32x32xf32>
    %134 = vector.extract_strided_slice %132 {offsets = [0, 32], sizes = [32, 32], strides = [1, 1]} : vector<32x64xf32> to vector<32x32xf32>
    %c0_61 = arith.constant 0 : index
    %c0_62 = arith.constant 0 : index
    %c0_63 = arith.constant 0 : index
    %135 = vector.load %arg13[%c0_61, %c0_62, %c0_63] : memref<1x32x32xf32, #tpu.memory_space<vmem>>, vector<1x32x32xf32>
    %136 = vector.shape_cast %135 : vector<1x32x32xf32> to vector<32x32xf32>
    %c0_64 = arith.constant 0 : index
    %c0_65 = arith.constant 0 : index
    %c0_66 = arith.constant 0 : index
    %137 = vector.load %arg14[%c0_64, %c0_65, %c0_66] : memref<1x1x32xf32, #tpu.memory_space<vmem>>, vector<1x1x32xf32>
    %138 = vector.shape_cast %137 : vector<1x1x32xf32> to vector<1x32xf32>
    %139 = vector.extract_strided_slice %125 {offsets = [0, 0], sizes = [16, 8], strides = [1, 1]} : vector<16x32xf32> to vector<16x8xf32>
    %140 = vector.extract_strided_slice %133 {offsets = [0, 0], sizes = [32, 8], strides = [1, 1]} : vector<32x32xf32> to vector<32x8xf32>
    %141 = vector.extract_strided_slice %134 {offsets = [0, 0], sizes = [32, 8], strides = [1, 1]} : vector<32x32xf32> to vector<32x8xf32>
    %cst_67 = arith.constant dense<0.000000e+00> : vector<16x32xf32>
    %142 = tpu.matmul %139, %140, %cst_67 {dimension_numbers = #tpu.dot_dimension_numbers<[1], [1], [0], [0], [0, 0, 1, 0], [], []>} : vector<16x8xf32>, vector<32x8xf32>, vector<16x32xf32> -> vector<16x32xf32>
    %cst_68 = arith.constant dense<0xFF800000> : vector<16xf32>
    %143 = vector.multi_reduction <maximumf>, %142, %cst_68 [1] : vector<16x32xf32> to vector<16xf32>
    %144 = vector.shape_cast %143 : vector<16xf32> to vector<16x1xf32>
    %145 = vector.broadcast %144 : vector<16x1xf32> to vector<16x32xf32>
    %146 = arith.subf %142, %145 : vector<16x32xf32>
    %147 = math.exp %146 : vector<16x32xf32>
    %cst_69 = arith.constant dense<0.000000e+00> : vector<16xf32>
    %148 = vector.multi_reduction <add>, %147, %cst_69 [1] : vector<16x32xf32> to vector<16xf32>
    %149 = vector.shape_cast %148 : vector<16xf32> to vector<16x1xf32>
    %150 = tpu.reciprocal %149 {approx = true} : vector<16x1xf32> -> vector<16x1xf32>
    %151 = vector.broadcast %150 : vector<16x1xf32> to vector<16x32xf32>
    %152 = arith.mulf %147, %151 : vector<16x32xf32>
    %cst_70 = arith.constant dense<0.000000e+00> : vector<16x8xf32>
    %153 = tpu.matmul %152, %141, %cst_70 {dimension_numbers = #tpu.dot_dimension_numbers<[1], [0], [0], [1], [0, 0, 1, 1], [], []>} : vector<16x32xf32>, vector<32x8xf32>, vector<16x8xf32> -> vector<16x8xf32>
    %154 = vector.extract_strided_slice %136 {offsets = [0, 0], sizes = [8, 32], strides = [1, 1]} : vector<32x32xf32> to vector<8x32xf32>
    %cst_71 = arith.constant dense<0.000000e+00> : vector<16x32xf32>
    %155 = tpu.matmul %153, %154, %cst_71 {dimension_numbers = #tpu.dot_dimension_numbers<[1], [0], [0], [1], [0, 0, 1, 1], [], []>} : vector<16x8xf32>, vector<8x32xf32>, vector<16x32xf32> -> vector<16x32xf32>
    %156 = vector.extract_strided_slice %125 {offsets = [0, 8], sizes = [16, 8], strides = [1, 1]} : vector<16x32xf32> to vector<16x8xf32>
    %157 = vector.extract_strided_slice %133 {offsets = [0, 8], sizes = [32, 8], strides = [1, 1]} : vector<32x32xf32> to vector<32x8xf32>
    %158 = vector.extract_strided_slice %134 {offsets = [0, 8], sizes = [32, 8], strides = [1, 1]} : vector<32x32xf32> to vector<32x8xf32>
    %cst_72 = arith.constant dense<0.000000e+00> : vector<16x32xf32>
    %159 = tpu.matmul %156, %157, %cst_72 {dimension_numbers = #tpu.dot_dimension_numbers<[1], [1], [0], [0], [0, 0, 1, 0], [], []>} : vector<16x8xf32>, vector<32x8xf32>, vector<16x32xf32> -> vector<16x32xf32>
    %cst_73 = arith.constant dense<0xFF800000> : vector<16xf32>
    %160 = vector.multi_reduction <maximumf>, %159, %cst_73 [1] : vector<16x32xf32> to vector<16xf32>
    %161 = vector.shape_cast %160 : vector<16xf32> to vector<16x1xf32>
    %162 = vector.broadcast %161 : vector<16x1xf32> to vector<16x32xf32>
    %163 = arith.subf %159, %162 : vector<16x32xf32>
    %164 = math.exp %163 : vector<16x32xf32>
    %cst_74 = arith.constant dense<0.000000e+00> : vector<16xf32>
    %165 = vector.multi_reduction <add>, %164, %cst_74 [1] : vector<16x32xf32> to vector<16xf32>
    %166 = vector.shape_cast %165 : vector<16xf32> to vector<16x1xf32>
    %167 = tpu.reciprocal %166 {approx = true} : vector<16x1xf32> -> vector<16x1xf32>
    %168 = vector.broadcast %167 : vector<16x1xf32> to vector<16x32xf32>
    %169 = arith.mulf %164, %168 : vector<16x32xf32>
    %cst_75 = arith.constant dense<0.000000e+00> : vector<16x8xf32>
    %170 = tpu.matmul %169, %158, %cst_75 {dimension_numbers = #tpu.dot_dimension_numbers<[1], [0], [0], [1], [0, 0, 1, 1], [], []>} : vector<16x32xf32>, vector<32x8xf32>, vector<16x8xf32> -> vector<16x8xf32>
    %171 = vector.extract_strided_slice %136 {offsets = [8, 0], sizes = [8, 32], strides = [1, 1]} : vector<32x32xf32> to vector<8x32xf32>
    %cst_76 = arith.constant dense<0.000000e+00> : vector<16x32xf32>
    %172 = tpu.matmul %170, %171, %cst_76 {dimension_numbers = #tpu.dot_dimension_numbers<[1], [0], [0], [1], [0, 0, 1, 1], [], []>} : vector<16x8xf32>, vector<8x32xf32>, vector<16x32xf32> -> vector<16x32xf32>
    %173 = arith.addf %155, %172 : vector<16x32xf32>
    %174 = vector.extract_strided_slice %125 {offsets = [0, 16], sizes = [16, 8], strides = [1, 1]} : vector<16x32xf32> to vector<16x8xf32>
    %175 = vector.extract_strided_slice %133 {offsets = [0, 16], sizes = [32, 8], strides = [1, 1]} : vector<32x32xf32> to vector<32x8xf32>
    %176 = vector.extract_strided_slice %134 {offsets = [0, 16], sizes = [32, 8], strides = [1, 1]} : vector<32x32xf32> to vector<32x8xf32>
    %cst_77 = arith.constant dense<0.000000e+00> : vector<16x32xf32>
    %177 = tpu.matmul %174, %175, %cst_77 {dimension_numbers = #tpu.dot_dimension_numbers<[1], [1], [0], [0], [0, 0, 1, 0], [], []>} : vector<16x8xf32>, vector<32x8xf32>, vector<16x32xf32> -> vector<16x32xf32>
    %cst_78 = arith.constant dense<0xFF800000> : vector<16xf32>
    %178 = vector.multi_reduction <maximumf>, %177, %cst_78 [1] : vector<16x32xf32> to vector<16xf32>
    %179 = vector.shape_cast %178 : vector<16xf32> to vector<16x1xf32>
    %180 = vector.broadcast %179 : vector<16x1xf32> to vector<16x32xf32>
    %181 = arith.subf %177, %180 : vector<16x32xf32>
    %182 = math.exp %181 : vector<16x32xf32>
    %cst_79 = arith.constant dense<0.000000e+00> : vector<16xf32>
    %183 = vector.multi_reduction <add>, %182, %cst_79 [1] : vector<16x32xf32> to vector<16xf32>
    %184 = vector.shape_cast %183 : vector<16xf32> to vector<16x1xf32>
    %185 = tpu.reciprocal %184 {approx = true} : vector<16x1xf32> -> vector<16x1xf32>
    %186 = vector.broadcast %185 : vector<16x1xf32> to vector<16x32xf32>
    %187 = arith.mulf %182, %186 : vector<16x32xf32>
    %cst_80 = arith.constant dense<0.000000e+00> : vector<16x8xf32>
    %188 = tpu.matmul %187, %176, %cst_80 {dimension_numbers = #tpu.dot_dimension_numbers<[1], [0], [0], [1], [0, 0, 1, 1], [], []>} : vector<16x32xf32>, vector<32x8xf32>, vector<16x8xf32> -> vector<16x8xf32>
    %189 = vector.extract_strided_slice %136 {offsets = [16, 0], sizes = [8, 32], strides = [1, 1]} : vector<32x32xf32> to vector<8x32xf32>
    %cst_81 = arith.constant dense<0.000000e+00> : vector<16x32xf32>
    %190 = tpu.matmul %188, %189, %cst_81 {dimension_numbers = #tpu.dot_dimension_numbers<[1], [0], [0], [1], [0, 0, 1, 1], [], []>} : vector<16x8xf32>, vector<8x32xf32>, vector<16x32xf32> -> vector<16x32xf32>
    %191 = arith.addf %173, %190 : vector<16x32xf32>
    %192 = vector.extract_strided_slice %125 {offsets = [0, 24], sizes = [16, 8], strides = [1, 1]} : vector<16x32xf32> to vector<16x8xf32>
    %193 = vector.extract_strided_slice %133 {offsets = [0, 24], sizes = [32, 8], strides = [1, 1]} : vector<32x32xf32> to vector<32x8xf32>
    %194 = vector.extract_strided_slice %134 {offsets = [0, 24], sizes = [32, 8], strides = [1, 1]} : vector<32x32xf32> to vector<32x8xf32>
    %cst_82 = arith.constant dense<0.000000e+00> : vector<16x32xf32>
    %195 = tpu.matmul %192, %193, %cst_82 {dimension_numbers = #tpu.dot_dimension_numbers<[1], [1], [0], [0], [0, 0, 1, 0], [], []>} : vector<16x8xf32>, vector<32x8xf32>, vector<16x32xf32> -> vector<16x32xf32>
    %cst_83 = arith.constant dense<0xFF800000> : vector<16xf32>
    %196 = vector.multi_reduction <maximumf>, %195, %cst_83 [1] : vector<16x32xf32> to vector<16xf32>
    %197 = vector.shape_cast %196 : vector<16xf32> to vector<16x1xf32>
    %198 = vector.broadcast %197 : vector<16x1xf32> to vector<16x32xf32>
    %199 = arith.subf %195, %198 : vector<16x32xf32>
    %200 = math.exp %199 : vector<16x32xf32>
    %cst_84 = arith.constant dense<0.000000e+00> : vector<16xf32>
    %201 = vector.multi_reduction <add>, %200, %cst_84 [1] : vector<16x32xf32> to vector<16xf32>
    %202 = vector.shape_cast %201 : vector<16xf32> to vector<16x1xf32>
    %203 = tpu.reciprocal %202 {approx = true} : vector<16x1xf32> -> vector<16x1xf32>
    %204 = vector.broadcast %203 : vector<16x1xf32> to vector<16x32xf32>
    %205 = arith.mulf %200, %204 : vector<16x32xf32>
    %cst_85 = arith.constant dense<0.000000e+00> : vector<16x8xf32>
    %206 = tpu.matmul %205, %194, %cst_85 {dimension_numbers = #tpu.dot_dimension_numbers<[1], [0], [0], [1], [0, 0, 1, 1], [], []>} : vector<16x32xf32>, vector<32x8xf32>, vector<16x8xf32> -> vector<16x8xf32>
    %207 = vector.extract_strided_slice %136 {offsets = [24, 0], sizes = [8, 32], strides = [1, 1]} : vector<32x32xf32> to vector<8x32xf32>
    %cst_86 = arith.constant dense<0.000000e+00> : vector<16x32xf32>
    %208 = tpu.matmul %206, %207, %cst_86 {dimension_numbers = #tpu.dot_dimension_numbers<[1], [0], [0], [1], [0, 0, 1, 1], [], []>} : vector<16x8xf32>, vector<8x32xf32>, vector<16x32xf32> -> vector<16x32xf32>
    %209 = arith.addf %191, %208 : vector<16x32xf32>
    %210 = vector.broadcast %138 : vector<1x32xf32> to vector<16x32xf32>
    %211 = arith.addf %209, %210 : vector<16x32xf32>
    %212 = arith.addf %118, %211 : vector<16x32xf32>
    %c0_87 = arith.constant 0 : index
    %c0_88 = arith.constant 0 : index
    %c0_89 = arith.constant 0 : index
    %213 = vector.load %arg21[%c0_87, %c0_88, %c0_89] : memref<1x1x32xf32, #tpu.memory_space<vmem>>, vector<1x1x32xf32>
    %214 = vector.shape_cast %213 : vector<1x1x32xf32> to vector<1x32xf32>
    %c0_90 = arith.constant 0 : index
    %c0_91 = arith.constant 0 : index
    %c0_92 = arith.constant 0 : index
    %215 = vector.load %arg22[%c0_90, %c0_91, %c0_92] : memref<1x1x32xf32, #tpu.memory_space<vmem>>, vector<1x1x32xf32>
    %216 = vector.shape_cast %215 : vector<1x1x32xf32> to vector<1x32xf32>
    %cst_93 = arith.constant dense<0.000000e+00> : vector<16xf32>
    %217 = vector.multi_reduction <add>, %212, %cst_93 [1] : vector<16x32xf32> to vector<16xf32>
    %218 = vector.shape_cast %217 : vector<16xf32> to vector<16x1xf32>
    %cst_94 = arith.constant 3.200000e+01 : f32
    %219 = vector.broadcast %cst_94 : f32 to vector<16x1xf32>
    %220 = arith.divf %218, %219 : vector<16x1xf32>
    %221 = arith.mulf %212, %212 : vector<16x32xf32>
    %cst_95 = arith.constant dense<0.000000e+00> : vector<16xf32>
    %222 = vector.multi_reduction <add>, %221, %cst_95 [1] : vector<16x32xf32> to vector<16xf32>
    %223 = vector.shape_cast %222 : vector<16xf32> to vector<16x1xf32>
    %cst_96 = arith.constant 3.200000e+01 : f32
    %224 = vector.broadcast %cst_96 : f32 to vector<16x1xf32>
    %225 = arith.divf %223, %224 : vector<16x1xf32>
    %226 = arith.mulf %220, %220 : vector<16x1xf32>
    %227 = arith.subf %225, %226 : vector<16x1xf32>
    %228 = vector.broadcast %220 : vector<16x1xf32> to vector<16x32xf32>
    %229 = arith.subf %212, %228 : vector<16x32xf32>
    %cst_97 = arith.constant 9.99999974E-6 : f32
    %230 = vector.broadcast %cst_97 : f32 to vector<16x1xf32>
    %231 = arith.addf %227, %230 : vector<16x1xf32>
    %232 = math.rsqrt %231 : vector<16x1xf32>
    %233 = vector.broadcast %232 : vector<16x1xf32> to vector<16x32xf32>
    %234 = arith.mulf %229, %233 : vector<16x32xf32>
    %235 = vector.broadcast %214 : vector<1x32xf32> to vector<16x32xf32>
    %236 = arith.mulf %234, %235 : vector<16x32xf32>
    %237 = vector.broadcast %216 : vector<1x32xf32> to vector<16x32xf32>
    %238 = arith.addf %236, %237 : vector<16x32xf32>
    %239 = arith.truncf %238 : vector<16x32xf32> to vector<16x32xbf16>
    %c0_98 = arith.constant 0 : index
    %c0_99 = arith.constant 0 : index
    %c0_100 = arith.constant 0 : index
    %240 = vector.load %arg15[%c0_98, %c0_99, %c0_100] : memref<1x32x2048xbf16, #tpu.memory_space<vmem>>, vector<1x32x2048xbf16>
    %241 = vector.shape_cast %240 : vector<1x32x2048xbf16> to vector<32x2048xbf16>
    %cst_101 = arith.constant dense<0.000000e+00> : vector<16x2048xf32>
    %242 = tpu.matmul %239, %241, %cst_101 {dimension_numbers = #tpu.dot_dimension_numbers<[1], [0], [0], [1], [0, 0, 1, 1], [], []>} : vector<16x32xbf16>, vector<32x2048xbf16>, vector<16x2048xf32> -> vector<16x2048xf32>
    %c0_102 = arith.constant 0 : index
    %c0_103 = arith.constant 0 : index
    %c0_104 = arith.constant 0 : index
    %243 = vector.load %arg16[%c0_102, %c0_103, %c0_104] : memref<1x1x2048xf32, #tpu.memory_space<vmem>>, vector<1x1x2048xf32>
    %244 = vector.shape_cast %243 : vector<1x1x2048xf32> to vector<1x2048xf32>
    %245 = vector.broadcast %244 : vector<1x2048xf32> to vector<16x2048xf32>
    %246 = arith.addf %242, %245 : vector<16x2048xf32>
    %cst_105 = arith.constant 0.000000e+00 : f32
    %247 = vector.broadcast %cst_105 : f32 to vector<16x2048xf32>
    %248 = arith.maximumf %246, %247 : vector<16x2048xf32>
    %249 = arith.truncf %248 : vector<16x2048xf32> to vector<16x2048xbf16>
    %c0_106 = arith.constant 0 : index
    %c0_107 = arith.constant 0 : index
    %c0_108 = arith.constant 0 : index
    %250 = vector.load %arg17[%c0_106, %c0_107, %c0_108] : memref<1x2048x32xbf16, #tpu.memory_space<vmem>>, vector<1x2048x32xbf16>
    %251 = vector.shape_cast %250 : vector<1x2048x32xbf16> to vector<2048x32xbf16>
    %cst_109 = arith.constant dense<0.000000e+00> : vector<16x32xf32>
    %252 = tpu.matmul %249, %251, %cst_109 {dimension_numbers = #tpu.dot_dimension_numbers<[1], [0], [0], [1], [0, 0, 1, 1], [], []>} : vector<16x2048xbf16>, vector<2048x32xbf16>, vector<16x32xf32> -> vector<16x32xf32>
    %c0_110 = arith.constant 0 : index
    %c0_111 = arith.constant 0 : index
    %c0_112 = arith.constant 0 : index
    %253 = vector.load %arg18[%c0_110, %c0_111, %c0_112] : memref<1x1x32xf32, #tpu.memory_space<vmem>>, vector<1x1x32xf32>
    %254 = vector.shape_cast %253 : vector<1x1x32xf32> to vector<1x32xf32>
    %255 = vector.broadcast %254 : vector<1x32xf32> to vector<16x32xf32>
    %256 = arith.addf %252, %255 : vector<16x32xf32>
    %257 = arith.addf %238, %256 : vector<16x32xf32>
    %c0_113 = arith.constant 0 : index
    %c0_114 = arith.constant 0 : index
    %c0_115 = arith.constant 0 : index
    %258 = vector.load %arg23[%c0_113, %c0_114, %c0_115] : memref<1x1x32xf32, #tpu.memory_space<vmem>>, vector<1x1x32xf32>
    %259 = vector.shape_cast %258 : vector<1x1x32xf32> to vector<1x32xf32>
    %c0_116 = arith.constant 0 : index
    %c0_117 = arith.constant 0 : index
    %c0_118 = arith.constant 0 : index
    %260 = vector.load %arg24[%c0_116, %c0_117, %c0_118] : memref<1x1x32xf32, #tpu.memory_space<vmem>>, vector<1x1x32xf32>
    %261 = vector.shape_cast %260 : vector<1x1x32xf32> to vector<1x32xf32>
    %cst_119 = arith.constant dense<0.000000e+00> : vector<16xf32>
    %262 = vector.multi_reduction <add>, %257, %cst_119 [1] : vector<16x32xf32> to vector<16xf32>
    %263 = vector.shape_cast %262 : vector<16xf32> to vector<16x1xf32>
    %cst_120 = arith.constant 3.200000e+01 : f32
    %264 = vector.broadcast %cst_120 : f32 to vector<16x1xf32>
    %265 = arith.divf %263, %264 : vector<16x1xf32>
    %266 = arith.mulf %257, %257 : vector<16x32xf32>
    %cst_121 = arith.constant dense<0.000000e+00> : vector<16xf32>
    %267 = vector.multi_reduction <add>, %266, %cst_121 [1] : vector<16x32xf32> to vector<16xf32>
    %268 = vector.shape_cast %267 : vector<16xf32> to vector<16x1xf32>
    %cst_122 = arith.constant 3.200000e+01 : f32
    %269 = vector.broadcast %cst_122 : f32 to vector<16x1xf32>
    %270 = arith.divf %268, %269 : vector<16x1xf32>
    %271 = arith.mulf %265, %265 : vector<16x1xf32>
    %272 = arith.subf %270, %271 : vector<16x1xf32>
    %273 = vector.broadcast %265 : vector<16x1xf32> to vector<16x32xf32>
    %274 = arith.subf %257, %273 : vector<16x32xf32>
    %cst_123 = arith.constant 9.99999974E-6 : f32
    %275 = vector.broadcast %cst_123 : f32 to vector<16x1xf32>
    %276 = arith.addf %272, %275 : vector<16x1xf32>
    %277 = math.rsqrt %276 : vector<16x1xf32>
    %278 = vector.broadcast %277 : vector<16x1xf32> to vector<16x32xf32>
    %279 = arith.mulf %274, %278 : vector<16x32xf32>
    %280 = vector.broadcast %259 : vector<1x32xf32> to vector<16x32xf32>
    %281 = arith.mulf %279, %280 : vector<16x32xf32>
    %282 = vector.broadcast %261 : vector<1x32xf32> to vector<16x32xf32>
    %283 = arith.addf %281, %282 : vector<16x32xf32>
    %c0_124 = arith.constant 0 : index
    %c0_125 = arith.constant 0 : index
    %284 = vector.load %arg28[%c0_124, %c0_125] : memref<16x32xf32, #tpu.memory_space<vmem>>, vector<16x32xf32>
    tpu.vector_store %arg28[%c0_124, %c0_125], %283 {strides = array<i32>} : memref<16x32xf32, #tpu.memory_space<vmem>>, vector<16x32xf32>,
    %c3_i32 = arith.constant 3 : i32
    %285 = arith.cmpi eq, %arg0, %c3_i32 : i32
    %286 = arith.extui %285 : i1 to i32
    %c0_i32_126 = arith.constant 0 : i32
    %287 = arith.cmpi ne, %286, %c0_i32_126 : i32
    scf.if %287 {
      %c0_127 = arith.constant 0 : index
      %c0_128 = arith.constant 0 : index
      %288 = vector.load %arg25[%c0_127, %c0_128] : memref<32x128xf32, #tpu.memory_space<vmem>>, vector<32x128xf32>
      %cst_129 = arith.constant dense<0.000000e+00> : vector<16x128xf32>
      %289 = tpu.matmul %283, %288, %cst_129 {dimension_numbers = #tpu.dot_dimension_numbers<[1], [0], [0], [1], [0, 0, 1, 1], [], []>} : vector<16x32xf32>, vector<32x128xf32>, vector<16x128xf32> -> vector<16x128xf32>
      %c0_130 = arith.constant 0 : index
      %c0_131 = arith.constant 0 : index
      %290 = vector.load %arg26[%c0_130, %c0_131] : memref<1x128xf32, #tpu.memory_space<vmem>>, vector<1x128xf32>
      %291 = vector.broadcast %290 : vector<1x128xf32> to vector<16x128xf32>
      %292 = arith.addf %289, %291 : vector<16x128xf32>
      %c0_132 = arith.constant 0 : index
      %c0_133 = arith.constant 0 : index
      %293 = vector.load %arg27[%c0_132, %c0_133] : memref<16x128xf32, #tpu.memory_space<vmem>>, vector<16x128xf32>
      tpu.vector_store %arg27[%c0_132, %c0_133], %292 {strides = array<i32>} : memref<16x128xf32, #tpu.memory_space<vmem>>, vector<16x128xf32>,
    } else {
    }
    return
  }
  func.func @transform_0(%arg0: i32) -> (i32, i32) {
    %c0_i32 = arith.constant 0 : i32
    %c0_i32_0 = arith.constant 0 : i32
    %c0_i32_1 = arith.constant 0 : i32
    return %c0_i32, %c0_i32_0 : i32, i32
  }
  func.func @transform_1(%arg0: i32) -> (i32, i32) {
    %c0_i32 = arith.constant 0 : i32
    %c0_i32_0 = arith.constant 0 : i32
    %c0_i32_1 = arith.constant 0 : i32
    return %c0_i32, %c0_i32_0 : i32, i32
  }
  func.func @transform_2(%arg0: i32) -> (i32, i32) {
    %c0_i32 = arith.constant 0 : i32
    %c0_i32_0 = arith.constant 0 : i32
    %c0_i32_1 = arith.constant 0 : i32
    return %c0_i32, %c0_i32_0 : i32, i32
  }
  func.func @transform_3(%arg0: i32) -> (i32, i32) {
    %c0_i32 = arith.constant 0 : i32
    %c0_i32_0 = arith.constant 0 : i32
    %c0_i32_1 = arith.constant 0 : i32
    return %c0_i32, %c0_i32_0 : i32, i32
  }
  func.func @transform_4(%arg0: i32) -> (i32, i32, i32) {
    %c0_i32 = arith.constant 0 : i32
    %c0_i32_0 = arith.constant 0 : i32
    %c0_i32_1 = arith.constant 0 : i32
    return %arg0, %c0_i32, %c0_i32_0 : i32, i32, i32
  }
  func.func @transform_5(%arg0: i32) -> (i32, i32, i32) {
    %c0_i32 = arith.constant 0 : i32
    %c0_i32_0 = arith.constant 0 : i32
    %c0_i32_1 = arith.constant 0 : i32
    return %arg0, %c0_i32, %c0_i32_0 : i32, i32, i32
  }
  func.func @transform_6(%arg0: i32) -> (i32, i32, i32) {
    %c0_i32 = arith.constant 0 : i32
    %c0_i32_0 = arith.constant 0 : i32
    %c0_i32_1 = arith.constant 0 : i32
    return %arg0, %c0_i32, %c0_i32_0 : i32, i32, i32
  }
  func.func @transform_7(%arg0: i32) -> (i32, i32, i32) {
    %c0_i32 = arith.constant 0 : i32
    %c0_i32_0 = arith.constant 0 : i32
    %c0_i32_1 = arith.constant 0 : i32
    return %arg0, %c0_i32, %c0_i32_0 : i32, i32, i32
  }
  func.func @transform_8(%arg0: i32) -> (i32, i32, i32) {
    %c0_i32 = arith.constant 0 : i32
    %c0_i32_0 = arith.constant 0 : i32
    %c0_i32_1 = arith.constant 0 : i32
    return %arg0, %c0_i32, %c0_i32_0 : i32, i32, i32
  }
  func.func @transform_9(%arg0: i32) -> (i32, i32, i32) {
    %c0_i32 = arith.constant 0 : i32
    %c0_i32_0 = arith.constant 0 : i32
    %c0_i32_1 = arith.constant 0 : i32
    return %arg0, %c0_i32, %c0_i32_0 : i32, i32, i32
  }
  func.func @transform_10(%arg0: i32) -> (i32, i32, i32) {
    %c0_i32 = arith.constant 0 : i32
    %c0_i32_0 = arith.constant 0 : i32
    %c0_i32_1 = arith.constant 0 : i32
    return %arg0, %c0_i32, %c0_i32_0 : i32, i32, i32
  }
  func.func @transform_11(%arg0: i32) -> (i32, i32, i32) {
    %c0_i32 = arith.constant 0 : i32
    %c0_i32_0 = arith.constant 0 : i32
    %c0_i32_1 = arith.constant 0 : i32
    return %arg0, %c0_i32, %c0_i32_0 : i32, i32, i32
  }
  func.func @transform_12(%arg0: i32) -> (i32, i32, i32) {
    %c0_i32 = arith.constant 0 : i32
    %c0_i32_0 = arith.constant 0 : i32
    %c0_i32_1 = arith.constant 0 : i32
    return %arg0, %c0_i32, %c0_i32_0 : i32, i32, i32
  }
  func.func @transform_13(%arg0: i32) -> (i32, i32, i32) {
    %c0_i32 = arith.constant 0 : i32
    %c0_i32_0 = arith.constant 0 : i32
    %c0_i32_1 = arith.constant 0 : i32
    return %arg0, %c0_i32, %c0_i32_0 : i32, i32, i32
  }
  func.func @transform_14(%arg0: i32) -> (i32, i32, i32) {
    %c0_i32 = arith.constant 0 : i32
    %c0_i32_0 = arith.constant 0 : i32
    %c0_i32_1 = arith.constant 0 : i32
    return %arg0, %c0_i32, %c0_i32_0 : i32, i32, i32
  }
  func.func @transform_15(%arg0: i32) -> (i32, i32, i32) {
    %c0_i32 = arith.constant 0 : i32
    %c0_i32_0 = arith.constant 0 : i32
    %c0_i32_1 = arith.constant 0 : i32
    return %arg0, %c0_i32, %c0_i32_0 : i32, i32, i32
  }
  func.func @transform_16(%arg0: i32) -> (i32, i32, i32) {
    %c0_i32 = arith.constant 0 : i32
    %c0_i32_0 = arith.constant 0 : i32
    %c0_i32_1 = arith.constant 0 : i32
    return %arg0, %c0_i32, %c0_i32_0 : i32, i32, i32
  }
  func.func @transform_17(%arg0: i32) -> (i32, i32, i32) {
    %c0_i32 = arith.constant 0 : i32
    %c0_i32_0 = arith.constant 0 : i32
    %c0_i32_1 = arith.constant 0 : i32
    return %arg0, %c0_i32, %c0_i32_0 : i32, i32, i32
  }
  func.func @transform_18(%arg0: i32) -> (i32, i32, i32) {
    %c0_i32 = arith.constant 0 : i32
    %c0_i32_0 = arith.constant 0 : i32
    %c0_i32_1 = arith.constant 0 : i32
    return %arg0, %c0_i32, %c0_i32_0 : i32, i32, i32
  }
  func.func @transform_19(%arg0: i32) -> (i32, i32, i32) {
    %c0_i32 = arith.constant 0 : i32
    %c0_i32_0 = arith.constant 0 : i32
    %c0_i32_1 = arith.constant 0 : i32
    return %arg0, %c0_i32, %c0_i32_0 : i32, i32, i32
  }
  func.func @transform_20(%arg0: i32) -> (i32, i32, i32) {
    %c0_i32 = arith.constant 0 : i32
    %c0_i32_0 = arith.constant 0 : i32
    %c0_i32_1 = arith.constant 0 : i32
    return %arg0, %c0_i32, %c0_i32_0 : i32, i32, i32
  }
  func.func @transform_21(%arg0: i32) -> (i32, i32, i32) {
    %c0_i32 = arith.constant 0 : i32
    %c0_i32_0 = arith.constant 0 : i32
    %c0_i32_1 = arith.constant 0 : i32
    return %arg0, %c0_i32, %c0_i32_0 : i32, i32, i32
  }
  func.func @transform_22(%arg0: i32) -> (i32, i32, i32) {
    %c0_i32 = arith.constant 0 : i32
    %c0_i32_0 = arith.constant 0 : i32
    %c0_i32_1 = arith.constant 0 : i32
    return %arg0, %c0_i32, %c0_i32_0 : i32, i32, i32
  }
  func.func @transform_23(%arg0: i32) -> (i32, i32, i32) {
    %c0_i32 = arith.constant 0 : i32
    %c0_i32_0 = arith.constant 0 : i32
    %c0_i32_1 = arith.constant 0 : i32
    return %arg0, %c0_i32, %c0_i32_0 : i32, i32, i32
  }
  func.func @transform_24(%arg0: i32) -> (i32, i32) {
    %c0_i32 = arith.constant 0 : i32
    %c0_i32_0 = arith.constant 0 : i32
    %c0_i32_1 = arith.constant 0 : i32
    return %c0_i32, %c0_i32_0 : i32, i32
  }
  func.func @transform_25(%arg0: i32) -> (i32, i32) {
    %c0_i32 = arith.constant 0 : i32
    %c0_i32_0 = arith.constant 0 : i32
    %c0_i32_1 = arith.constant 0 : i32
    return %c0_i32, %c0_i32_0 : i32, i32
  }
  func.func @transform_26(%arg0: i32) -> (i32, i32) {
    %c0_i32 = arith.constant 0 : i32
    %c0_i32_0 = arith.constant 0 : i32
    %c0_i32_1 = arith.constant 0 : i32
    return %c0_i32, %c0_i32_0 : i32, i32
  }
}

</mosaic_0001>

<bundles_post_ra>
// kernel: eeg_decoder_v2_forward.1
= control target key start
LH: loop header
LB: loop body
LE: loop exit
PB: predicated region body
PF: predicated region fallthrough
CT: control target
= control target key end

     0   :  { %s8718_s0 = inlined_call_operand.vmem [shape: f32[16,32], index: 0, kind: input, shape index: {}]   ;;  %s8719_s1 = inlined_call_operand.vmem [shape: f32[32,32], index: 1, kind: input, shape index: {}]   ;;  %s8720_s2 = inlined_call_operand.vmem [shape: f32[32,32], index: 2, kind: input, shape index: {}]   ;;  %s8721_s3 = inlined_call_operand.vmem [shape: f32[1,32], index: 3, kind: input, shape index: {}]   ;;  %s8722_s4 = inlined_call_operand.vmem [shape: f32[4,32,96], index: 4, kind: input, shape index: {}]   ;;  %s8723_s5 = inlined_call_operand.vmem [shape: f32[4,1,96], index: 5, kind: input, shape index: {}]   ;;  %s8724_s6 = inlined_call_operand.vmem [shape: f32[4,32,32], index: 6, kind: input, shape index: {}]   ;;  %s8725_s7 = inlined_call_operand.vmem [shape: f32[4,1,32], index: 7, kind: input, shape index: {}]   ;;  %s8726_s8 = inlined_call_operand.vmem [shape: f32[4,32,32], index: 8, kind: input, shape index: {}]   ;;  %s8727_s9 = inlined_call_operand.vmem [shape: f32[4,1,32], index: 9, kind: input, shape index: {}]   ;;  %s8728_s10 = inlined_call_operand.vmem [shape: f32[4,32,64], index: 10, kind: input, shape index: {}]   ;;  %s8729_s11 = inlined_call_operand.vmem [shape: f32[4,1,64], index: 11, kind: input, shape index: {}]   ;;  %s8730_s12 = inlined_call_operand.vmem [shape: f32[4,32,32], index: 12, kind: input, shape index: {}]   ;;  %s8731_s13 = inlined_call_operand.vmem [shape: f32[4,1,32], index: 13, kind: input, shape index: {}]   ;;  %s8732_s14 = inlined_call_operand.vmem [shape: bf16[4,32,2048], index: 14, kind: input, shape index: {}]   ;;  %s8733_s15 = inlined_call_operand.vmem [shape: f32[4,1,2048], index: 15, kind: input, shape index: {}]   ;;  %s8734_s16 = inlined_call_operand.vmem [shape: bf16[4,2048,32], index: 16, kind: input, shape index: {}]   ;;  %s8735_s17 = inlined_call_operand.vmem [shape: f32[4,1,32], index: 17, kind: input, shape index: {}]   ;;  %s8736_s18 = inlined_call_operand.vmem [shape: f32[4,1,32], index: 18, kind: input, shape index: {}]   ;;  %s8737_s19 = inlined_call_operand.vmem [shape: f32[4,1,32], index: 19, kind: input, shape index: {}]   ;;  %s8738_s20 = inlined_call_operand.vmem [shape: f32[4,1,32], index: 20, kind: input, shape index: {}]   ;;  %s8739_s21 = inlined_call_operand.vmem [shape: f32[4,1,32], index: 21, kind: input, shape index: {}]   ;;  %s8740_s22 = inlined_call_operand.vmem [shape: f32[4,1,32], index: 22, kind: input, shape index: {}]   ;;  %s8741_s23 = inlined_call_operand.vmem [shape: f32[4,1,32], index: 23, kind: input, shape index: {}]   ;;  %s8742_s24 = inlined_call_operand.vmem [shape: f32[32,128], index: 24, kind: input, shape index: {}]   ;;  %s8743_s25 = inlined_call_operand.vmem [shape: f32[1,128], index: 25, kind: input, shape index: {}]   ;;  %s8744_s26 = inlined_call_operand.hbm [shape: f32[16,128], index: 26, kind: output, shape index: {}]  }
   0x1   :  { %8755 = sst [smem:[#allocation12_spill]] %s8718_s0 }
   0x2   :  { %8756 = sst [smem:[#allocation13_spill]] %s8719_s1 }
   0x3   :  { %8757 = sst [smem:[#allocation14_spill]] %s8720_s2 }
   0x4   :  { %8758 = sst [smem:[#allocation15_spill]] %s8721_s3 }
   0x5   :  { %8759 = sst [smem:[#allocation16_spill]] %s8722_s4 }
   0x6   :  { %8760 = sst [smem:[#allocation17_spill]] %s8723_s5 }
   0x7   :  { %8761 = sst [smem:[#allocation18_spill]] %s8724_s6 }
   0x8   :  { %8762 = sst [smem:[#allocation19_spill]] %s8725_s7 }
   0x9   :  { %8763 = sst [smem:[#allocation20_spill]] %s8726_s8 }
   0xa   :  { %8764 = sst [smem:[#allocation21_spill]] %s8727_s9 }
   0xb   :  { %8765 = sst [smem:[#allocation22_spill]] %s8728_s10 }
   0xc   :  { %8766 = sst [smem:[#allocation23_spill]] %s8730_s12 }
   0xd   :  { %8767 = sst [smem:[#allocation24_spill]] %s8732_s14 }
   0xe   :  { %8768 = sst [smem:[#allocation25_spill]] %s8733_s15 }
   0xf   :  { %8769 = sst [smem:[#allocation26_spill]] %s8734_s16 }
  0x10   :  { %8770 = sst [smem:[#allocation27_spill]] %s8741_s23 }
  0x11   :  { %8771 = sst [smem:[#allocation28_spill]] %s8742_s24 }
  0x12   :  { %8772 = sst [smem:[#allocation29_spill]] %s8743_s25 }
  0x13   :  { %8773 = sst [smem:[#allocation30_spill]] %s8744_s26 }
  0x14   :  { %31 = vsyncpa [#allocation5], 0  ;;  %s7820_s27 = smov 0  }
  0x15 LB: > { %8774 = sst [smem:[#allocation7_spill]] %s7668_s27  ;;  %s7826_s3 = sadd.s32 4294967295, %s7668_s27   ;;  %s7668_s27 = sphi %s7820_s27, %s37_s27  }
  0x16   : > { %8775 = sst [smem:[#allocation8_spill]] %s7826_s3  ;;  %p6507_p0 = scmp.ge.s32.totalorder %s7668_s27, 1 }
  0x17   : > { %p873_p1 = scmp.lt.s32.totalorder %s7668_s27, 5 }
  0x19   : > { %p874_p2 = pnand %p6507_p0, %p873_p1 }
  0x1b   : > { %877 = sbr.rel (%p874_p2) target bundleno = 7244 (0x1c4c), region = 124 }
  0x20   : > { %p1008_p3 = scmp.lt.s32.totalorder %s7826_s3, 3  ;;  %s8777_s2 = sld [smem:[#allocation16_spill]] }
  0x21   : > { %s8778_s1 = sld [smem:[#allocation18_spill]] }
  0x22   : > { %s7832_s7 = scalar_select %p1008_p3, %s7826_s3, 3 }
  0x23   : > { %s8781_s4 = sld [smem:[#allocation20_spill]] }
  0x24   : > { %s6805_s28 = sshll.u32 %s7832_s7, 5  ;;  %s8785_s12 = sld [smem:[#allocation23_spill]] }
  0x25   : > { %s8786_s14 = sld [smem:[#allocation24_spill]]  ;;  %s6811_s24 = sshll.u32 %s7832_s7, 10 }
  0x26   : > { %s7842_s5 = scalar_lea.vmem %s8777_s2, %s6805_s28  ;;  %s6810_s2 = sshll.u32 %s7832_s7, 8 }
  0x27   : > { %s7847_s27 = scalar_lea.vmem %s8778_s1, %s6805_s28  ;;  %s8784_s1 = sld [smem:[#allocation22_spill]] }
  0x28   : > { %8779 = sst [smem:[#allocation9_spill]] %s7847_s27  ;;  %s1079_s3 = scalar_lea.vmem %s8740_s22, %s7832_s7 }
  0x29   : > { %s7856_s29 = scalar_lea.vmem %s8781_s4, %s6805_s28  ;;  %s8787_s15 = sld [smem:[#allocation25_spill]] }
  0x2a   : > { %8782 = sst [smem:[#allocation10_spill]] %s7856_s29  ;;  %s7874_s4 = scalar_lea.vmem %s8785_s12, %s6805_s28 }
  0x2b   : > { %s7884_s6 = scalar_lea.vmem %s8786_s14, %s6810_s2  ;;  %s8789_s16 = sld [smem:[#allocation26_spill]] }
  0x2c   : > { %s8791_s2 = sld [smem:[#allocation8_spill]] }
  0x2d   : > { %s7865_s27 = scalar_lea.vmem %s8784_s1, %s6805_s28  ;;  %s6520_s1 = sshll.u32 %s7832_s7, 4 }
  0x2f   : > { %s7890_s26 = scalar_lea.vmem %s8787_s15, %s6520_s1  ;;  %s1073_s15 = scalar_lea.vmem %s8738_s20, %s7832_s7 }
  0x30   : > { %8788 = sst [smem:[#allocation11_spill]] %s7890_s26 }
  0x31   : > { %s7896_s8 = scalar_lea.vmem %s8789_s16, %s6811_s24  ;;  %s1076_s24 = scalar_lea.vmem %s8739_s21, %s7832_s7 }
  0x32   : > { %p6523_p4 = scmp.ne.s32.totalorder %s8791_s2, 0 }
  0x33   : > { %s8792_s29 = sld [smem:[#allocation12_spill]] (!%p6523_p4) }
  0x34   : > { %1087 = sbr.rel (%p6523_p4) target bundleno = 707 (0x2c3), region = 128  ;;  %s8793_s16 = sld [smem:[#allocation13_spill]] (!%p6523_p4) }
  0x35   : > { %s8794_s25 = sld [smem:[#allocation14_spill]] (!%p6523_p4) }
  0x36   : > { %s8795_s26 = sld [smem:[#allocation15_spill]] (!%p6523_p4) }
  0x39   : > { %v1088_v0 = vld [vmem:[%s8792_s29] sm:$0xff]  ;;  %v1089_v1 = vld [vmem:[%s8792_s29 + $0x8] sm:$0xff]  ;;  %vm1090_vm0 = vcmask 261120  }
  0x3a   : > { %v1096_v2 = vld [vmem:[%s8793_s16 + $0x18] sm:$0xff]  ;;  %1091 = vst.msk [vmem:[#allocation2] sm:$0xff] %vm1090_vm0, %v1088_v0  ;;  %1092 = vst.msk [vmem:[#allocation2 + $0x8] sm:$0xff] %vm1090_vm0, %v1089_v1  ;;  %v1095_v3 = vld [vmem:[%s8793_s16 + $0x10] sm:$0xff] }
  0x3b   : > { %7134 = vmatprep.subr.msk.mxu0 %vm1090_vm0, %v1096_v2  ;;  %v1093_v4 = vld [vmem:[%s8793_s16] sm:$0xff]  ;;  %v1094_v5 = vld [vmem:[%s8793_s16 + $0x8] sm:$0xff]  ;;  %v1242_v24 = vld [vmem:[%s8794_s25 + $0x18] sm:$0xff] }
  0x3c   : > { %7135 = vmatpush3.xpose.msk.msra.mxu0 %vm1090_vm0, %v1096_v2  ;;  %7142 = vmatprep.mubr.msk.f32.mxu0 %vm1090_vm0, %v1093_v4  ;;  %v1241_v25 = vld [vmem:[%s8794_s25 + $0x10] sm:$0xff]  ;;  %v1240_v26 = vld [vmem:[%s8794_s25 + $0x8] sm:$0xff]  ;;  %v1239_v27 = vld [vmem:[%s8794_s25] sm:$0xff] }
  0x3d   : > { %7136 = vmatprep.subr.msk.mxu0 %vm1090_vm0, %v1095_v3  ;;  %7148 = vmatprep.subr.mxu1 %v1242_v24  ;;  %v6532_v55 = vld [vmem:[%s8795_s26] ss:$0 sm:$0xff] }
  0x3e   : > { %7149 = vmatpush3.msra.mxu1 %v1242_v24 }
  0x3f   : > { %7150 = vmatprep.subr.mxu1 %v1241_v25 }
  0x40   : > { %7137 = vmatpush3.xpose.msk.msra.mxu0 %vm1090_vm0, %v1095_v3  ;;  %7151 = vmatpush3.msra.mxu1 %v1241_v25 }
  0x41   : > { %7138 = vmatprep.subr.msk.mxu0 %vm1090_vm0, %v1094_v5  ;;  %7152 = vmatprep.subr.mxu1 %v1240_v26 }
  0x42   : > { %7153 = vmatpush3.msra.mxu1 %v1240_v26 }
  0x43   : > { %7154 = vmatprep.subr.mxu1 %v1239_v27 }
  0x44   : > { %7139 = vmatpush3.xpose.msk.msra.mxu0 %vm1090_vm0, %v1094_v5  ;;  %7155 = vmatpush3.msra.mxu1 %v1239_v27 }
  0x45   : > { %7140 = vmatprep.subr.msk.mxu0 %vm1090_vm0, %v1093_v4 }
  0x48   : > { %7141 = vmatpush3.xpose.msk.msra.mxu0 %vm1090_vm0, %v1093_v4 }
  0x4b   : > { %7143 = vmatmul.mubr.msk.f32.vlgmr.msra.gmra.mxu0 %vm1090_vm0, %v1094_v5 }
  0x4c   : > { %7145 = vmatprep.mubr.msk.f32.mxu0 %vm1090_vm0, %v1095_v3 }
  0x4f   : > { %7146 = vmatmul.mubr.msk.f32.gmra.mxu0 %vm1090_vm0, %v1096_v2 }
 0x10b   : > { %v7144_v6 = vpop.f32.mrf.mxu0 }
 0x10c   : > { %v1195_v13 = vsel %vm1090_vm0, %v7144_v6, inf  ;;  %v1212_v21 = vsel %vm1090_vm0, %v7144_v6, -inf }
 0x10d   : > { %v1175_v7 = vpop.f32.mrf.mxu0 }
 0x10e   : > { %v1194_v9 = vsel %vm1090_vm0, %v1175_v7, inf  ;;  %v1211_v17 = vsel %vm1090_vm0, %v1175_v7, -inf }
 0x10f   : > { %v7959_v8 = vpop.f32.mrf.mxu0  ;;  %v1198_v15 = vmin.f32 %v1194_v9, %v1195_v13  ;;  %v1215_v22 = vmax.f32 %v1211_v17, %v1212_v21 }
 0x110   : > { %v1197_v14 = vsel %vm1090_vm0, %v7959_v8, inf  ;;  %v1214_v18 = vsel %vm1090_vm0, %v7959_v8, -inf }
 0x111   : > { %v1185_v10 = vpop.f32.mrf.mxu0 }
 0x112   : > { %v1196_v11 = vsel %vm1090_vm0, %v1185_v10, inf  ;;  %v1213_v12 = vsel %vm1090_vm0, %v1185_v10, -inf }
 0x113   : > { %v1199_v16 = vmin.f32 %v1196_v11, %v1197_v14  ;;  %v1216_v19 = vmax.f32 %v1213_v12, %v1214_v18 }
 0x115   : > { %v1200_v20 = vmin.f32 %v1198_v15, %v1199_v16  ;;  %v1217_v23 = vmax.f32 %v1215_v22, %v1216_v19 }
 0x117   : > { %1201 = vmin.xlane.f32.xlu0 %v1200_v20 }
 0x11b   : > { %1218 = vmax.xlane.f32.xlu0 %v1217_v23 }
 0x1a0   : > { %v1202_v28 = vpop.xlane.xlu0 %1201 }
 0x1a1   : > { %v1203_v29 = vrot.slane %v1202_v28, 4 }
 0x1a3   : > { %v1204_v30 = vmin.f32 %v1202_v28, %v1203_v29 }
 0x1a4   : > { %v1219_v31 = vpop.xlane.xlu0 %1218 }
 0x1a5   : > { %v1205_v32 = vrot.slane %v1204_v30, 2  ;;  %v1220_v33 = vrot.slane %v1219_v31, 4 }
 0x1a7   : > { %v1221_v34 = vmax.f32 %v1219_v31, %v1220_v33  ;;  %v1206_v35 = vmin.f32 %v1204_v30, %v1205_v32 }
 0x1a9   : > { %v1222_v36 = vrot.slane %v1221_v34, 2  ;;  %v1207_v37 = vrot.slane %v1206_v35, 1 }
 0x1ab   : > { %v1223_v38 = vmax.f32 %v1221_v34, %v1222_v36  ;;  %v1208_v39 = vmin.f32 %v1206_v35, %v1207_v37 }
 0x1ad   : > { %7393 = vpush %v1208_v39  ;;  %v1224_v40 = vrot.slane %v1223_v38, 1 }
 0x1af   : > { %v1225_v41 = vmax.f32 %v1223_v38, %v1224_v40 }
 0x1b1   : > { %7395 = vpush %v1225_v41 }
 0x1de   : > { %s7394_s12 = spop %7393 }
 0x1df   : > { %v1210_v42 = vstv %s7394_s12 }
 0x1e0   : > { %v1231_v46 = vsub.f32 %v7144_v6, %v1210_v42  ;;  %v1230_v47 = vsub.f32 %v1175_v7, %v1210_v42  ;;  %v1232_v49 = vsub.f32 %v1185_v10, %v1210_v42  ;;  %v1233_v53 = vsub.f32 %v7959_v8, %v1210_v42 }
 0x1e2   : > { %s7396_s14 = spop %7395 }
 0x1e3   : > { %v1227_v43 = vstv %s7396_s14 }
 0x1e4   : > { %v1228_v44 = vsub.f32 %v1227_v43, %v1210_v42 }
 0x1e6   : > { %v1229_v45 = vmax.f32 %v1228_v44, 1e-12 }
 0x1e8   : > { %7426 = vrcp.f32 %v1229_v45 }
 0x1f5   : > { %v7427_v48 = vpop.eup %7426 }
 0x1f6   : > { %v1235_v50 = vmul.f32 %v7427_v48, %v1230_v47  ;;  %v1236_v51 = vmul.f32 %v7427_v48, %v1231_v46  ;;  %v1237_v52 = vmul.f32 %v7427_v48, %v1232_v49  ;;  %v1238_v54 = vmul.f32 %v7427_v48, %v1233_v53 }
 0x1f8   : > { %7156 = vmatprep.mubr.msk.f32.mxu1 %vm1090_vm0, %v1235_v50 }
 0x1f9   : > { %7157 = vmatmul.mubr.msk.f32.vlgmr.msra.gmra.mxu1 %vm1090_vm0, %v1236_v51 }
 0x1fa   : > { %7159 = vmatprep.mubr.msk.f32.mxu1 %vm1090_vm0, %v1237_v52 }
 0x1fd   : > { %7160 = vmatmul.mubr.msk.f32.gmra.mxu1 %vm1090_vm0, %v1238_v54 }
 0x2b9   : > { %v7158_v56 = vpop.f32.mrf.mxu1 }
 0x2ba   : > { %v1334_v57 = vadd.f32 %v7158_v56, %v6532_v55 }
 0x2bb   : > { %v1328_v58 = vpop.f32.mrf.mxu1 }
 0x2bc   : > { %1348 = vst.msk [vmem:[#allocation3 + $0x8] sm:$0xff] %vm1090_vm0, %v1334_v57  ;;  %v1329_v59 = vadd.f32 %v6532_v55, %v1328_v58 }
 0x2bd   : > { %v7161_v60 = vpop.f32.mrf.mxu1 }
 0x2be   : > { %1347 = vst.msk [vmem:[#allocation3] sm:$0xff] %vm1090_vm0, %v1329_v59  ;;  %v1344_v61 = vadd.f32 %v7161_v60, %v6532_v55 }
 0x2bf   : > { %v1338_v62 = vpop.f32.mrf.mxu1 }
 0x2c0   : > { %1350 = vst.msk [vmem:[#allocation3 + $0x18] sm:$0xff] %vm1090_vm0, %v1344_v61  ;;  %v1339_v63 = vadd.f32 %v6532_v55, %v1338_v62 }
 0x2c2   : > { %1349 = vst.msk [vmem:[#allocation3 + $0x10] sm:$0xff] %vm1090_vm0, %v1339_v63 }
 0x2c3 PF: > { %v1360_v0 = vld [vmem:[%s7842_s5 + $0x18] sm:$0xff]  ;;  %v1359_v1 = vld [vmem:[%s7842_s5 + $0x10] sm:$0xff]  ;;  %vm1368_vm1 = vcmask 261120   ;;  %v1358_v2 = vld [vmem:[%s7842_s5 + $0x8] sm:$0xff]  ;;  %s8796_s2 = sld [smem:[#allocation17_spill]]  ;;  %vm1461_vm2 = vcmask 64512   ;;  %s8803_s0 = scalar_lea.vmem %s8737_s19, %s7832_s7 }
 0x2c4   : > { %7162 = vmatprep.subr.mxu0 %v1360_v0  ;;  %v1351_v3 = vld [vmem:[#allocation2] sm:$0xff]  ;;  %v1352_v5 = vld [vmem:[#allocation2 + $0x8] sm:$0xff]  ;;  %s7671_s9 = smov 96   ;;  %s7672_s12 = smov 120   ;;  %vm1545_vm3 = vcmask 130048  }
 0x2c5   : > { %7163 = vmatpush3.msra.mxu0 %v1360_v0  ;;  %v1357_v4 = vld [vmem:[%s7842_s5] sm:$0xff]  ;;  %7170 = vmatprep.mubr.msk.f32.mxu0 %vm1368_vm1, %v1351_v3  ;;  %s7670_s5 = smov 88   ;;  %s7673_s14 = smov 64  }
 0x2c6   : > { %7164 = vmatprep.subr.mxu0 %v1359_v1  ;;  %s7674_s10 = smov 56   ;;  %s7675_s1 = smov 80  }
 0x2c7   : > { %7165 = vmatpush3.msra.mxu0 %v1359_v1  ;;  %s7676_s26 = smov 112   ;;  %s7677_s23 = smov 72  }
 0x2c8   : > { %7166 = vmatprep.subr.mxu0 %v1358_v2  ;;  %s7678_s30 = smov 104  }
 0x2c9   : > { %7167 = vmatpush3.msra.mxu0 %v1358_v2  ;;  %s8797_s28 = scalar_lea.vmem %s8796_s2, %s7832_s7  ;;  %s8798_s2 = sld [smem:[#allocation9_spill]] }
 0x2ca   : > { %7168 = vmatprep.subr.mxu0 %v1357_v4  ;;  %v6537_v6 = vld [vmem:[%s8797_s28] ss:$0 sm:$0xff]  ;;  %s7679_s28 = smov 48  }
 0x2cb   : > { %7169 = vmatpush3.msra.mxu0 %v1357_v4 }
 0x2cc   : > { %7171 = vmatmul.mubr.msk.f32.vlgmr.msra.gmra.mxu0 %vm1368_vm1, %v1352_v5 }
 0x2cf   : > { %v1451_v57 = vld [vmem:[%s8798_s2 + $0x8] sm:$0xff]  ;;  %v1450_v63 = vld [vmem:[%s8798_s2] sm:$0xff] }
 0x38c   : > { %v7172_v7 = vpop.f32.mrf.mxu0 }
 0x38d   : > { %v8006_v8 = vadd.f32 %v7172_v7, %v6537_v6 }
 0x38e   : > { %v1441_v9 = vpop.f32.mrf.mxu0 }
 0x38f   : > { %v8008_v10 = vadd.f32 %v6537_v6, %v1441_v9  ;;  %1661 = vrot.lane.b32.xlu1 %v8006_v8, %s7670_s5  ;;  %1459 = vrot.lane.b32.xlu0 %v8006_v8, %s7671_s9 }
 0x391   : > { %7177 = vmatprep.mubr.msk.f32.mxu1 %vm1461_vm2, %v8008_v10 }
 0x393   : > { %1659 = vrot.lane.b32.xlu1 %v8008_v10, %s7670_s5  ;;  %1457 = vrot.lane.b32.xlu0 %v8008_v10, %s7671_s9 }
 0x397   : > { %1657 = vrot.lane.b32.xlu1 %v8006_v8, %s7672_s12  ;;  %1655 = vrot.lane.b32.xlu0 %v8008_v10, %s7672_s12 }
 0x401   : > { %v1460_v11 = vpop.permute.xlu0 %1459  ;;  %v1662_v12 = vpop.permute.xlu1 %1661 }
 0x402   : > { %7173 = vmatprep.subr.msk.mxu1 %vm1461_vm2, %v1460_v11 }
 0x403   : > { %7174 = vmatpush3.xpose.msk.msra.mxu1 %vm1461_vm2, %v1460_v11 }
 0x405   : > { %v1458_v13 = vpop.permute.xlu0 %1457  ;;  %v1660_v15 = vpop.permute.xlu1 %1659 }
 0x406   : > { %7175 = vmatprep.subr.msk.mxu1 %vm1461_vm2, %v1458_v13 }
 0x407   : > { %7176 = vmatpush3.xpose.msk.msra.mxu1 %vm1461_vm2, %v1458_v13 }
 0x408   : > { %7187 = vmatprep.subr.msk.mxu1 %vm1461_vm2, %v1662_v12 }
 0x409   : > { %v1656_v14 = vpop.permute.xlu0 %1655  ;;  %v1658_v16 = vpop.permute.xlu1 %1657 }
 0x40a   : > { %7178 = vmatmul.mubr.msk.f32.vlgmr.msra.gmra.mxu1 %vm1461_vm2, %v8006_v8 }
 0x40b   : > { %7188 = vmatpush3.xpose.msk.msra.mxu1 %vm1461_vm2, %v1662_v12  ;;  %7191 = vmatprep.mubr.msk.f32.mxu1 %vm1461_vm2, %v1656_v14 }
 0x40c   : > { %7189 = vmatprep.subr.msk.mxu1 %vm1461_vm2, %v1660_v15 }
 0x40f   : > { %7190 = vmatpush3.xpose.msk.msra.mxu1 %vm1461_vm2, %v1660_v15 }
 0x410   : > { %7206 = vmatprep.subr.mxu1 %v1450_v63 }
 0x412   : > { %7192 = vmatmul.mubr.msk.f32.vlgmr.msra.gmra.mxu1 %vm1461_vm2, %v1658_v16 }
 0x413   : > { %7207 = vmatpush3.msra.mxu1 %v1450_v63  ;;  %v1453_v63 = vld [vmem:[%s8798_s2 + $0x18] sm:$0xff] }
 0x4ca   : > { %v7179_v17 = vpop.f32.mrf.mxu1 }
 0x4cb   : > { %v1549_v18 = vsel %vm1545_vm3, %v7179_v17, -inf }
 0x4cc   : > { %1550 = vmax.xlane.f32.xlu1 %v1549_v18  ;;  %v1536_v19 = vpop.f32.mrf.mxu1 }
 0x4cd   : > { %v1546_v20 = vsel %vm1545_vm3, %v1536_v19, -inf }
 0x4ce   : > { %1547 = vmax.xlane.f32.xlu0 %v1546_v20 }
 0x4d2   : > { %v7193_v21 = vpop.f32.mrf.mxu1 }
 0x4d3   : > { %v1749_v24 = vsel %vm1545_vm3, %v7193_v21, -inf }
 0x4d4   : > { %v1737_v22 = vpop.f32.mrf.mxu1 }
 0x4d5   : > { %v1746_v23 = vsel %vm1545_vm3, %v1737_v22, -inf }
 0x4d6   : > { %1747 = vmax.xlane.f32.xlu0 %v1746_v23 }
 0x4da   : > { %1750 = vmax.xlane.f32.xlu0 %v1749_v24 }
 0x4dd   : > { %1570 = vrot.lane.b32.xlu1 %v8006_v8, %s7673_s14 }
 0x555   : > { %v1551_v25 = vpop.xlane.xlu1 %1550 }
 0x556   : > { %v1553_v26 = vsub.f32 %v7179_v17, %v1551_v25 }
 0x557   : > { %v1548_v27 = vpop.xlane.xlu0 %1547 }
 0x558   : > { %v1556_v28 = vmul.f32 1.442695, %v1553_v26  ;;  %v1552_v29 = vsub.f32 %v1536_v19, %v1548_v27 }
 0x559   : > { %v1571_v30 = vpop.permute.xlu1 %1570 }
 0x55a   : > { %7556 = vpow2.f32 %v1556_v28  ;;  %v1554_v31 = vmul.f32 1.442695, %v1552_v29  ;;  %7180 = vmatprep.subr.mxu0 %v1571_v30 }
 0x55b   : > { %7181 = vmatpush3.msra.mxu0 %v1571_v30 }
 0x55c   : > { %7558 = vpow2.f32 %v1554_v31 }
 0x55f   : > { %v1748_v32 = vpop.xlane.xlu0 %1747 }
 0x560   : > { %v1752_v42 = vsub.f32 %v1737_v22, %v1748_v32 }
 0x562   : > { %v1754_v43 = vmul.f32 1.442695, %v1752_v42 }
 0x563   : > { %v1751_v33 = vpop.xlane.xlu0 %1750 }
 0x564   : > { %v1753_v34 = vsub.f32 %v7193_v21, %v1751_v33 }
 0x566   : > { %v1756_v35 = vmul.f32 1.442695, %v1753_v34 }
 0x567   : > { %v7557_v36 = vpop.eup %7556 }
 0x568   : > { %7560 = vpow2.f32 %v1756_v35  ;;  %v1561_v37 = vsel %vm1545_vm3, %v7557_v36, 0.0 }
 0x569   : > { %v7559_v38 = vpop.eup %7558  ;;  %1562 = vadd.xlane.f32.xlu0 %v1561_v37  ;;  %7562 = vpow2.f32 %v1754_v43 }
 0x56a   : > { %v1558_v39 = vsel %vm1545_vm3, %v7559_v38, 0.0 }
 0x56b   : > { %1559 = vadd.xlane.f32.xlu1 %v1558_v39 }
 0x575   : > { %v7561_v40 = vpop.eup %7560 }
 0x576   : > { %v1761_v41 = vsel %vm1545_vm3, %v7561_v40, 0.0  ;;  %v7563_v44 = vpop.eup %7562 }
 0x577   : > { %1762 = vadd.xlane.f32.xlu0 %v1761_v41  ;;  %v1758_v45 = vsel %vm1545_vm3, %v7563_v44, 0.0 }
 0x57c   : > { %1770 = vrot.lane.b32.xlu1 %v8006_v8, %s7674_s10 }
 0x58d   : > { %1568 = vrot.lane.b32.xlu0 %v8008_v10, %s7673_s14  ;;  %s7680_s14 = smov 40  }
 0x591   : > { %2023 = vrot.lane.b32.xlu0 %v8006_v8, %s7675_s1 }
 0x595   : > { %2017 = vrot.lane.b32.xlu0 %v8008_v10, %s7676_s26 }
 0x599   : > { %2306 = vrot.lane.b32.xlu0 %v8006_v8, %s7677_s23 }
 0x59d   : > { %2300 = vrot.lane.b32.xlu0 %v8008_v10, %s7678_s30 }
 0x5a0   : > { %1759 = vadd.xlane.f32.xlu1 %v1758_v45 }
 0x5b1   : > { %1768 = vrot.lane.b32.xlu1 %v8008_v10, %s7674_s10 }
 0x5b5   : > { %2021 = vrot.lane.b32.xlu1 %v8008_v10, %s7675_s1 }
 0x5b9   : > { %2019 = vrot.lane.b32.xlu1 %v8006_v8, %s7676_s26 }
 0x5bd   : > { %2304 = vrot.lane.b32.xlu1 %v8008_v10, %s7677_s23 }
 0x5c1   : > { %2302 = vrot.lane.b32.xlu1 %v8006_v8, %s7678_s30 }
 0x5f2   : > { %v1563_v46 = vpop.xlane.xlu0 %1562 }
 0x5f3   : > { %7564 = vrcp.f32 %v1563_v46 }
 0x5f4   : > { %v1560_v47 = vpop.xlane.xlu1 %1559 }
 0x5f5   : > { %7566 = vrcp.f32 %v1560_v47 }
 0x5f8   : > { %v1771_v54 = vpop.permute.xlu1 %1770 }
 0x600   : > { %v1763_v48 = vpop.xlane.xlu0 %1762  ;;  %v7565_v49 = vpop.eup %7564 }
 0x601   : > { %v1567_v53 = vmul.f32 %v7565_v49, %v7557_v36  ;;  %7568 = vrcp.f32 %v1763_v48 }
 0x602   : > { %v7567_v50 = vpop.eup %7566 }
 0x603   : > { %v1566_v51 = vmul.f32 %v7567_v50, %v7559_v38 }
 0x604   : > { %v1569_v52 = vpop.permute.xlu0 %1568 }
 0x605   : > { %7182 = vmatprep.subr.mxu0 %v1569_v52  ;;  %7184 = vmatprep.mubr.msk.f32.mxu0 %vm1545_vm3, %v1566_v51 }
 0x606   : > { %7183 = vmatpush3.msra.mxu0 %v1569_v52 }
 0x607   : > { %7185 = vmatmul.mubr.msk.f32.vlgmr.msra.gmra.mxu0 %vm1545_vm3, %v1567_v53  ;;  %7194 = vmatprep.subr.mxu0 %v1771_v54 }
 0x608   : > { %7195 = vmatpush3.msra.mxu0 %v1771_v54  ;;  %v2024_v62 = vpop.permute.xlu0 %2023 }
 0x60c   : > { %v2018_v2 = vpop.permute.xlu0 %2017 }
 0x60e   : > { %v7569_v58 = vpop.eup %7568 }
 0x60f   : > { %v1767_v61 = vmul.f32 %v7569_v58, %v7561_v40 }
 0x610   : > { %v2307_v6 = vpop.permute.xlu0 %2306 }
 0x614   : > { %v2301_v9 = vpop.permute.xlu0 %2300 }
 0x629   : > { %v1760_v55 = vpop.xlane.xlu1 %1759 }
 0x62a   : > { %7570 = vrcp.f32 %v1760_v55 }
 0x62d   : > { %v1769_v56 = vpop.permute.xlu1 %1768 }
 0x62e   : > { %7196 = vmatprep.subr.mxu0 %v1769_v56 }
 0x62f   : > { %7197 = vmatpush3.msra.mxu0 %v1769_v56 }
 0x630   : > { %7201 = vmatprep.subr.mxu0 %v1451_v57 }
 0x631   : > { %v2022_v4 = vpop.permute.xlu1 %2021 }
 0x635   : > { %v2020_v7 = vpop.permute.xlu1 %2019 }
 0x637   : > { %v7571_v59 = vpop.eup %7570 }
 0x638   : > { %v1766_v60 = vmul.f32 %v7571_v59, %v7563_v44  ;;  %v1452_v44 = vld [vmem:[%s8798_s2 + $0x10] sm:$0xff] }
 0x639   : > { %v2305_v11 = vpop.permute.xlu1 %2304 }
 0x63a   : > { %7198 = vmatprep.mubr.msk.f32.mxu0 %vm1545_vm3, %v1766_v60 }
 0x63b   : > { %7199 = vmatmul.mubr.msk.f32.vlgmr.msra.gmra.mxu0 %vm1545_vm3, %v1767_v61 }
 0x63c   : > { %7202 = vmatpush3.msra.mxu0 %v1451_v57 }
 0x63d   : > { %7211 = vmatprep.subr.msk.mxu0 %vm1461_vm2, %v2024_v62  ;;  %v2303_v12 = vpop.permute.xlu1 %2302 }
 0x6c7   : > { %v7186_v0 = vpop.f32.mrf.mxu0 }
 0x6c9   : > { %v1646_v1 = vpop.f32.mrf.mxu0 }
 0x6ca   : > { %7208 = vmatprep.mubr.msk.f32.mxu1 %vm1461_vm2, %v1646_v1 }
 0x6cb   : > { %7209 = vmatmul.mubr.msk.f32.vlgmr.msra.gmra.mxu1 %vm1461_vm2, %v7186_v0 }
 0x6fb   : > { %v7200_v3 = vpop.f32.mrf.mxu0 }
 0x6fd   : > { %v1846_v5 = vpop.f32.mrf.mxu0 }
 0x6fe   : > { %7203 = vmatprep.mubr.msk.f32.mxu0 %vm1461_vm2, %v1846_v5 }
 0x6ff   : > { %7204 = vmatmul.mubr.msk.f32.vlgmr.msra.gmra.mxu0 %vm1461_vm2, %v7200_v3 }
 0x700   : > { %7212 = vmatpush3.xpose.msk.msra.mxu0 %vm1461_vm2, %v2024_v62  ;;  %7215 = vmatprep.mubr.msk.f32.mxu0 %vm1461_vm2, %v2018_v2 }
 0x701   : > { %7213 = vmatprep.subr.msk.mxu0 %vm1461_vm2, %v2022_v4 }
 0x704   : > { %7214 = vmatpush3.xpose.msk.msra.mxu0 %vm1461_vm2, %v2022_v4 }
 0x705   : > { %7230 = vmatprep.subr.msk.mxu0 %vm1461_vm2, %v2307_v6 }
 0x707   : > { %7216 = vmatmul.mubr.msk.f32.vlgmr.msra.gmra.mxu0 %vm1461_vm2, %v2020_v7  ;;  %v2737_v7 = vld [vmem:[%s7865_s27 + $0x18] sm:$0xff] }
 0x708   : > { %7231 = vmatpush3.xpose.msk.msra.mxu0 %vm1461_vm2, %v2307_v6  ;;  %7234 = vmatprep.mubr.msk.f32.mxu0 %vm1461_vm2, %v2301_v9  ;;  %v2736_v9 = vld [vmem:[%s7865_s27 + $0x10] sm:$0xff] }
 0x709   : > { %7232 = vmatprep.subr.msk.mxu0 %vm1461_vm2, %v2305_v11 }
 0x70c   : > { %7233 = vmatpush3.xpose.msk.msra.mxu0 %vm1461_vm2, %v2305_v11  ;;  %v1353_v11 = vld [vmem:[#allocation3] sm:$0xff] }
 0x70f   : > { %7235 = vmatmul.mubr.msk.f32.vlgmr.msra.gmra.mxu0 %vm1461_vm2, %v2303_v12  ;;  %v2735_v12 = vld [vmem:[%s7865_s27 + $0x8] sm:$0xff] }
 0x78b   : > { %v7210_v13 = vpop.f32.mrf.mxu1 }
 0x78d   : > { %v2008_v55 = vpop.f32.mrf.mxu1 }
 0x7bf   : > { %v7205_v14 = vpop.f32.mrf.mxu0 }
 0x7c0   : > { %v8088_v15 = vadd.f32 %v7210_v13, %v7205_v14  ;;  %v2734_v13 = vld [vmem:[%s7865_s27] sm:$0xff]  ;;  %v1354_v14 = vld [vmem:[#allocation3 + $0x8] sm:$0xff]  ;;  %s8801_s27 = sld [smem:[#allocation10_spill]] }
 0x7c1   : > { %v8090_v16 = vpop.f32.mrf.mxu0 }
 0x7c2   : > { %v2009_v1 = vadd.f32 %v2008_v55, %v8090_v16 }
 0x7c7   : > { %v7217_v17 = vpop.f32.mrf.mxu0 }
 0x7c8   : > { %v2111_v18 = vsel %vm1545_vm3, %v7217_v17, -inf }
 0x7c9   : > { %2112 = vmax.xlane.f32.xlu1 %v2111_v18  ;;  %v2099_v19 = vpop.f32.mrf.mxu0 }
 0x7ca   : > { %v2108_v20 = vsel %vm1545_vm3, %v2099_v19, -inf }
 0x7cb   : > { %2109 = vmax.xlane.f32.xlu0 %v2108_v20 }
 0x7cf   : > { %v7236_v21 = vpop.f32.mrf.mxu0 }
 0x7d0   : > { %v2394_v40 = vsel %vm1545_vm3, %v7236_v21, -inf }
 0x7d1   : > { %v2382_v22 = vpop.f32.mrf.mxu0 }
 0x7d2   : > { %v2391_v23 = vsel %vm1545_vm3, %v2382_v22, -inf }
 0x7da   : > { %2132 = vrot.lane.b32.xlu1 %v8006_v8, %s7679_s28 }
 0x7fe   : > { %2392 = vmax.xlane.f32.xlu1 %v2391_v23 }
 0x852   : > { %v2113_v24 = vpop.xlane.xlu1 %2112 }
 0x853   : > { %v2115_v25 = vsub.f32 %v7217_v17, %v2113_v24  ;;  %v7633_v24 = vld [vmem:[#allocation2] sm:$0xff] }
 0x854   : > { %v2110_v26 = vpop.xlane.xlu0 %2109 }
 0x855   : > { %v2118_v27 = vmul.f32 1.442695, %v2115_v25  ;;  %v2114_v28 = vsub.f32 %v2099_v19, %v2110_v26 }
 0x856   : > { %v2133_v29 = vpop.permute.xlu1 %2132 }
 0x857   : > { %7572 = vpow2.f32 %v2118_v27  ;;  %v2116_v30 = vmul.f32 1.442695, %v2114_v28  ;;  %7218 = vmatprep.subr.mxu1 %v2133_v29 }
 0x858   : > { %7219 = vmatpush3.msra.mxu1 %v2133_v29 }
 0x859   : > { %7574 = vpow2.f32 %v2116_v30 }
 0x864   : > { %v7573_v31 = vpop.eup %7572 }
 0x865   : > { %v2123_v32 = vsel %vm1545_vm3, %v7573_v31, 0.0 }
 0x866   : > { %v7575_v33 = vpop.eup %7574  ;;  %2124 = vadd.xlane.f32.xlu0 %v2123_v32  ;;  %v1355_v32 = vld [vmem:[#allocation3 + $0x10] sm:$0xff] }
 0x867   : > { %v2120_v34 = vsel %vm1545_vm3, %v7575_v33, 0.0 }
 0x86a   : > { %2121 = vadd.xlane.f32.xlu0 %v2120_v34  ;;  %v2645_v34 = vld [vmem:[%s8801_s27 + $0x18] sm:$0xff] }
 0x86b   : > { %7249 = vmatprep.subr.mxu0 %v2645_v34 }
 0x86c   : > { %7250 = vmatpush3.msra.mxu0 %v2645_v34 }
 0x880   : > { %2130 = vrot.lane.b32.xlu0 %v8008_v10, %s7679_s28  ;;  %s8799_s28 = sld [smem:[#allocation19_spill]] }
 0x887   : > { %v2393_v35 = vpop.xlane.xlu1 %2392 }
 0x888   : > { %v2397_v36 = vsub.f32 %v2382_v22, %v2393_v35  ;;  %v2644_v35 = vld [vmem:[%s8801_s27 + $0x10] sm:$0xff] }
 0x889   : > { %7251 = vmatprep.subr.mxu0 %v2644_v35 }
 0x88a   : > { %v2399_v37 = vmul.f32 1.442695, %v2397_v36  ;;  %v2643_v36 = vld [vmem:[%s8801_s27 + $0x8] sm:$0xff]  ;;  %7252 = vmatpush3.msra.mxu0 %v2644_v35 }
 0x88b   : > { %7253 = vmatprep.subr.mxu0 %v2643_v36 }
 0x88c   : > { %7576 = vpow2.f32 %v2399_v37  ;;  %v2642_v37 = vld [vmem:[%s8801_s27] sm:$0xff]  ;;  %7254 = vmatpush3.msra.mxu0 %v2643_v36  ;;  %s8805_s27 = sld [smem:[#allocation21_spill]] }
 0x88d   : > { %7255 = vmatprep.subr.mxu0 %v2642_v37 }
 0x88e   : > { %7256 = vmatpush3.msra.mxu0 %v2642_v37 }
 0x892   : > { %s8806_s10 = scalar_lea.vmem %s8805_s27, %s7832_s7 }
 0x899   : > { %v7577_v38 = vpop.eup %7576 }
 0x89a   : > { %v2403_v39 = vsel %vm1545_vm3, %v7577_v38, 0.0 }
 0x89b   : > { %2404 = vadd.xlane.f32.xlu1 %v2403_v39 }
 0x89f   : > { %2395 = vmax.xlane.f32.xlu0 %v2394_v40 }
 0x8ac   : > { %2415 = vrot.lane.b32.xlu1 %v8006_v8, %s7680_s14 }
 0x8ef   : > { %v2125_v41 = vpop.xlane.xlu0 %2124 }
 0x8f0   : > { %7578 = vrcp.f32 %v2125_v41 }
 0x8f3   : > { %v2122_v42 = vpop.xlane.xlu0 %2121 }
 0x8f4   : > { %7580 = vrcp.f32 %v2122_v42 }
 0x8f7   : > { %v2131_v43 = vpop.permute.xlu0 %2130 }
 0x8f8   : > { %7220 = vmatprep.subr.mxu1 %v2131_v43 }
 0x8f9   : > { %7221 = vmatpush3.msra.mxu1 %v2131_v43 }
 0x8fa   : > { %7225 = vmatprep.subr.mxu1 %v1452_v44 }
 0x8fd   : > { %v7579_v45 = vpop.eup %7578 }
 0x8fe   : > { %v2129_v48 = vmul.f32 %v7579_v45, %v7573_v31 }
 0x901   : > { %v7581_v46 = vpop.eup %7580 }
 0x902   : > { %v2128_v47 = vmul.f32 %v7581_v46, %v7575_v33  ;;  %v1356_v33 = vld [vmem:[#allocation3 + $0x18] sm:$0xff] }
 0x904   : > { %7222 = vmatprep.mubr.msk.f32.mxu1 %vm1545_vm3, %v2128_v47 }
 0x905   : > { %7223 = vmatmul.mubr.msk.f32.vlgmr.msra.gmra.mxu1 %vm1545_vm3, %v2129_v48 }
 0x906   : > { %7226 = vmatpush3.msra.mxu1 %v1452_v44 }
 0x924   : > { %v2405_v49 = vpop.xlane.xlu1 %2404 }
 0x928   : > { %v2416_v8 = vpop.permute.xlu1 %2415  ;;  %v2396_v50 = vpop.xlane.xlu0 %2395 }
 0x929   : > { %v2398_v51 = vsub.f32 %v7236_v21, %v2396_v50  ;;  %7237 = vmatprep.subr.mxu1 %v2416_v8  ;;  %v7632_v21 = vld [vmem:[#allocation2 + $0x8] sm:$0xff] }
 0x92b   : > { %v2401_v52 = vmul.f32 1.442695, %v2398_v51 }
 0x92d   : > { %7582 = vpow2.f32 %v2401_v52 }
 0x92e   : > { %7584 = vrcp.f32 %v2405_v49 }
 0x93a   : > { %v7583_v53 = vpop.eup %7582 }
 0x93b   : > { %v2406_v54 = vsel %vm1545_vm3, %v7583_v53, 0.0  ;;  %v7585_v56 = vpop.eup %7584 }
 0x93c   : > { %2407 = vadd.xlane.f32.xlu0 %v2406_v54  ;;  %v2411_v60 = vmul.f32 %v7585_v56, %v7577_v38 }
 0x952   : > { %2413 = vrot.lane.b32.xlu0 %v8008_v10, %s7680_s14  ;;  %s8800_s14 = scalar_lea.vmem %s8799_s28, %s7832_s7  ;;  %s8802_s28 = scalar_lea.vmem %s8736_s18, %s7832_s7 }
 0x953   : > { %v6573_v54 = vld [vmem:[%s8802_s28] ss:$0 sm:$0xff]  ;;  %s8804_s28 = scalar_lea.vmem %s8729_s11, %s7832_s7 }
 0x9c5   : > { %v7224_v57 = vpop.f32.mrf.mxu1  ;;  %v2408_v58 = vpop.xlane.xlu0 %2407 }
 0x9c6   : > { %7586 = vrcp.f32 %v2408_v58 }
 0x9c7   : > { %v2208_v59 = vpop.f32.mrf.mxu1 }
 0x9c8   : > { %7227 = vmatprep.mubr.msk.f32.mxu1 %vm1461_vm2, %v2208_v59  ;;  %v6574_v59 = vld [vmem:[%s8803_s0] ss:$0 sm:$0xff] }
 0x9c9   : > { %7228 = vmatmul.mubr.msk.f32.vlgmr.msra.gmra.mxu1 %vm1461_vm2, %v7224_v57  ;;  %v2414_v61 = vpop.permute.xlu0 %2413 }
 0x9ca   : > { %7238 = vmatpush3.msra.mxu1 %v2416_v8  ;;  %7241 = vmatprep.mubr.msk.f32.mxu1 %vm1545_vm3, %v2411_v60 }
 0x9cb   : > { %7239 = vmatprep.subr.mxu1 %v2414_v61 }
 0x9cc   : > { %7240 = vmatpush3.msra.mxu1 %v2414_v61 }
 0x9cd   : > { %7244 = vmatprep.subr.mxu1 %v1453_v63 }
 0x9d3   : > { %v7587_v10 = vpop.eup %7586 }
 0x9d4   : > { %v2412_v62 = vmul.f32 %v7587_v10, %v7583_v53 }
 0x9d6   : > { %7242 = vmatmul.mubr.msk.f32.vlgmr.msra.gmra.mxu1 %vm1545_vm3, %v2412_v62 }
 0x9d7   : > { %7245 = vmatpush3.msra.mxu1 %v1453_v63 }
 0x9d8   : > { %7260 = vmatprep.subr.mxu1 %v2737_v7 }
 0xa89   : > { %v7229_v0 = vpop.f32.mrf.mxu1 }
 0xa8a   : > { %v2299_v2 = vadd.f32 %v7229_v0, %v8088_v15  ;;  %v6572_v15 = vld [vmem:[%s8800_s14] ss:$0 sm:$0xff]  ;;  %s8810_s14 = sld [smem:[#allocation27_spill]] }
 0xa8b   : > { %v2289_v3 = vpop.f32.mrf.mxu1  ;;  %v6578_v0 = vld [vmem:[%s8804_s28] ss:$0 sm:$0xff] }
 0xa8c   : > { %v2298_v4 = vadd.f32 %v2289_v3, %v2009_v1 }
 0xa90   : > { %s8811_s27 = scalar_lea.vmem %s8810_s14, %s7832_s7 }
 0xa96   : > { %v7243_v5 = vpop.f32.mrf.mxu1 }
 0xa98   : > { %v2491_v6 = vpop.f32.mrf.mxu1 }
 0xa99   : > { %7246 = vmatprep.mubr.msk.f32.mxu1 %vm1461_vm2, %v2491_v6 }
 0xa9a   : > { %7247 = vmatmul.mubr.msk.f32.vlgmr.msra.gmra.mxu1 %vm1461_vm2, %v7243_v5 }
 0xa9b   : > { %7261 = vmatpush3.msra.mxu1 %v2737_v7  ;;  %7268 = vmatprep.mubr.msk.f32.mxu1 %vm1368_vm1, %v1353_v11 }
 0xa9c   : > { %7262 = vmatprep.subr.mxu1 %v2736_v9 }
 0xa9d   : > { %7263 = vmatpush3.msra.mxu1 %v2736_v9  ;;  %v6575_v9 = vld [vmem:[%s8806_s10] ss:$0 sm:$0xff]  ;;  %s8812_s10 = sld [smem:[#allocation8_spill]] }
 0xa9e   : > { %7264 = vmatprep.subr.mxu1 %v2735_v12 }
 0xa9f   : > { %7265 = vmatpush3.msra.mxu1 %v2735_v12 }
 0xaa0   : > { %7266 = vmatprep.subr.mxu1 %v2734_v13 }
 0xaa1   : > { %7267 = vmatpush3.msra.mxu1 %v2734_v13 }
 0xaa2   : > { %7269 = vmatmul.mubr.msk.f32.vlgmr.msra.gmra.mxu1 %vm1368_vm1, %v1354_v14 }
 0xaa3   : > { %7271 = vmatprep.mubr.msk.f32.mxu1 %vm1368_vm1, %v1355_v32  ;;  %p6797_p5 = scmp.ne.s32.totalorder %s8812_s10, 3 }
 0xaa6   : > { %7272 = vmatmul.mubr.msk.f32.gmra.mxu1 %vm1368_vm1, %v1356_v33 }
 0xb5a   : > { %v7248_v16 = vpop.f32.mrf.mxu1 }
 0xb5b   : > { %v2582_v17 = vadd.f32 %v7248_v16, %v2299_v2 }
 0xb5c   : > { %v2572_v18 = vpop.f32.mrf.mxu1 }
 0xb5d   : > { %v2590_v19 = vadd.f32 %v6572_v15, %v2582_v17  ;;  %v2581_v20 = vadd.f32 %v2572_v18, %v2298_v4 }
 0xb5f   : > { %v2592_v22 = vadd.f32 %v7632_v21, %v2590_v19  ;;  %v2589_v23 = vadd.f32 %v6572_v15, %v2581_v20 }
 0xb61   : > { %v2591_v25 = vadd.f32 %v7633_v24, %v2589_v23  ;;  %v2598_v26 = vsel %vm1368_vm1, %v2592_v22, 0.0  ;;  %v2605_v27 = vmul.f32 %v2592_v22, %v2592_v22 }
 0xb62   : > { %2599 = vadd.xlane.f32.xlu0 %v2598_v26  ;;  %v7270_v62 = vpop.f32.mrf.mxu1 }
 0xb63   : > { %v2595_v28 = vsel %vm1368_vm1, %v2591_v25, 0.0  ;;  %v2604_v29 = vmul.f32 %v2591_v25, %v2591_v25  ;;  %v2609_v30 = vsel %vm1368_vm1, %v2605_v27, 0.0  ;;  %v8168_v5 = vadd.f32 %v7270_v62, %v6578_v0 }
 0xb64   : > { %2596 = vadd.xlane.f32.xlu1 %v2595_v28  ;;  %v2823_v63 = vpop.f32.mrf.mxu1 }
 0xb65   : > { %v2606_v31 = vsel %vm1368_vm1, %v2604_v29, 0.0  ;;  %v8174_v6 = vadd.f32 %v6578_v0, %v2823_v63 }
 0xb66   : > { %2610 = vadd.xlane.f32.xlu0 %v2609_v30  ;;  %v7273_v1 = vpop.f32.mrf.mxu1 }
 0xb67   : > { %v8160_v2 = vadd.f32 %v7273_v1, %v6578_v0 }
 0xb68   : > { %2607 = vadd.xlane.f32.xlu1 %v2606_v31  ;;  %v2833_v3 = vpop.f32.mrf.mxu1 }
 0xb69   : > { %7274 = vmatprep.subr.msk.mxu0 %vm1461_vm2, %v8160_v2  ;;  %v8164_v4 = vadd.f32 %v6578_v0, %v2833_v3 }
 0xbeb   : > { %v2600_v38 = vpop.xlane.xlu0 %2599 }
 0xbec   : > { %v2603_v39 = vmul.f32 0.03125, %v2600_v38 }
 0xbed   : > { %v2597_v40 = vpop.xlane.xlu1 %2596 }
 0xbee   : > { %v2602_v41 = vmul.f32 0.03125, %v2597_v40  ;;  %v2615_v43 = vmul.f32 %v2603_v39, %v2603_v39  ;;  %v2619_v51 = vsub.f32 %v2592_v22, %v2603_v39 }
 0xbef   : > { %v2611_v42 = vpop.xlane.xlu0 %2610 }
 0xbf0   : > { %v2613_v44 = vmul.f32 0.03125, %v2611_v42  ;;  %v2614_v46 = vmul.f32 %v2602_v41, %v2602_v41  ;;  %v2618_v53 = vsub.f32 %v2591_v25, %v2602_v41 }
 0xbf1   : > { %v2608_v45 = vpop.xlane.xlu1 %2607 }
 0xbf2   : > { %v2617_v47 = vsub.f32 %v2613_v44, %v2615_v43  ;;  %v2612_v48 = vmul.f32 0.03125, %v2608_v45  ;;  %v2842_v44 = vld [vmem:[%s7874_s4] sm:$0xff] }
 0xbf4   : > { %v2621_v49 = vadd.f32 1e-05, %v2617_v47  ;;  %v2616_v8 = vsub.f32 %v2612_v48, %v2614_v46 }
 0xbf6   : > { %7588 = vrsqrt.f32 %v2621_v49  ;;  %v2620_v50 = vadd.f32 1e-05, %v2616_v8 }
 0xbf8   : > { %7590 = vrsqrt.f32 %v2620_v50 }
 0xc03   : > { %v7589_v52 = vpop.eup %7588 }
 0xc04   : > { %v2625_v55 = vmul.f32 %v7589_v52, %v2619_v51 }
 0xc05   : > { %v7591_v56 = vpop.eup %7590 }
 0xc06   : > { %v2624_v57 = vmul.f32 %v7591_v56, %v2618_v53  ;;  %v2633_v58 = vmul.f32 %v6573_v54, %v2625_v55 }
 0xc08   : > { %v2632_v60 = vmul.f32 %v6573_v54, %v2624_v57  ;;  %v8149_v10 = vadd.f32 %v6574_v59, %v2633_v58 }
 0xc0a   : > { %v8147_v61 = vadd.f32 %v6574_v59, %v2632_v60 }
 0xc0c   : > { %7257 = vmatprep.mubr.msk.f32.mxu0 %vm1368_vm1, %v8147_v61 }
 0xc0d   : > { %7258 = vmatmul.mubr.msk.f32.vlgmr.msra.gmra.mxu0 %vm1368_vm1, %v8149_v10 }
 0xc0e   : > { %7275 = vmatpush3.xpose.msk.msra.mxu0 %vm1461_vm2, %v8160_v2 }
 0xc0f   : > { %7276 = vmatprep.subr.msk.mxu0 %vm1461_vm2, %v8164_v4 }
 0xc12   : > { %7277 = vmatpush3.xpose.msk.msra.mxu0 %vm1461_vm2, %v8164_v4 }
 0xc13   : > { %7278 = vmatprep.subr.msk.mxu0 %vm1461_vm2, %v8168_v5 }
 0xc16   : > { %7279 = vmatpush3.xpose.msk.msra.mxu0 %vm1461_vm2, %v8168_v5 }
 0xc17   : > { %7280 = vmatprep.subr.msk.mxu0 %vm1461_vm2, %v8174_v6 }
 0xc1a   : > { %7281 = vmatpush3.xpose.msk.msra.mxu0 %vm1461_vm2, %v8174_v6 }
 0xccd   : > { %v7259_v7 = vpop.f32.mrf.mxu0 }
 0xcce   : > { %v8191_v13 = vadd.f32 %v7259_v7, %v6575_v9  ;;  %v2843_v7 = vld [vmem:[%s7874_s4 + $0x8] sm:$0xff] }
 0xccf   : > { %v2725_v11 = vpop.f32.mrf.mxu0 }
 0xcd0   : > { %v8189_v12 = vadd.f32 %v6575_v9, %v2725_v11 }
 0xcd2   : > { %7282 = vmatprep.mubr.msk.f32.mxu0 %vm1461_vm2, %v8189_v12 }
 0xcd3   : > { %7283 = vmatmul.mubr.msk.f32.vlgmr.msra.gmra.mxu0 %vm1461_vm2, %v8191_v13 }
 0xd93   : > { %v7284_v14 = vpop.f32.mrf.mxu0 }
 0xd94   : > { %v2943_v15 = vsel %vm1368_vm1, %v7284_v14, -inf }
 0xd95   : > { %2944 = vmax.xlane.f32.xlu0 %v2943_v15  ;;  %v2931_v16 = vpop.f32.mrf.mxu0 }
 0xd96   : > { %v2940_v17 = vsel %vm1368_vm1, %v2931_v16, -inf }
 0xd97   : > { %2941 = vmax.xlane.f32.xlu1 %v2940_v17 }
 0xda8   : > { %2968 = vrot.lane.b32.xlu1 %v8160_v2, %s7671_s9 }
 0xdab   : > { %2966 = vrot.lane.b32.xlu0 %v8164_v4, %s7671_s9 }
 0xdac   : > { %2964 = vrot.lane.b32.xlu1 %v8168_v5, %s7671_s9 }
 0xdb0   : > { %2962 = vrot.lane.b32.xlu1 %v8174_v6, %s7671_s9  ;;  %s8807_s9 = scalar_lea.vmem %s8731_s13, %s7832_s7 }
 0xe1e   : > { %v2945_v18 = vpop.xlane.xlu0 %2944 }
 0xe1f   : > { %v2947_v19 = vsub.f32 %v7284_v14, %v2945_v18 }
 0xe20   : > { %v2942_v20 = vpop.xlane.xlu1 %2941 }
 0xe21   : > { %v2950_v21 = vmul.f32 1.442695, %v2947_v19  ;;  %v2946_v22 = vsub.f32 %v2931_v16, %v2942_v20 }
 0xe22   : > { %v2967_v25 = vpop.permute.xlu0 %2966 }
 0xe23   : > { %7592 = vpow2.f32 %v2950_v21  ;;  %v2948_v23 = vmul.f32 1.442695, %v2946_v22 }
 0xe24   : > { %v2969_v24 = vpop.permute.xlu1 %2968 }
 0xe25   : > { %7594 = vpow2.f32 %v2948_v23  ;;  %7285 = vmatprep.subr.mxu1 %v2969_v24 }
 0xe26   : > { %7286 = vmatpush3.msra.mxu1 %v2969_v24 }
 0xe27   : > { %7287 = vmatprep.subr.mxu1 %v2967_v25 }
 0xe28   : > { %7288 = vmatpush3.msra.mxu1 %v2967_v25  ;;  %v2965_v26 = vpop.permute.xlu1 %2964 }
 0xe29   : > { %7289 = vmatprep.subr.mxu1 %v2965_v26 }
 0xe2a   : > { %7290 = vmatpush3.msra.mxu1 %v2965_v26 }
 0xe2c   : > { %v2963_v27 = vpop.permute.xlu1 %2962 }
 0xe2d   : > { %7291 = vmatprep.subr.mxu1 %v2963_v27 }
 0xe2e   : > { %7292 = vmatpush3.msra.mxu1 %v2963_v27 }
 0xe30   : > { %v7593_v28 = vpop.eup %7592 }
 0xe31   : > { %v2955_v29 = vsel %vm1368_vm1, %v7593_v28, 0.0 }
 0xe32   : > { %v7595_v30 = vpop.eup %7594  ;;  %2956 = vadd.xlane.f32.xlu0 %v2955_v29 }
 0xe33   : > { %v2952_v31 = vsel %vm1368_vm1, %v7595_v30, 0.0 }
 0xe34   : > { %2953 = vadd.xlane.f32.xlu1 %v2952_v31 }
 0xe45   : > { %3063 = vrot.lane.b32.xlu1 %v8164_v4, %s7672_s12 }
 0xe48   : > { %3065 = vrot.lane.b32.xlu0 %v8160_v2, %s7672_s12 }
 0xe49   : > { %3059 = vrot.lane.b32.xlu1 %v8174_v6, %s7672_s12 }
 0xe4c   : > { %3061 = vrot.lane.b32.xlu0 %v8168_v5, %s7672_s12 }
 0xe4d   : > { %3057 = vrot.lane.b32.xlu1 %v8191_v13, %s7672_s12 }
 0xe50   : > { %3055 = vrot.lane.b32.xlu0 %v8189_v12, %s7672_s12 }
 0xebb   : > { %v2957_v32 = vpop.xlane.xlu0 %2956 }
 0xebc   : > { %7596 = vrcp.f32 %v2957_v32 }
 0xebd   : > { %v2954_v33 = vpop.xlane.xlu1 %2953 }
 0xebe   : > { %7598 = vrcp.f32 %v2954_v33 }
 0xebf   : > { %v3066_v34 = vpop.permute.xlu0 %3065 }
 0xec0   : > { %7296 = vmatprep.subr.msk.mxu1 %vm1461_vm2, %v3066_v34 }
 0xec1   : > { %v3064_v41 = vpop.permute.xlu1 %3063 }
 0xec3   : > { %v3062_v35 = vpop.permute.xlu0 %3061 }
 0xec5   : > { %v3060_v42 = vpop.permute.xlu1 %3059 }
 0xec7   : > { %v3056_v40 = vpop.permute.xlu0 %3055 }
 0xec9   : > { %v7597_v36 = vpop.eup %7596  ;;  %v3058_v43 = vpop.permute.xlu1 %3057 }
 0xeca   : > { %v2961_v39 = vmul.f32 %v7597_v36, %v7593_v28 }
 0xecb   : > { %v7599_v37 = vpop.eup %7598 }
 0xecc   : > { %v2960_v38 = vmul.f32 %v7599_v37, %v7595_v30 }
 0xece   : > { %7293 = vmatprep.mubr.msk.f32.mxu1 %vm1368_vm1, %v2960_v38 }
 0xecf   : > { %7294 = vmatmul.mubr.msk.f32.vlgmr.msra.gmra.mxu1 %vm1368_vm1, %v2961_v39 }
 0xed0   : > { %7297 = vmatpush3.xpose.msk.msra.mxu1 %vm1461_vm2, %v3066_v34  ;;  %7304 = vmatprep.mubr.msk.f32.mxu1 %vm1461_vm2, %v3056_v40 }
 0xed1   : > { %7298 = vmatprep.subr.msk.mxu1 %vm1461_vm2, %v3064_v41 }
 0xed4   : > { %7299 = vmatpush3.xpose.msk.msra.mxu1 %vm1461_vm2, %v3064_v41 }
 0xed5   : > { %7300 = vmatprep.subr.msk.mxu1 %vm1461_vm2, %v3062_v35 }
 0xed8   : > { %7301 = vmatpush3.xpose.msk.msra.mxu1 %vm1461_vm2, %v3062_v35 }
 0xed9   : > { %7302 = vmatprep.subr.msk.mxu1 %vm1461_vm2, %v3060_v42 }
 0xedc   : > { %7303 = vmatpush3.xpose.msk.msra.mxu1 %vm1461_vm2, %v3060_v42 }
 0xedd   : > { %7323 = vmatprep.subr.mxu1 %v2842_v44 }
 0xedf   : > { %7305 = vmatmul.mubr.msk.f32.vlgmr.msra.gmra.mxu1 %vm1461_vm2, %v3058_v43 }
 0xee0   : > { %7324 = vmatpush3.msra.mxu1 %v2842_v44 }
 0xf8f   : > { %v7295_v45 = vpop.f32.mrf.mxu1 }
 0xf91   : > { %v3046_v46 = vpop.f32.mrf.mxu1 }
 0xf92   : > { %7325 = vmatprep.mubr.msk.f32.mxu1 %vm1461_vm2, %v3046_v46 }
 0xf93   : > { %7326 = vmatmul.mubr.msk.f32.vlgmr.msra.gmra.mxu1 %vm1461_vm2, %v7295_v45  ;;  %v2844_v45 = vld [vmem:[%s7874_s4 + $0x10] sm:$0xff] }
 0xf9f   : > { %v7306_v47 = vpop.f32.mrf.mxu1 }
 0xfa0   : > { %v3157_v48 = vsel %vm1368_vm1, %v7306_v47, -inf }
 0xfa1   : > { %3158 = vmax.xlane.f32.xlu1 %v3157_v48  ;;  %v3145_v49 = vpop.f32.mrf.mxu1 }
 0xfa2   : > { %v3154_v8 = vsel %vm1368_vm1, %v3145_v49, -inf }
 0xfa3   : > { %3155 = vmax.xlane.f32.xlu0 %v3154_v8 }
 0xfb2   : > { %3182 = vrot.lane.b32.xlu1 %v8160_v2, %s7670_s5 }
 0xfb6   : > { %3178 = vrot.lane.b32.xlu1 %v8168_v5, %s7670_s5 }
 0xfba   : > { %3176 = vrot.lane.b32.xlu1 %v8174_v6, %s7670_s5 }
 0xfbe   : > { %3439 = vrot.lane.b32.xlu1 %v8164_v4, %s7676_s26 }
 0xfc2   : > { %3435 = vrot.lane.b32.xlu1 %v8174_v6, %s7676_s26 }
 0xfc6   : > { %3433 = vrot.lane.b32.xlu1 %v8191_v13, %s7676_s26 }
0x102a   : > { %v3159_v50 = vpop.xlane.xlu1 %3158 }
0x102b   : > { %v3161_v51 = vsub.f32 %v7306_v47, %v3159_v50 }
0x102c   : > { %v3156_v52 = vpop.xlane.xlu0 %3155 }
0x102d   : > { %v3164_v53 = vmul.f32 1.442695, %v3161_v51  ;;  %v3160_v54 = vsub.f32 %v3145_v49, %v3156_v52 }
0x102e   : > { %v3183_v55 = vpop.permute.xlu1 %3182 }
0x102f   : > { %7600 = vpow2.f32 %v3164_v53  ;;  %v3162_v56 = vmul.f32 1.442695, %v3160_v54  ;;  %7307 = vmatprep.subr.mxu0 %v3183_v55 }
0x1030   : > { %7308 = vmatpush3.msra.mxu0 %v3183_v55 }
0x1031   : > { %7602 = vpow2.f32 %v3162_v56 }
0x1032   : > { %v3179_v0 = vpop.permute.xlu1 %3178 }
0x1036   : > { %v3177_v3 = vpop.permute.xlu1 %3176 }
0x103a   : > { %v3440_v21 = vpop.permute.xlu1 %3439 }
0x103c   : > { %v7601_v57 = vpop.eup %7600 }
0x103d   : > { %v3169_v58 = vsel %vm1368_vm1, %v7601_v57, 0.0 }
0x103e   : > { %v7603_v59 = vpop.eup %7602  ;;  %3170 = vadd.xlane.f32.xlu0 %v3169_v58  ;;  %v3436_v22 = vpop.permute.xlu1 %3435 }
0x103f   : > { %v3166_v60 = vsel %vm1368_vm1, %v7603_v59, 0.0 }
0x1042   : > { %3167 = vadd.xlane.f32.xlu0 %v3166_v60  ;;  %v3434_v23 = vpop.permute.xlu1 %3433 }
0x1053   : > { %v7327_v8 = vpop.f32.mrf.mxu1 }
0x1055   : > { %v3422_v50 = vpop.f32.mrf.mxu1 }
0x1058   : > { %3180 = vrot.lane.b32.xlu0 %v8164_v4, %s7670_s5 }
0x105c   : > { %3441 = vrot.lane.b32.xlu0 %v8160_v2, %s7676_s26 }
0x1060   : > { %3437 = vrot.lane.b32.xlu0 %v8168_v5, %s7676_s26 }
0x1064   : > { %3431 = vrot.lane.b32.xlu0 %v8189_v12, %s7676_s26 }
0x10c7   : > { %v3171_v62 = vpop.xlane.xlu0 %3170 }
0x10c8   : > { %7604 = vrcp.f32 %v3171_v62 }
0x10cb   : > { %v3168_v63 = vpop.xlane.xlu0 %3167 }
0x10cc   : > { %7606 = vrcp.f32 %v3168_v63 }
0x10cf   : > { %v3181_v1 = vpop.permute.xlu0 %3180 }
0x10d0   : > { %7309 = vmatprep.subr.mxu0 %v3181_v1 }
0x10d1   : > { %7310 = vmatpush3.msra.mxu0 %v3181_v1 }
0x10d2   : > { %7311 = vmatprep.subr.mxu0 %v3179_v0 }
0x10d3   : > { %7312 = vmatpush3.msra.mxu0 %v3179_v0  ;;  %v3442_v16 = vpop.permute.xlu0 %3441 }
0x10d4   : > { %7313 = vmatprep.subr.mxu0 %v3177_v3 }
0x10d5   : > { %7314 = vmatpush3.msra.mxu0 %v3177_v3  ;;  %v7605_v9 = vpop.eup %7604 }
0x10d6   : > { %7318 = vmatprep.subr.mxu0 %v2843_v7  ;;  %v3175_v15 = vmul.f32 %v7605_v9, %v7601_v57 }
0x10d7   : > { %v3438_v17 = vpop.permute.xlu0 %3437 }
0x10d9   : > { %v7607_v11 = vpop.eup %7606 }
0x10da   : > { %v3174_v14 = vmul.f32 %v7607_v11, %v7603_v59 }
0x10db   : > { %v3432_v20 = vpop.permute.xlu0 %3431 }
0x10dc   : > { %7315 = vmatprep.mubr.msk.f32.mxu0 %vm1368_vm1, %v3174_v14 }
0x10dd   : > { %7316 = vmatmul.mubr.msk.f32.vlgmr.msra.gmra.mxu0 %vm1368_vm1, %v3175_v15 }
0x10de   : > { %7319 = vmatpush3.msra.mxu0 %v2843_v7 }
0x10df   : > { %7328 = vmatprep.subr.msk.mxu0 %vm1461_vm2, %v3442_v16 }
0x119d   : > { %v7317_v18 = vpop.f32.mrf.mxu0 }
0x119f   : > { %v3260_v19 = vpop.f32.mrf.mxu0 }
0x11a0   : > { %7320 = vmatprep.mubr.msk.f32.mxu0 %vm1461_vm2, %v3260_v19 }
0x11a1   : > { %7321 = vmatmul.mubr.msk.f32.vlgmr.msra.gmra.mxu0 %vm1461_vm2, %v7317_v18 }
0x11a2   : > { %7329 = vmatpush3.xpose.msk.msra.mxu0 %vm1461_vm2, %v3442_v16  ;;  %7336 = vmatprep.mubr.msk.f32.mxu0 %vm1461_vm2, %v3432_v20 }
0x11a3   : > { %7330 = vmatprep.subr.msk.mxu0 %vm1461_vm2, %v3440_v21 }
0x11a6   : > { %7331 = vmatpush3.xpose.msk.msra.mxu0 %vm1461_vm2, %v3440_v21 }
0x11a7   : > { %7332 = vmatprep.subr.msk.mxu0 %vm1461_vm2, %v3438_v17 }
0x11aa   : > { %7333 = vmatpush3.xpose.msk.msra.mxu0 %vm1461_vm2, %v3438_v17 }
0x11ab   : > { %7334 = vmatprep.subr.msk.mxu0 %vm1461_vm2, %v3436_v22 }
0x11ae   : > { %7335 = vmatpush3.xpose.msk.msra.mxu0 %vm1461_vm2, %v3436_v22 }
0x11b1   : > { %7337 = vmatmul.mubr.msk.f32.vlgmr.msra.gmra.mxu0 %vm1461_vm2, %v3434_v23 }
0x1261   : > { %v8275_v24 = vpop.f32.mrf.mxu0 }
0x1262   : > { %v3428_v58 = vadd.f32 %v7327_v8, %v8275_v24 }
0x1263   : > { %v8277_v25 = vpop.f32.mrf.mxu0 }
0x1264   : > { %v3423_v60 = vadd.f32 %v3422_v50, %v8277_v25  ;;  %v4084_v50 = vld [vmem:[%s7884_s6] sm:$0xff] }
0x1271   : > { %v7338_v26 = vpop.f32.mrf.mxu0 }
0x1272   : > { %v3533_v27 = vsel %vm1368_vm1, %v7338_v26, -inf }
0x1273   : > { %3534 = vmax.xlane.f32.xlu1 %v3533_v27  ;;  %v3521_v28 = vpop.f32.mrf.mxu0 }
0x1274   : > { %v3530_v29 = vsel %vm1368_vm1, %v3521_v28, -inf }
0x1275   : > { %3531 = vmax.xlane.f32.xlu0 %v3530_v29 }
0x1284   : > { %3558 = vrot.lane.b32.xlu1 %v8160_v2, %s7675_s1 }
0x1288   : > { %3554 = vrot.lane.b32.xlu1 %v8168_v5, %s7675_s1 }
0x128c   : > { %3552 = vrot.lane.b32.xlu1 %v8174_v6, %s7675_s1 }
0x1290   : > { %3736 = vrot.lane.b32.xlu1 %v8164_v4, %s7678_s30 }
0x1294   : > { %3732 = vrot.lane.b32.xlu1 %v8174_v6, %s7678_s30 }
0x1298   : > { %3730 = vrot.lane.b32.xlu1 %v8191_v13, %s7678_s30 }
0x12fc   : > { %v3535_v30 = vpop.xlane.xlu1 %3534 }
0x12fd   : > { %v3537_v31 = vsub.f32 %v7338_v26, %v3535_v30  ;;  %v2845_v26 = vld [vmem:[%s7874_s4 + $0x18] sm:$0xff]  ;;  %s8813_s4 = sld [smem:[#allocation28_spill]] (!%p6797_p5) }
0x12fe   : > { %v3532_v32 = vpop.xlane.xlu0 %3531 }
0x12ff   : > { %v3540_v33 = vmul.f32 1.442695, %v3537_v31  ;;  %v3536_v34 = vsub.f32 %v3521_v28, %v3532_v32  ;;  %v6623_v32 = vld [vmem:[%s8807_s9] ss:$0 sm:$0xff] }
0x1300   : > { %v3559_v35 = vpop.permute.xlu1 %3558 }
0x1301   : > { %7608 = vpow2.f32 %v3540_v33  ;;  %v3538_v36 = vmul.f32 1.442695, %v3536_v34  ;;  %7339 = vmatprep.subr.mxu1 %v3559_v35 }
0x1302   : > { %7340 = vmatpush3.msra.mxu1 %v3559_v35 }
0x1303   : > { %7610 = vpow2.f32 %v3538_v36 }
0x1304   : > { %v3555_v42 = vpop.permute.xlu1 %3554 }
0x1308   : > { %v3553_v44 = vpop.permute.xlu1 %3552 }
0x130c   : > { %v3737_v55 = vpop.permute.xlu1 %3736 }
0x130e   : > { %v7609_v37 = vpop.eup %7608 }
0x130f   : > { %v3545_v38 = vsel %vm1368_vm1, %v7609_v37, 0.0 }
0x1310   : > { %v7611_v39 = vpop.eup %7610  ;;  %3546 = vadd.xlane.f32.xlu0 %v3545_v38  ;;  %v3733_v56 = vpop.permute.xlu1 %3732 }
0x1311   : > { %v3542_v40 = vsel %vm1368_vm1, %v7611_v39, 0.0 }
0x1314   : > { %3543 = vadd.xlane.f32.xlu0 %v3542_v40  ;;  %v3731_v57 = vpop.permute.xlu1 %3730 }
0x132a   : > { %3556 = vrot.lane.b32.xlu0 %v8164_v4, %s7675_s1 }
0x132e   : > { %3738 = vrot.lane.b32.xlu0 %v8160_v2, %s7678_s30 }
0x1332   : > { %3734 = vrot.lane.b32.xlu0 %v8168_v5, %s7678_s30 }
0x1336   : > { %3728 = vrot.lane.b32.xlu0 %v8189_v12, %s7678_s30 }
0x1399   : > { %v3547_v13 = vpop.xlane.xlu0 %3546 }
0x139a   : > { %7612 = vrcp.f32 %v3547_v13 }
0x139d   : > { %v3544_v41 = vpop.xlane.xlu0 %3543 }
0x139e   : > { %7614 = vrcp.f32 %v3544_v41 }
0x13a1   : > { %v3557_v43 = vpop.permute.xlu0 %3556 }
0x13a2   : > { %7341 = vmatprep.subr.mxu1 %v3557_v43 }
0x13a3   : > { %7342 = vmatpush3.msra.mxu1 %v3557_v43 }
0x13a4   : > { %7343 = vmatprep.subr.mxu1 %v3555_v42 }
0x13a5   : > { %7344 = vmatpush3.msra.mxu1 %v3555_v42  ;;  %v3739_v12 = vpop.permute.xlu0 %3738 }
0x13a6   : > { %7345 = vmatprep.subr.mxu1 %v3553_v44 }
0x13a7   : > { %7346 = vmatpush3.msra.mxu1 %v3553_v44  ;;  %v7613_v46 = vpop.eup %7612  ;;  %v4100_v44 = vld [vmem:[%s7884_s6 + $0x80] sm:$0xff] }
0x13a8   : > { %7350 = vmatprep.subr.mxu1 %v2844_v45  ;;  %v3551_v49 = vmul.f32 %v7613_v46, %v7609_v37  ;;  %v4101_v46 = vld [vmem:[%s7884_s6 + $0x88] sm:$0xff] }
0x13a9   : > { %v3735_v51 = vpop.permute.xlu0 %3734 }
0x13ab   : > { %v7615_v47 = vpop.eup %7614 }
0x13ac   : > { %v3550_v48 = vmul.f32 %v7615_v47, %v7611_v39 }
0x13ad   : > { %v3729_v54 = vpop.permute.xlu0 %3728 }
0x13ae   : > { %7347 = vmatprep.mubr.msk.f32.mxu1 %vm1368_vm1, %v3550_v48  ;;  %v4109_v48 = vld [vmem:[%s7884_s6 + $0xc8] sm:$0xff] }
0x13af   : > { %7348 = vmatmul.mubr.msk.f32.vlgmr.msra.gmra.mxu1 %vm1368_vm1, %v3551_v49  ;;  %v6645_v8 = vcombine.high %v4101_v46, %v4109_v48 }
0x13b0   : > { %7351 = vmatpush3.msra.mxu1 %v2844_v45  ;;  %v4108_v45 = vld [vmem:[%s7884_s6 + $0xc0] sm:$0xff] }
0x13b1   : > { %7355 = vmatprep.subr.msk.mxu1 %vm1461_vm2, %v3739_v12  ;;  %v6643_v47 = vcombine.high %v4100_v44, %v4108_v45  ;;  %v6642_v49 = vcombine.low %v4100_v44, %v4108_v45 }
0x146f   : > { %v7349_v52 = vpop.f32.mrf.mxu1 }
0x1471   : > { %v3636_v53 = vpop.f32.mrf.mxu1 }
0x1472   : > { %7352 = vmatprep.mubr.msk.f32.mxu1 %vm1461_vm2, %v3636_v53 }
0x1473   : > { %7353 = vmatmul.mubr.msk.f32.vlgmr.msra.gmra.mxu1 %vm1461_vm2, %v7349_v52  ;;  %v4085_v52 = vld [vmem:[%s7884_s6 + $0x8] sm:$0xff] }
0x1474   : > { %7356 = vmatpush3.xpose.msk.msra.mxu1 %vm1461_vm2, %v3739_v12  ;;  %7363 = vmatprep.mubr.msk.f32.mxu1 %vm1461_vm2, %v3729_v54  ;;  %v6644_v12 = vcombine.low %v4101_v46, %v4109_v48  ;;  %v4093_v54 = vld [vmem:[%s7884_s6 + $0x48] sm:$0xff]  ;;  %v4088_v46 = vld [vmem:[%s7884_s6 + $0x20] sm:$0xff] }
0x1475   : > { %7357 = vmatprep.subr.msk.mxu1 %vm1461_vm2, %v3737_v55  ;;  %v4089_v48 = vld [vmem:[%s7884_s6 + $0x28] sm:$0xff] }
0x1478   : > { %7358 = vmatpush3.xpose.msk.msra.mxu1 %vm1461_vm2, %v3737_v55 }
0x1479   : > { %7359 = vmatprep.subr.msk.mxu1 %vm1461_vm2, %v3735_v51 }
0x147c   : > { %7360 = vmatpush3.xpose.msk.msra.mxu1 %vm1461_vm2, %v3735_v51  ;;  %v4092_v51 = vld [vmem:[%s7884_s6 + $0x40] sm:$0xff] }
0x147d   : > { %7361 = vmatprep.subr.msk.mxu1 %vm1461_vm2, %v3733_v56  ;;  %v6627_v53 = vcombine.high %v4084_v50, %v4092_v51  ;;  %v6626_v55 = vcombine.low %v4084_v50, %v4092_v51 }
0x1480   : > { %7362 = vmatpush3.xpose.msk.msra.mxu1 %vm1461_vm2, %v3733_v56  ;;  %v6628_v56 = vcombine.low %v4085_v52, %v4093_v54 }
0x1481   : > { %4418 = vmatprep.subr.bf16.mxu1 %v6645_v8 }
0x1483   : > { %7364 = vmatmul.mubr.msk.f32.vlgmr.msra.gmra.mxu1 %vm1461_vm2, %v3731_v57  ;;  %v6629_v57 = vcombine.high %v4085_v52, %v4093_v54  ;;  %v4106_v52 = vld [vmem:[%s7884_s6 + $0xb0] sm:$0xff]  ;;  %v4107_v54 = vld [vmem:[%s7884_s6 + $0xb8] sm:$0xff] }
0x1484   : > { %4419 = vmatpush1.bf16.msra.mxu1 %v6644_v12 }
0x1485   : > { %4420 = vmatprep.subr.bf16.mxu1 %v6629_v57 }
0x1488   : > { %4421 = vmatpush1.bf16.msra.mxu1 %v6628_v56 }
0x1533   : > { %v7354_v59 = vpop.f32.mrf.mxu1 }
0x1534   : > { %v3727_v62 = vadd.f32 %v7354_v59, %v3428_v58  ;;  %v4102_v58 = vld [vmem:[%s7884_s6 + $0x90] sm:$0xff] }
0x1535   : > { %v3717_v63 = vpop.f32.mrf.mxu1  ;;  %v4110_v59 = vld [vmem:[%s7884_s6 + $0xd0] sm:$0xff] }
0x1536   : > { %v3726_v0 = vadd.f32 %v3717_v63, %v3423_v60  ;;  %v4103_v60 = vld [vmem:[%s7884_s6 + $0x98] sm:$0xff] }
0x1537   : > { %v4111_v63 = vld [vmem:[%s7884_s6 + $0xd8] sm:$0xff] }
0x1543   : > { %v7365_v1 = vpop.f32.mrf.mxu1 }
0x1544   : > { %v3830_v3 = vsel %vm1368_vm1, %v7365_v1, -inf }
0x1545   : > { %3831 = vmax.xlane.f32.xlu1 %v3830_v3  ;;  %v3818_v7 = vpop.f32.mrf.mxu1  ;;  %v6648_v3 = vcombine.low %v4103_v60, %v4111_v63 }
0x1546   : > { %v3827_v9 = vsel %vm1368_vm1, %v3818_v7, -inf }
0x1547   : > { %3828 = vmax.xlane.f32.xlu0 %v3827_v9 }
0x1556   : > { %3855 = vrot.lane.b32.xlu1 %v8160_v2, %s7677_s23 }
0x155a   : > { %3851 = vrot.lane.b32.xlu1 %v8168_v5, %s7677_s23 }
0x155e   : > { %3849 = vrot.lane.b32.xlu1 %v8174_v6, %s7677_s23 }
0x15ce   : > { %v3832_v11 = vpop.xlane.xlu1 %3831 }
0x15cf   : > { %v3834_v14 = vsub.f32 %v7365_v1, %v3832_v11  ;;  %v6646_v1 = vcombine.low %v4102_v58, %v4110_v59 }
0x15d0   : > { %v3829_v15 = vpop.xlane.xlu0 %3828 }
0x15d1   : > { %v3837_v16 = vmul.f32 1.442695, %v3834_v14  ;;  %v3833_v17 = vsub.f32 %v3818_v7, %v3829_v15  ;;  %v6649_v7 = vcombine.high %v4103_v60, %v4111_v63  ;;  %v4090_v60 = vld [vmem:[%s7884_s6 + $0x30] sm:$0xff]  ;;  %v4091_v63 = vld [vmem:[%s7884_s6 + $0x38] sm:$0xff] }
0x15d2   : > { %v3856_v18 = vpop.permute.xlu1 %3855 }
0x15d3   : > { %7616 = vpow2.f32 %v3837_v16  ;;  %v3835_v19 = vmul.f32 1.442695, %v3833_v17  ;;  %7366 = vmatprep.subr.mxu0 %v3856_v18  ;;  %4504 = vmatprep.subr.bf16.mxu1 %v6649_v7 }
0x15d4   : > { %7367 = vmatpush3.msra.mxu0 %v3856_v18 }
0x15d5   : > { %7618 = vpow2.f32 %v3835_v19 }
0x15d6   : > { %v3852_v23 = vpop.permute.xlu1 %3851 }
0x15da   : > { %v3850_v25 = vpop.permute.xlu1 %3849 }
0x15e0   : > { %v7617_v20 = vpop.eup %7616 }
0x15e1   : > { %v3842_v2 = vsel %vm1368_vm1, %v7617_v20, 0.0 }
0x15e2   : > { %v7619_v21 = vpop.eup %7618  ;;  %3843 = vadd.xlane.f32.xlu0 %v3842_v2 }
0x15e3   : > { %v3839_v5 = vsel %vm1368_vm1, %v7619_v21, 0.0 }
0x15e6   : > { %3840 = vadd.xlane.f32.xlu0 %v3839_v5 }
0x15fc   : > { %3853 = vrot.lane.b32.xlu0 %v8164_v4, %s7677_s23 }
0x166b   : > { %v3844_v6 = vpop.xlane.xlu0 %3843 }
0x166c   : > { %7620 = vrcp.f32 %v3844_v6 }
0x166f   : > { %v3841_v22 = vpop.xlane.xlu0 %3840 }
0x1670   : > { %7622 = vrcp.f32 %v3841_v22 }
0x1673   : > { %v3854_v24 = vpop.permute.xlu0 %3853 }
0x1674   : > { %7368 = vmatprep.subr.mxu0 %v3854_v24 }
0x1675   : > { %7369 = vmatpush3.msra.mxu0 %v3854_v24 }
0x1676   : > { %7370 = vmatprep.subr.mxu0 %v3852_v23 }
0x1677   : > { %7371 = vmatpush3.msra.mxu0 %v3852_v23 }
0x1678   : > { %7372 = vmatprep.subr.mxu0 %v3850_v25 }
0x1679   : > { %7373 = vmatpush3.msra.mxu0 %v3850_v25  ;;  %v7621_v27 = vpop.eup %7620 }
0x167a   : > { %7377 = vmatprep.subr.mxu0 %v2845_v26  ;;  %v3848_v4 = vmul.f32 %v7621_v27, %v7617_v20 }
0x167d   : > { %v7623_v28 = vpop.eup %7622 }
0x167e   : > { %v3847_v29 = vmul.f32 %v7623_v28, %v7619_v21 }
0x1680   : > { %7374 = vmatprep.mubr.msk.f32.mxu0 %vm1368_vm1, %v3847_v29 }
0x1681   : > { %7375 = vmatmul.mubr.msk.f32.vlgmr.msra.gmra.mxu0 %vm1368_vm1, %v3848_v4 }
0x1682   : > { %7378 = vmatpush3.msra.mxu0 %v2845_v26  ;;  %v6624_v26 = vld [vmem:[%s1073_s15] ss:$0 sm:$0xff]  ;;  %s8808_s15 = sld [smem:[#allocation11_spill]] }
0x1683   : > { %4375 = vmatprep.subr.bf16.mxu0 %v6643_v47  ;;  %v4096_v47 = vld [vmem:[%s7884_s6 + $0x60] sm:$0xff] }
0x1684   : > { %v6635_v50 = vcombine.high %v4088_v46, %v4096_v47  ;;  %v6634_v56 = vcombine.low %v4088_v46, %v4096_v47 }
0x1741   : > { %v7376_v30 = vpop.f32.mrf.mxu0 }
0x1743   : > { %v3933_v31 = vpop.f32.mrf.mxu0 }
0x1744   : > { %7379 = vmatprep.mubr.msk.f32.mxu0 %vm1461_vm2, %v3933_v31 }
0x1745   : > { %7380 = vmatmul.mubr.msk.f32.vlgmr.msra.gmra.mxu0 %vm1461_vm2, %v7376_v30  ;;  %v6625_v30 = vld [vmem:[%s1076_s24] ss:$0 sm:$0xff]  ;;  %s8809_s24 = scalar_lea.vmem %s8735_s17, %s7832_s7 }
0x1746   : > { %4376 = vmatpush1.bf16.msra.mxu0 %v6642_v49  ;;  %v4097_v49 = vld [vmem:[%s7884_s6 + $0x68] sm:$0xff] }
0x1747   : > { %4377 = vmatprep.subr.bf16.mxu0 %v6627_v53  ;;  %v6637_v51 = vcombine.high %v4089_v48, %v4097_v49  ;;  %v4114_v53 = vld [vmem:[%s7884_s6 + $0xf0] sm:$0xff]  ;;  %v6636_v57 = vcombine.low %v4089_v48, %v4097_v49 }
0x174a   : > { %4378 = vmatpush1.bf16.msra.mxu0 %v6626_v55  ;;  %v4115_v55 = vld [vmem:[%s7884_s6 + $0xf8] sm:$0xff] }
0x174b   : > { %v6656_v7 = vcombine.low %v4107_v54, %v4115_v55 }
0x1805   : > { %v7381_v33 = vpop.f32.mrf.mxu0 }
0x1806   : > { %v4024_v34 = vadd.f32 %v7381_v33, %v3727_v62  ;;  %v6647_v62 = vcombine.high %v4102_v58, %v4110_v59  ;;  %v4094_v33 = vld [vmem:[%s7884_s6 + $0x50] sm:$0xff]  ;;  %v6655_v58 = vcombine.high %v4106_v52, %v4114_v53  ;;  %v6657_v59 = vcombine.high %v4107_v54, %v4115_v55 }
0x1807   : > { %v4014_v35 = vpop.f32.mrf.mxu0 }
0x1808   : > { %v4032_v36 = vadd.f32 %v6623_v32, %v4024_v34  ;;  %v4023_v37 = vadd.f32 %v4014_v35, %v3726_v0  ;;  %v7681_v0 = vmov 0   ;;  %4461 = vmatprep.subr.bf16.mxu0 %v6647_v62  ;;  %v4087_v34 = vld [vmem:[%s7884_s6 + $0x18] sm:$0xff]  ;;  %v4098_v62 = vld [vmem:[%s7884_s6 + $0x70] sm:$0xff] }
0x1809   : > { %4395 = vmatprep.mubr.bf16.mxu0 %v7681_v0  ;;  %4438 = vmatprep.mubr.bf16.mxu1 %v7681_v0  ;;  %v4095_v35 = vld [vmem:[%s7884_s6 + $0x58] sm:$0xff] }
0x180a   : > { %v8343_v38 = vadd.f32 %v4032_v36, %v8149_v10  ;;  %v4031_v39 = vadd.f32 %v6623_v32, %v4023_v37  ;;  %v4086_v32 = vld [vmem:[%s7884_s6 + $0x10] sm:$0xff] }
0x180c   : > { %v8346_v40 = vadd.f32 %v4031_v39, %v8147_v61  ;;  %v4040_v13 = vsel %vm1368_vm1, %v8343_v38, 0.0  ;;  %v4046_v10 = vmul.f32 %v8343_v38, %v8343_v38  ;;  %v6631_v39 = vcombine.high %v4086_v32, %v4094_v33 }
0x180d   : > { %4041 = vadd.xlane.f32.xlu1 %v4040_v13  ;;  %v4104_v13 = vld [vmem:[%s7884_s6 + $0xa0] sm:$0xff] }
0x180e   : > { %v4037_v41 = vsel %vm1368_vm1, %v8346_v40, 0.0  ;;  %v4045_v42 = vmul.f32 %v8346_v40, %v8346_v40  ;;  %v4050_v61 = vsel %vm1368_vm1, %v4046_v10, 0.0  ;;  %v6630_v10 = vcombine.low %v4086_v32, %v4094_v33  ;;  %v7449_v32 = vld [vmem:[%s7896_s8 + $0xd0] sm:$0xff]  }
0x180f   : > { %4038 = vadd.xlane.f32.xlu0 %v4037_v41  ;;  %v4112_v41 = vld [vmem:[%s7884_s6 + $0xe0] sm:$0xff]  ;;  %v7450_v33 = vld [vmem:[%s7896_s8 + $0x10] sm:$0xff]  }
0x1810   : > { %v4047_v43 = vsel %vm1368_vm1, %v4045_v42, 0.0  ;;  %v4105_v42 = vld [vmem:[%s7884_s6 + $0xa8] sm:$0xff]  ;;  %v6651_v44 = vcombine.high %v4104_v13, %v4112_v41  ;;  %v6650_v12 = vcombine.low %v4104_v13, %v4112_v41  ;;  %v7456_v13 = vld [vmem:[%s7896_s8 + $0x40] sm:$0xff]  }
0x1811   : > { %v7457_v41 = vld [vmem:[%s7896_s8 + $0xc0] sm:$0xff]  }
0x1813   : > { %4048 = vadd.xlane.f32.xlu0 %v4047_v43  ;;  %v4113_v43 = vld [vmem:[%s7884_s6 + $0xe8] sm:$0xff] }
0x1814   : > { %v6653_v45 = vcombine.high %v4105_v42, %v4113_v43  ;;  %v6652_v8 = vcombine.low %v4105_v42, %v4113_v43  ;;  %v7458_v42 = vld [vmem:[%s7896_s8] sm:$0xff]  }
0x1815   : > { %v7459_v43 = vld [vmem:[%s7896_s8 + $0x80] sm:$0xff]  }
0x1817   : > { %4051 = vadd.xlane.f32.xlu0 %v4050_v61  ;;  %v6632_v61 = vcombine.low %v4087_v34, %v4095_v35 }
0x1896   : > { %v4042_v14 = vpop.xlane.xlu1 %4041 }
0x1897   : > { %v4044_v16 = vmul.f32 0.03125, %v4042_v14  ;;  %v6638_v14 = vcombine.low %v4090_v60, %v4098_v62 }
0x1898   : > { %v4039_v9 = vpop.xlane.xlu0 %4038 }
0x1899   : > { %v4043_v11 = vmul.f32 0.03125, %v4039_v9  ;;  %v4056_v2 = vmul.f32 %v4044_v16, %v4044_v16  ;;  %v4060_v27 = vsub.f32 %v8343_v38, %v4044_v16  ;;  %v6639_v9 = vcombine.high %v4090_v60, %v4098_v62  ;;  %v7428_v16 = vld [vmem:[%s7896_s8 + $0x78] sm:$0xff]  }
0x189b   : > { %v4055_v17 = vmul.f32 %v4043_v11, %v4043_v11  ;;  %v4059_v23 = vsub.f32 %v8346_v40, %v4043_v11  ;;  %v6633_v40 = vcombine.high %v4087_v34, %v4095_v35  ;;  %v7451_v34 = vld [vmem:[%s7896_s8 + $0x90] sm:$0xff]   ;;  %v7452_v35 = vld [vmem:[%s7896_s8 + $0x48] sm:$0xff]  }
0x189c   : > { %v4049_v15 = vpop.xlane.xlu0 %4048 }
0x189d   : > { %v4053_v18 = vmul.f32 0.03125, %v4049_v15 }
0x189f   : > { %v4057_v19 = vsub.f32 %v4053_v18, %v4055_v17  ;;  %v7429_v17 = vld [vmem:[%s7896_s8 + $0xf8] sm:$0xff]  }
0x18a0   : > { %v4052_v20 = vpop.xlane.xlu0 %4051  ;;  %v7430_v18 = vld [vmem:[%s7896_s8 + $0x38] sm:$0xff]  }
0x18a1   : > { %v4061_v21 = vadd.f32 1e-05, %v4057_v19  ;;  %v4054_v5 = vmul.f32 0.03125, %v4052_v20  ;;  %v7431_v19 = vld [vmem:[%s7896_s8 + $0xb8] sm:$0xff]   ;;  %v7432_v20 = vld [vmem:[%s7896_s8 + $0x70] sm:$0xff]  }
0x18a3   : > { %7624 = vrsqrt.f32 %v4061_v21  ;;  %v4058_v6 = vsub.f32 %v4054_v5, %v4056_v2  ;;  %v7433_v2 = vld [vmem:[%s7896_s8 + $0xf0] sm:$0xff]   ;;  %v7436_v5 = vld [vmem:[%s7896_s8 + $0x68] sm:$0xff]  }
0x18a4   : > { %v7435_v21 = vld [vmem:[%s7896_s8 + $0xb0] sm:$0xff]  }
0x18a5   : > { %v4062_v22 = vadd.f32 1e-05, %v4058_v6  ;;  %v7437_v6 = vld [vmem:[%s7896_s8 + $0xe8] sm:$0xff]  }
0x18a7   : > { %7626 = vrsqrt.f32 %v4062_v22  ;;  %v7438_v22 = vld [vmem:[%s7896_s8 + $0x28] sm:$0xff]  }
0x18b0   : > { %v7625_v24 = vpop.eup %7624 }
0x18b1   : > { %v4065_v25 = vmul.f32 %v7625_v24, %v4059_v23  ;;  %v7439_v23 = vld [vmem:[%s7896_s8 + $0xa8] sm:$0xff]   ;;  %v7440_v24 = vld [vmem:[%s7896_s8 + $0x60] sm:$0xff]  }
0x18b3   : > { %v4073_v29 = vmul.f32 %v6624_v26, %v4065_v25  ;;  %v7441_v25 = vld [vmem:[%s7896_s8 + $0xe0] sm:$0xff]  }
0x18b4   : > { %v7627_v28 = vpop.eup %7626 }
0x18b5   : > { %v4066_v4 = vmul.f32 %v7627_v28, %v4060_v27  ;;  %v8388_v36 = vadd.f32 %v6625_v30, %v4073_v29  ;;  %v7443_v27 = vld [vmem:[%s7896_s8 + $0xa0] sm:$0xff]   ;;  %v7444_v28 = vld [vmem:[%s7896_s8 + $0x58] sm:$0xff]  }
0x18b6   : > { %v7445_v29 = vld [vmem:[%s7896_s8 + $0xd8] sm:$0xff]  }
0x18b7   : > { %v4074_v31 = vmul.f32 %v6624_v26, %v4066_v4  ;;  %v7442_v26 = vld [vmem:[%s7896_s8 + $0x20] sm:$0xff]   ;;  %v7446_v4 = vld [vmem:[%s7896_s8 + $0x18] sm:$0xff]  }
0x18b9   : > { %v8390_v37 = vadd.f32 %v6625_v30, %v4074_v31  ;;  %v7447_v30 = vld [vmem:[%s7896_s8 + $0x98] sm:$0xff]   ;;  %v7448_v31 = vld [vmem:[%s7896_s8 + $0x50] sm:$0xff]  }
0x18bb   : > { %v8394_v38 = vpack.c.bf16 %v8390_v37, %v8388_v36 }
0x18bd   : > { %6658 = vmatmul.mubr.msk.bf16.vlgmr.msra.gmra.mxu0 %vm1368_vm1, %v8394_v38  ;;  %6659 = vmatmul.mubr.msk.bf16.vlgmr.msra.gmra.mxu1 %vm1368_vm1, %v8394_v38 }
0x18be   : > { %4462 = vmatpush1.bf16.msra.mxu0 %v6646_v1  ;;  %4505 = vmatpush1.bf16.msra.mxu1 %v6648_v3  ;;  %v4099_v1 = vld [vmem:[%s7884_s6 + $0x78] sm:$0xff]  ;;  %v6654_v3 = vcombine.low %v4106_v52, %v4114_v53 }
0x18bf   : > { %4463 = vmatprep.subr.bf16.mxu0 %v6631_v39  ;;  %4506 = vmatprep.subr.bf16.mxu1 %v6633_v40  ;;  %v6641_v11 = vcombine.high %v4091_v63, %v4099_v1  ;;  %v6640_v15 = vcombine.low %v4091_v63, %v4099_v1  ;;  %v7454_v39 = vld [vmem:[%s7896_s8 + $0x8] sm:$0xff]  }
0x18c0   : > { %4481 = vmatprep.mubr.bf16.mxu0 %v7681_v0  ;;  %4524 = vmatprep.mubr.bf16.mxu1 %v7681_v0  ;;  %v7455_v40 = vld [vmem:[%s7896_s8 + $0x88] sm:$0xff]  }
0x18c2   : > { %4464 = vmatpush1.bf16.msra.mxu0 %v6630_v10  ;;  %4507 = vmatpush1.bf16.msra.mxu1 %v6632_v61  ;;  %v7460_v10 = vld [vmem:[%s7896_s8 + $0x178] sm:$0xff]  }
0x18c3   : > { %4547 = vmatprep.subr.bf16.mxu0 %v6651_v44  ;;  %4590 = vmatprep.subr.bf16.mxu1 %v6653_v45  ;;  %v7461_v61 = vld [vmem:[%s7896_s8 + $0x1f8] sm:$0xff]   ;;  %v4120_v44 = vlaneseq }
0x18c5   : > { %6660 = vmatmul.mubr.msk.bf16.vlgmr.msra.gmra.mxu0 %vm1368_vm1, %v8394_v38  ;;  %6661 = vmatmul.mubr.msk.bf16.vlgmr.msra.gmra.mxu1 %vm1368_vm1, %v8394_v38  ;;  %v8468_v45 = vshrl.u32 %v4120_v44, 7 }
0x18c6   : > { %4548 = vmatpush1.bf16.msra.mxu0 %v6650_v12  ;;  %4591 = vmatpush1.bf16.msra.mxu1 %v6652_v8  ;;  %v8475_v12 = vld [vmem:[%s8808_s15] sm:$0xff] }
0x18c7   : > { %4549 = vmatprep.subr.bf16.mxu0 %v6635_v50  ;;  %4592 = vmatprep.subr.bf16.mxu1 %v6637_v51  ;;  %v4126_v46 = vsub.s32 1, %v8468_v45  ;;  %v4134_v47 = vsub.s32 3, %v8468_v45  ;;  %v4122_v48 = vsub.s32 0, %v8468_v45  ;;  %v4130_v49 = vsub.s32 2, %v8468_v45 }
0x18c8   : > { %4567 = vmatprep.mubr.bf16.mxu0 %v7681_v0  ;;  %4610 = vmatprep.mubr.bf16.mxu1 %v7681_v0  ;;  %v4150_v60 = vsub.s32 7, %v8468_v45 }
0x18c9   : > { %v4127_v51 = vrot.slane %v8475_v12, %v4126_v46  ;;  %v4135_v52 = vrot.slane %v8475_v12, %v4134_v47  ;;  %v4123_v53 = vrot.slane %v8475_v12, %v4122_v48  ;;  %v4131_v54 = vrot.slane %v8475_v12, %v4130_v49 }
0x18ca   : > { %4550 = vmatpush1.bf16.msra.mxu0 %v6634_v56  ;;  %4593 = vmatpush1.bf16.msra.mxu1 %v6636_v57 }
0x18cb   : > { %4633 = vmatprep.subr.bf16.mxu0 %v6655_v58  ;;  %4676 = vmatprep.subr.bf16.mxu1 %v6657_v59  ;;  %v4142_v59 = vsub.s32 5, %v8468_v45 }
0x18cd   : > { %6662 = vmatmul.mubr.msk.bf16.vlgmr.msra.gmra.mxu0 %vm1368_vm1, %v8394_v38  ;;  %6663 = vmatmul.mubr.msk.bf16.vlgmr.msra.gmra.mxu1 %vm1368_vm1, %v8394_v38 }
0x18ce   : > { %4634 = vmatpush1.bf16.msra.mxu0 %v6654_v3  ;;  %4677 = vmatpush1.bf16.msra.mxu1 %v6656_v7 }
0x18cf   : > { %4635 = vmatprep.subr.bf16.mxu0 %v6639_v9  ;;  %4678 = vmatprep.subr.bf16.mxu1 %v6641_v11 }
0x18d0   : > { %4653 = vmatprep.mubr.bf16.mxu0 %v7681_v0  ;;  %4696 = vmatprep.mubr.bf16.mxu1 %v7681_v0  ;;  %v7434_v0 = vld [vmem:[%s7896_s8 + $0x30] sm:$0xff]  }
0x18d2   : > { %4636 = vmatpush1.bf16.msra.mxu0 %v6638_v14  ;;  %4679 = vmatpush1.bf16.msra.mxu1 %v6640_v15 }
0x18d3   : > { %6952 = vmatprep.subr.bf16.mxu0 %v7428_v16  ;;  %6974 = vmatprep.subr.bf16.mxu1 %v7429_v17 }
0x18d5   : > { %6664 = vmatmul.mubr.msk.bf16.vlgmr.msra.gmra.mxu0 %vm1368_vm1, %v8394_v38  ;;  %6665 = vmatmul.mubr.msk.bf16.vlgmr.msra.gmra.mxu1 %vm1368_vm1, %v8394_v38  ;;  %v7453_v38 = vld [vmem:[%s7896_s8 + $0xc8] sm:$0xff]  }
0x18d6   : > { %6953 = vmatpush3.bf16.msra.mxu0 %v7430_v18  ;;  %6975 = vmatpush3.bf16.msra.mxu1 %v7431_v19 }
0x18d7   : > { %6954 = vmatprep.subr.bf16.mxu0 %v7432_v20  ;;  %6976 = vmatprep.subr.bf16.mxu1 %v7433_v2  ;;  %v4143_v2 = vrot.slane %v8475_v12, %v4142_v59 }
0x18da   : > { %6955 = vmatpush3.bf16.msra.mxu0 %v7434_v0  ;;  %6977 = vmatpush3.bf16.msra.mxu1 %v7435_v21  ;;  %v4151_v0 = vrot.slane %v8475_v12, %v4150_v60 }
0x18db   : > { %6956 = vmatprep.subr.bf16.mxu0 %v7436_v5  ;;  %6978 = vmatprep.subr.bf16.mxu1 %v7437_v6 }
0x18de   : > { %6957 = vmatpush3.bf16.msra.mxu0 %v7438_v22  ;;  %6979 = vmatpush3.bf16.msra.mxu1 %v7439_v23 }
0x18df   : > { %6958 = vmatprep.subr.bf16.mxu0 %v7440_v24  ;;  %6980 = vmatprep.subr.bf16.mxu1 %v7441_v25 }
0x18e2   : > { %6959 = vmatpush3.bf16.msra.mxu0 %v7442_v26  ;;  %6981 = vmatpush3.bf16.msra.mxu1 %v7443_v27 }
0x18e3   : > { %6960 = vmatprep.subr.bf16.mxu0 %v7444_v28  ;;  %6982 = vmatprep.subr.bf16.mxu1 %v7445_v29  ;;  %v7462_v29 = vld [vmem:[%s7896_s8 + $0x138] sm:$0xff]  }
0x18e6   : > { %6961 = vmatpush3.bf16.msra.mxu0 %v7446_v4  ;;  %6983 = vmatpush3.bf16.msra.mxu1 %v7447_v30  ;;  %v7463_v4 = vld [vmem:[%s7896_s8 + $0x1b8] sm:$0xff]  }
0x18e7   : > { %6962 = vmatprep.subr.bf16.mxu0 %v7448_v31  ;;  %6984 = vmatprep.subr.bf16.mxu1 %v7449_v32 }
0x18ea   : > { %6963 = vmatpush3.bf16.msra.mxu0 %v7450_v33  ;;  %6985 = vmatpush3.bf16.msra.mxu1 %v7451_v34  ;;  %v7464_v34 = vld [vmem:[%s7896_s8 + $0x170] sm:$0xff]  }
0x18eb   : > { %6964 = vmatprep.subr.bf16.mxu0 %v7452_v35  ;;  %6986 = vmatprep.subr.bf16.mxu1 %v7453_v38  ;;  %v7465_v35 = vld [vmem:[%s7896_s8 + $0x1f0] sm:$0xff]  }
0x18ee   : > { %6965 = vmatpush3.bf16.msra.mxu0 %v7454_v39  ;;  %6987 = vmatpush3.bf16.msra.mxu1 %v7455_v40 }
0x18ef   : > { %6966 = vmatprep.subr.bf16.mxu0 %v7456_v13  ;;  %6988 = vmatprep.subr.bf16.mxu1 %v7457_v41 }
0x18f2   : > { %6967 = vmatpush3.bf16.msra.mxu0 %v7458_v42  ;;  %6989 = vmatpush3.bf16.msra.mxu1 %v7459_v43  ;;  %v7466_v43 = vld [vmem:[%s7896_s8 + $0x130] sm:$0xff]  }
0x18f3   : > { %6996 = vmatprep.subr.bf16.mxu0 %v7460_v10  ;;  %7018 = vmatprep.subr.bf16.mxu1 %v7461_v61  ;;  %v7467_v10 = vld [vmem:[%s7896_s8 + $0x1b0] sm:$0xff]   ;;  %v7468_v61 = vld [vmem:[%s7896_s8 + $0x168] sm:$0xff]  }
0x197d   : > { %v4397_v8 = vpop.f32.mrf.mxu0  ;;  %v4440_v50 = vpop.f32.mrf.mxu1 }
0x197e   : > { %v4398_v7 = vadd.f32 %v4397_v8, %v4123_v53  ;;  %v4441_v9 = vadd.f32 %v4440_v50, %v4131_v54 }
0x197f   : > { %v4399_v55 = vpop.f32.mrf.mxu0  ;;  %v4442_v56 = vpop.f32.mrf.mxu1 }
0x1980   : > { %v4400_v62 = vadd.f32 %v4399_v55, %v4127_v51  ;;  %v4443_v63 = vadd.f32 %v4442_v56, %v4135_v52  ;;  %v4707_v23 = vmax.f32 %v4398_v7, 0.0  ;;  %v4709_v24 = vmax.f32 %v4441_v9, 0.0  ;;  %v7470_v55 = vld [vmem:[%s7896_s8 + $0x128] sm:$0xff]   ;;  %v7476_v7 = vld [vmem:[%s7896_s8 + $0x158] sm:$0xff]  }
0x1981   : > { %v4401_v57 = vpop.f32.mrf.mxu0  ;;  %v4444_v58 = vpop.f32.mrf.mxu1  ;;  %v7471_v56 = vld [vmem:[%s7896_s8 + $0x1a8] sm:$0xff]   ;;  %v7477_v9 = vld [vmem:[%s7896_s8 + $0x1d8] sm:$0xff]  }
0x1982   : > { %v4402_v1 = vadd.f32 %v4401_v57, %v4123_v53  ;;  %v4445_v3 = vadd.f32 %v4444_v58, %v4131_v54  ;;  %v4708_v21 = vmax.f32 %v4400_v62, 0.0  ;;  %v4710_v5 = vmax.f32 %v4443_v63, 0.0  ;;  %v7472_v57 = vld [vmem:[%s7896_s8 + $0x160] sm:$0xff]  }
0x1983   : > { %v4403_v11 = vpop.f32.mrf.mxu0  ;;  %v4446_v14 = vpop.f32.mrf.mxu1  ;;  %v7473_v58 = vld [vmem:[%s7896_s8 + $0x1e0] sm:$0xff]  }
0x1984   : > { %v4404_v15 = vadd.f32 %v4403_v11, %v4127_v51  ;;  %v4447_v16 = vadd.f32 %v4446_v14, %v4135_v52  ;;  %v4723_v17 = vmax.f32 %v4402_v1, 0.0  ;;  %v4725_v18 = vmax.f32 %v4445_v3, 0.0  ;;  %v7469_v52 = vld [vmem:[%s7896_s8 + $0x1e8] sm:$0xff]   ;;  %v7474_v63 = vld [vmem:[%s7896_s8 + $0x120] sm:$0xff]   ;;  %v7478_v14 = vld [vmem:[%s7896_s8 + $0x118] sm:$0xff]  }
0x1985   : > { %v8491_v19 = vpop.f32.mrf.mxu0  ;;  %v8493_v20 = vpop.f32.mrf.mxu1  ;;  %v7475_v3 = vld [vmem:[%s7896_s8 + $0x1a0] sm:$0xff]  }
0x1986   : > { %v4724_v6 = vmax.f32 %v4404_v15, 0.0  ;;  %v4726_v22 = vmax.f32 %v4447_v16, 0.0  ;;  %v4739_v30 = vpack.c.bf16 %v4723_v17, %v4707_v23  ;;  %v4741_v31 = vpack.c.bf16 %v4725_v18, %v4709_v24  ;;  %v7479_v16 = vld [vmem:[%s7896_s8 + $0x198] sm:$0xff]   ;;  %v7480_v17 = vld [vmem:[%s7896_s8 + $0x150] sm:$0xff]   ;;  %v7484_v23 = vld [vmem:[%s7896_s8 + $0x148] sm:$0xff]  }
0x1987   : > { %v4485_v25 = vpop.f32.mrf.mxu0  ;;  %v4528_v26 = vpop.f32.mrf.mxu1  ;;  %v7481_v18 = vld [vmem:[%s7896_s8 + $0x1d0] sm:$0xff]   ;;  %v7485_v24 = vld [vmem:[%s7896_s8 + $0x1c8] sm:$0xff]  }
0x1988   : > { %v4740_v27 = vpack.c.bf16 %v4724_v6, %v4708_v21  ;;  %v4742_v28 = vpack.c.bf16 %v4726_v22, %v4710_v5  ;;  %v4486_v38 = vadd.f32 %v4485_v25, %v4143_v2  ;;  %v4529_v39 = vadd.f32 %v4528_v26, %v4151_v0  ;;  %v7482_v5 = vld [vmem:[%s7896_s8 + $0x110] sm:$0xff]  }
0x1989   : > { %v8503_v32 = vpop.f32.mrf.mxu0  ;;  %v8505_v33 = vpop.f32.mrf.mxu1  ;;  %v7483_v22 = vld [vmem:[%s7896_s8 + $0x190] sm:$0xff]  }
0x198a   : > { %5818 = vmatprep.mubr.bf16.mxu0 %v4740_v27  ;;  %5859 = vmatprep.mubr.bf16.mxu1 %v4742_v28  ;;  %v4712_v44 = vmax.f32 %v4486_v38, 0.0  ;;  %v4714_v8 = vmax.f32 %v4529_v39, 0.0  ;;  %v8546_v27 = vld [vmem:[%s8808_s15 + $0x8] sm:$0xff] }
0x198b   : > { %v4489_v40 = vpop.f32.mrf.mxu0  ;;  %v4532_v13 = vpop.f32.mrf.mxu1  ;;  %5819 = vmatmul.mubr.bf16.vlgmr.msra.gmra.mxu0 %v4739_v30  ;;  %5860 = vmatmul.mubr.bf16.vlgmr.msra.gmra.mxu1 %v4741_v31  ;;  %v4159_v30 = vrot.slane %v8546_v27, %v4126_v46  ;;  %v4167_v38 = vrot.slane %v8546_v27, %v4134_v47 }
0x198c   : > { %v4490_v41 = vadd.f32 %v4489_v40, %v4143_v2  ;;  %v4533_v42 = vadd.f32 %v4532_v13, %v4151_v0  ;;  %6997 = vmatpush3.bf16.msra.mxu0 %v7462_v29  ;;  %7019 = vmatpush3.bf16.msra.mxu1 %v7463_v4  ;;  %v4138_v2 = vsub.s32 4, %v8468_v45  ;;  %v4146_v0 = vsub.s32 6, %v8468_v45  ;;  %v7486_v29 = vld [vmem:[%s7896_s8 + $0x108] sm:$0xff]   ;;  %v7554_v45 = vld [vmem:[%s7896_s8 + $0x300] sm:$0xff]  }
0x198d   : > { %6998 = vmatprep.subr.bf16.mxu0 %v7464_v34  ;;  %7020 = vmatprep.subr.bf16.mxu1 %v7465_v35  ;;  %v8517_v62 = vpop.f32.mrf.mxu0  ;;  %v8520_v1 = vpop.f32.mrf.mxu1  ;;  %v7487_v34 = vld [vmem:[%s7896_s8 + $0x188] sm:$0xff]   ;;  %v7488_v35 = vld [vmem:[%s7896_s8 + $0x140] sm:$0xff]  }
0x198e   : > { %v4728_v50 = vmax.f32 %v4490_v41, 0.0  ;;  %v4730_v51 = vmax.f32 %v4533_v42, 0.0  ;;  %v4139_v25 = vrot.slane %v8475_v12, %v4138_v2  ;;  %v4147_v26 = vrot.slane %v8475_v12, %v4146_v0  ;;  %v7490_v41 = vld [vmem:[%s7896_s8 + $0x100] sm:$0xff]  }
0x198f   : > { %v4571_v11 = vpop.f32.mrf.mxu0  ;;  %v4614_v15 = vpop.f32.mrf.mxu1 }
0x1990   : > { %v4744_v53 = vpack.c.bf16 %v4728_v50, %v4712_v44  ;;  %v4746_v54 = vpack.c.bf16 %v4730_v51, %v4714_v8  ;;  %6999 = vmatpush3.bf16.msra.mxu0 %v7466_v43  ;;  %7021 = vmatpush3.bf16.msra.mxu1 %v7467_v10  ;;  %v4488_v4 = vadd.f32 %v8503_v32, %v4139_v25  ;;  %v7489_v32 = vld [vmem:[%s7896_s8 + $0x1c0] sm:$0xff]   ;;  %v7492_v10 = vld [vmem:[%s7896_s8 + $0x278] sm:$0xff]  }
0x1991   : > { %7000 = vmatprep.subr.bf16.mxu0 %v7468_v61  ;;  %7022 = vmatprep.subr.bf16.mxu1 %v7469_v52  ;;  %v8531_v21 = vpop.f32.mrf.mxu0  ;;  %v8534_v6 = vpop.f32.mrf.mxu1  ;;  %v4531_v12 = vadd.f32 %v8505_v33, %v4147_v26  ;;  %v4484_v39 = vadd.f32 %v8491_v19, %v4139_v25  ;;  %v4527_v46 = vadd.f32 %v8493_v20, %v4147_v26  ;;  %v7491_v33 = vld [vmem:[%s7896_s8 + $0x180] sm:$0xff]   ;;  %v7493_v44 = vld [vmem:[%s7896_s8 + $0x2f8] sm:$0xff]  }
0x1992   : > { %5900 = vmatprep.mubr.bf16.mxu0 %v4744_v53  ;;  %5941 = vmatprep.mubr.bf16.mxu1 %v4746_v54  ;;  %v4727_v42 = vmax.f32 %v4488_v4, 0.0  ;;  %v4572_v43 = vadd.f32 %v4571_v11, %v4159_v30  ;;  %v4615_v61 = vadd.f32 %v4614_v15, %v4167_v38  ;;  %v7494_v51 = vld [vmem:[%s7896_s8 + $0x238] sm:$0xff]   ;;  %v7500_v11 = vld [vmem:[%s7896_s8 + $0x268] sm:$0xff]  }
0x1993   : > { %v4575_v28 = vpop.f32.mrf.mxu0  ;;  %v4618_v31 = vpop.f32.mrf.mxu1  ;;  %v4729_v47 = vmax.f32 %v4531_v12, 0.0  ;;  %v4711_v19 = vmax.f32 %v4484_v39, 0.0  ;;  %v4713_v20 = vmax.f32 %v4527_v46, 0.0  ;;  %v7495_v54 = vld [vmem:[%s7896_s8 + $0x2b8] sm:$0xff]   ;;  %v7502_v15 = vld [vmem:[%s7896_s8 + $0x228] sm:$0xff]   ;;  %v7514_v12 = vld [vmem:[%s7896_s8 + $0x210] sm:$0xff]   ;;  %v4155_v46 = vrot.slane %v8546_v27, %v4122_v48 }
0x1994   : > { %7001 = vmatpush3.bf16.msra.mxu0 %v7470_v55  ;;  %7023 = vmatpush3.bf16.msra.mxu1 %v7471_v56  ;;  %v4576_v40 = vadd.f32 %v4575_v28, %v4159_v30  ;;  %v4619_v13 = vadd.f32 %v4618_v31, %v4167_v38  ;;  %v4716_v53 = vmax.f32 %v4572_v43, 0.0  ;;  %v4718_v56 = vmax.f32 %v4615_v61, 0.0  ;;  %v7508_v25 = vld [vmem:[%s7896_s8 + $0x258] sm:$0xff]   ;;  %v7512_v31 = vld [vmem:[%s7896_s8 + $0x250] sm:$0xff]   ;;  %v7516_v39 = vld [vmem:[%s7896_s8 + $0x248] sm:$0xff]  }
0x1995   : > { %7002 = vmatprep.subr.bf16.mxu0 %v7472_v57  ;;  %7024 = vmatprep.subr.bf16.mxu1 %v7473_v58  ;;  %v4743_v52 = vpack.c.bf16 %v4727_v42, %v4711_v19  ;;  %v4745_v55 = vpack.c.bf16 %v4729_v47, %v4713_v20  ;;  %v7496_v57 = vld [vmem:[%s7896_s8 + $0x270] sm:$0xff]   ;;  %v7509_v26 = vld [vmem:[%s7896_s8 + $0x2d8] sm:$0xff]   ;;  %v7518_v42 = vld [vmem:[%s7896_s8 + $0x208] sm:$0xff]   ;;  %v4574_v43 = vadd.f32 %v8531_v21, %v4155_v46 }
0x1996   : > { %v4732_v8 = vmax.f32 %v4576_v40, 0.0  ;;  %v4734_v50 = vmax.f32 %v4619_v13, 0.0  ;;  %v7511_v30 = vld [vmem:[%s7896_s8 + $0x298] sm:$0xff]   ;;  %v7517_v40 = vld [vmem:[%s7896_s8 + $0x2c8] sm:$0xff]   ;;  %v4163_v13 = vrot.slane %v8546_v27, %v4130_v49  ;;  %v7520_v48 = vld [vmem:[%s7896_s8 + $0x240] sm:$0xff]   ;;  %v4183_v49 = vrot.slane %v8546_v27, %v4150_v60 }
0x1997   : > { %v7519_v47 = vld [vmem:[%s7896_s8 + $0x288] sm:$0xff]   ;;  %v7521_v21 = vld [vmem:[%s7896_s8 + $0x2c0] sm:$0xff]  }
0x1998   : > { %7003 = vmatpush3.bf16.msra.mxu0 %v7474_v63  ;;  %7025 = vmatpush3.bf16.msra.mxu1 %v7475_v3  ;;  %v4748_v58 = vpack.c.bf16 %v4732_v8, %v4716_v53  ;;  %v7497_v63 = vld [vmem:[%s7896_s8 + $0x2f0] sm:$0xff]   ;;  %v4750_v3 = vpack.c.bf16 %v4734_v50, %v4718_v56  ;;  %v4617_v61 = vadd.f32 %v8534_v6, %v4163_v13  ;;  %v7522_v20 = vld [vmem:[%s7896_s8 + $0x200] sm:$0xff]   ;;  %v4731_v50 = vmax.f32 %v4574_v43, 0.0 }
0x1999   : > { %7004 = vmatprep.subr.bf16.mxu0 %v7476_v7  ;;  %7026 = vmatprep.subr.bf16.mxu1 %v7477_v9  ;;  %v7498_v7 = vld [vmem:[%s7896_s8 + $0x230] sm:$0xff]   ;;  %v7523_v6 = vld [vmem:[%s7896_s8 + $0x280] sm:$0xff]   ;;  %v4171_v43 = vrot.slane %v8546_v27, %v4138_v2 }
0x199a   : > { %v7499_v9 = vld [vmem:[%s7896_s8 + $0x2b0] sm:$0xff]   ;;  %v4733_v60 = vmax.f32 %v4617_v61, 0.0  ;;  %v7552_v61 = vld [vmem:[%s7896_s8 + $0x340] sm:$0xff]  }
0x199c   : > { %7005 = vmatpush3.bf16.msra.mxu0 %v7478_v14  ;;  %7027 = vmatpush3.bf16.msra.mxu1 %v7479_v16  ;;  %v7501_v14 = vld [vmem:[%s7896_s8 + $0x2e8] sm:$0xff]  }
0x199d   : > { %7006 = vmatprep.subr.bf16.mxu0 %v7480_v17  ;;  %7028 = vmatprep.subr.bf16.mxu1 %v7481_v18  ;;  %v7503_v16 = vld [vmem:[%s7896_s8 + $0x2a8] sm:$0xff]   ;;  %v7504_v17 = vld [vmem:[%s7896_s8 + $0x260] sm:$0xff]  }
0x199e   : > { %v7505_v18 = vld [vmem:[%s7896_s8 + $0x2e0] sm:$0xff]  }
0x19a0   : > { %7007 = vmatpush3.bf16.msra.mxu0 %v7482_v5  ;;  %7029 = vmatpush3.bf16.msra.mxu1 %v7483_v22  ;;  %v8578_v5 = vpop.f32.mrf.mxu0  ;;  %v7506_v22 = vld [vmem:[%s7896_s8 + $0x220] sm:$0xff]  }
0x19a1   : > { %7008 = vmatprep.subr.bf16.mxu0 %v7484_v23  ;;  %7030 = vmatprep.subr.bf16.mxu1 %v7485_v24  ;;  %v8581_v23 = vpop.f32.mrf.mxu1  ;;  %v7507_v24 = vld [vmem:[%s7896_s8 + $0x2a0] sm:$0xff]  }
0x19a2   : > { %v4657_v28 = vpop.f32.mrf.mxu0 }
0x19a3   : > { %v4700_v4 = vpop.f32.mrf.mxu1 }
0x19a4   : > { %7009 = vmatpush3.bf16.msra.mxu0 %v7486_v29  ;;  %7031 = vmatpush3.bf16.msra.mxu1 %v7487_v34  ;;  %v7510_v29 = vld [vmem:[%s7896_s8 + $0x218] sm:$0xff]   ;;  %v7513_v34 = vld [vmem:[%s7896_s8 + $0x2d0] sm:$0xff]   ;;  %v4701_v53 = vadd.f32 %v4700_v4, %v4183_v49  ;;  %v7538_v4 = vld [vmem:[%s7896_s8 + $0x320] sm:$0xff]  }
0x19a5   : > { %7010 = vmatprep.subr.bf16.mxu0 %v7488_v35  ;;  %7032 = vmatprep.subr.bf16.mxu1 %v7489_v32  ;;  %v8590_v35 = vpop.f32.mrf.mxu0  ;;  %v8593_v38 = vpop.f32.mrf.mxu1  ;;  %v7515_v32 = vld [vmem:[%s7896_s8 + $0x290] sm:$0xff]  }
0x19a8   : > { %7011 = vmatpush3.bf16.msra.mxu0 %v7490_v41  ;;  %7033 = vmatpush3.bf16.msra.mxu1 %v7491_v33  ;;  %v4661_v41 = vpop.f32.mrf.mxu0  ;;  %v4175_v33 = vrot.slane %v8546_v27, %v4142_v59  ;;  %v4613_v59 = vadd.f32 %v8520_v1, %v4163_v13  ;;  %v7547_v13 = vld [vmem:[%s7896_s8 + $0x390] sm:$0xff]  }
0x19a9   : > { %7040 = vmatprep.subr.bf16.mxu0 %v7492_v10  ;;  %7062 = vmatprep.subr.bf16.mxu1 %v7493_v44  ;;  %v4704_v10 = vpop.f32.mrf.mxu1  ;;  %v4570_v44 = vadd.f32 %v8517_v62, %v4155_v46  ;;  %v7546_v46 = vld [vmem:[%s7896_s8 + $0x310] sm:$0xff]  }
0x19aa   : > { %v4662_v19 = vadd.f32 %v4661_v41, %v4175_v33  ;;  %v4705_v8 = vadd.f32 %v4704_v10, %v4183_v49  ;;  %v4717_v1 = vmax.f32 %v4613_v59, 0.0  ;;  %v7548_v41 = vld [vmem:[%s7896_s8 + $0x348] sm:$0xff]  }
0x19ab   : > { %5901 = vmatmul.mubr.bf16.vlgmr.msra.gmra.mxu0 %v4743_v52  ;;  %5942 = vmatmul.mubr.bf16.vlgmr.msra.gmra.mxu1 %v4745_v55  ;;  %v7524_v52 = vld [vmem:[%s7896_s8 + $0x378] sm:$0xff]   ;;  %v4715_v62 = vmax.f32 %v4570_v44, 0.0  ;;  %v7550_v10 = vld [vmem:[%s7896_s8 + $0x308] sm:$0xff]   ;;  %v4656_v44 = vadd.f32 %v8578_v5, %v4171_v43 }
0x19ac   : > { %7041 = vmatpush3.bf16.msra.mxu0 %v7494_v51  ;;  %5982 = vmatprep.mubr.bf16.mxu0 %v4748_v58  ;;  %v4658_v51 = vadd.f32 %v4657_v28, %v4175_v33  ;;  %v4736_v55 = vmax.f32 %v4662_v19, 0.0  ;;  %v4738_v56 = vmax.f32 %v4705_v8, 0.0  ;;  %v7536_v28 = vld [vmem:[%s7896_s8 + $0x360] sm:$0xff]   ;;  %v4179_v33 = vrot.slane %v8546_v27, %v4146_v0 }
0x19ad   : > { %7063 = vmatpush3.bf16.msra.mxu1 %v7495_v54  ;;  %6023 = vmatprep.mubr.bf16.mxu1 %v4750_v3  ;;  %v7525_v54 = vld [vmem:[%s7896_s8 + $0x3f8] sm:$0xff]   ;;  %v4747_v58 = vpack.c.bf16 %v4731_v50, %v4715_v62  ;;  %v7555_v27 = vld [vmem:[%s7896_s8 + $0x380] sm:$0xff]  }
0x19ae   : > { %7042 = vmatprep.subr.bf16.mxu0 %v7496_v57  ;;  %7064 = vmatprep.subr.bf16.mxu1 %v7497_v63  ;;  %v7526_v57 = vld [vmem:[%s7896_s8 + $0x338] sm:$0xff]   ;;  %v4720_v63 = vmax.f32 %v4658_v51, 0.0  ;;  %v4703_v49 = vadd.f32 %v8593_v38, %v4179_v33  ;;  %v4699_v2 = vadd.f32 %v8581_v23, %v4179_v33 }
0x19af   : > { %v7527_v3 = vld [vmem:[%s7896_s8 + $0x3b8] sm:$0xff]  }
0x19b0   : > { %7043 = vmatpush3.bf16.msra.mxu0 %v7498_v7  ;;  %v4749_v7 = vpack.c.bf16 %v4733_v60, %v4717_v1  ;;  %v4737_v19 = vmax.f32 %v4703_v49, 0.0  ;;  %v4721_v59 = vmax.f32 %v4699_v2, 0.0 }
0x19b1   : > { %7065 = vmatpush3.bf16.msra.mxu1 %v7499_v9  ;;  %7044 = vmatprep.subr.bf16.mxu0 %v7500_v11  ;;  %v4722_v9 = vmax.f32 %v4701_v53, 0.0  ;;  %v7528_v11 = vld [vmem:[%s7896_s8 + $0x370] sm:$0xff]  }
0x19b2   : > { %7066 = vmatprep.subr.bf16.mxu1 %v7501_v14  ;;  %v4752_v14 = vpack.c.bf16 %v4736_v55, %v4720_v63  ;;  %v4753_v38 = vpack.c.bf16 %v4737_v19, %v4721_v59  ;;  %v6666_v63 = vld [vmem:[%s8809_s24] ss:$0 sm:$0xff] }
0x19b4   : > { %7045 = vmatpush3.bf16.msra.mxu0 %v7502_v15  ;;  %v7529_v15 = vld [vmem:[%s7896_s8 + $0x3f0] sm:$0xff]  }
0x19b5   : > { %7067 = vmatpush3.bf16.msra.mxu1 %v7503_v16  ;;  %7046 = vmatprep.subr.bf16.mxu0 %v7504_v17  ;;  %v4754_v16 = vpack.c.bf16 %v4738_v56, %v4722_v9  ;;  %v7530_v17 = vld [vmem:[%s7896_s8 + $0x330] sm:$0xff]  }
0x19b6   : > { %7068 = vmatprep.subr.bf16.mxu1 %v7505_v18  ;;  %v7531_v18 = vld [vmem:[%s7896_s8 + $0x3b0] sm:$0xff]  }
0x19b8   : > { %7047 = vmatpush3.bf16.msra.mxu0 %v7506_v22  ;;  %v7532_v22 = vld [vmem:[%s7896_s8 + $0x368] sm:$0xff]  }
0x19b9   : > { %7069 = vmatpush3.bf16.msra.mxu1 %v7507_v24  ;;  %7048 = vmatprep.subr.bf16.mxu0 %v7508_v25  ;;  %v7533_v24 = vld [vmem:[%s7896_s8 + $0x3e8] sm:$0xff]  }
0x19ba   : > { %7070 = vmatprep.subr.bf16.mxu1 %v7509_v26  ;;  %v7534_v25 = vld [vmem:[%s7896_s8 + $0x328] sm:$0xff]  }
0x19bb   : > { %v7535_v26 = vld [vmem:[%s7896_s8 + $0x3a8] sm:$0xff]  }
0x19bc   : > { %7049 = vmatpush3.bf16.msra.mxu0 %v7510_v29  ;;  %v7537_v29 = vld [vmem:[%s7896_s8 + $0x3e0] sm:$0xff]  }
0x19bd   : > { %7071 = vmatpush3.bf16.msra.mxu1 %v7511_v30  ;;  %7050 = vmatprep.subr.bf16.mxu0 %v7512_v31  ;;  %v7539_v30 = vld [vmem:[%s7896_s8 + $0x3a0] sm:$0xff]   ;;  %v7540_v31 = vld [vmem:[%s7896_s8 + $0x358] sm:$0xff]  }
0x19be   : > { %7072 = vmatprep.subr.bf16.mxu1 %v7513_v34  ;;  %v7541_v34 = vld [vmem:[%s7896_s8 + $0x3d8] sm:$0xff]  }
0x19c0   : > { %7051 = vmatpush3.bf16.msra.mxu0 %v7514_v12  ;;  %v7542_v12 = vld [vmem:[%s7896_s8 + $0x318] sm:$0xff]  }
0x19c1   : > { %7073 = vmatpush3.bf16.msra.mxu1 %v7515_v32  ;;  %7052 = vmatprep.subr.bf16.mxu0 %v7516_v39  ;;  %v7543_v32 = vld [vmem:[%s7896_s8 + $0x398] sm:$0xff]   ;;  %v7544_v39 = vld [vmem:[%s7896_s8 + $0x350] sm:$0xff]  }
0x19c2   : > { %7074 = vmatprep.subr.bf16.mxu1 %v7517_v40  ;;  %v7545_v40 = vld [vmem:[%s7896_s8 + $0x3d0] sm:$0xff]  }
0x19c4   : > { %7053 = vmatpush3.bf16.msra.mxu0 %v7518_v42  ;;  %v7549_v42 = vld [vmem:[%s7896_s8 + $0x3c8] sm:$0xff]  }
0x19c5   : > { %7075 = vmatpush3.bf16.msra.mxu1 %v7519_v47  ;;  %7054 = vmatprep.subr.bf16.mxu0 %v7520_v48  ;;  %v4660_v47 = vadd.f32 %v8590_v35, %v4171_v43  ;;  %v7551_v48 = vld [vmem:[%s7896_s8 + $0x388] sm:$0xff]   ;;  %v4719_v35 = vmax.f32 %v4656_v44, 0.0 }
0x19c6   : > { %7076 = vmatprep.subr.bf16.mxu1 %v7521_v21  ;;  %v7553_v21 = vld [vmem:[%s7896_s8 + $0x3c0] sm:$0xff]   ;;  %s8814_s8 = sld [smem:[#allocation29_spill]] (!%p6797_p5) }
0x19c7   : > { %v4735_v0 = vmax.f32 %v4660_v47, 0.0 }
0x19c8   : > { %7055 = vmatpush3.bf16.msra.mxu0 %v7522_v20 }
0x19c9   : > { %7077 = vmatpush3.bf16.msra.mxu1 %v7523_v6  ;;  %7084 = vmatprep.subr.bf16.mxu0 %v7524_v52  ;;  %v4751_v8 = vpack.c.bf16 %v4735_v0, %v4719_v35 }
0x19ca   : > { %7106 = vmatprep.subr.bf16.mxu1 %v7525_v54 }
0x19cb   : > { %5983 = vmatmul.mubr.bf16.vlgmr.msra.gmra.mxu0 %v4747_v58 }
0x19cc   : > { %6024 = vmatmul.mubr.bf16.vlgmr.msra.gmra.mxu1 %v4749_v7  ;;  %7085 = vmatpush3.bf16.msra.mxu0 %v7526_v57 }
0x19cd   : > { %6064 = vmatprep.mubr.bf16.mxu0 %v4752_v14  ;;  %7107 = vmatpush3.bf16.msra.mxu1 %v7527_v3 }
0x19ce   : > { %6105 = vmatprep.mubr.bf16.mxu1 %v4754_v16  ;;  %7086 = vmatprep.subr.bf16.mxu0 %v7528_v11 }
0x19cf   : > { %7108 = vmatprep.subr.bf16.mxu1 %v7529_v15 }
0x19d0   : > { %7087 = vmatpush3.bf16.msra.mxu0 %v7530_v17 }
0x19d1   : > { %7109 = vmatpush3.bf16.msra.mxu1 %v7531_v18  ;;  %7088 = vmatprep.subr.bf16.mxu0 %v7532_v22 }
0x19d2   : > { %7110 = vmatprep.subr.bf16.mxu1 %v7533_v24 }
0x19d4   : > { %7089 = vmatpush3.bf16.msra.mxu0 %v7534_v25 }
0x19d5   : > { %7111 = vmatpush3.bf16.msra.mxu1 %v7535_v26  ;;  %7090 = vmatprep.subr.bf16.mxu0 %v7536_v28 }
0x19d6   : > { %7112 = vmatprep.subr.bf16.mxu1 %v7537_v29 }
0x19d8   : > { %7091 = vmatpush3.bf16.msra.mxu0 %v7538_v4 }
0x19d9   : > { %7113 = vmatpush3.bf16.msra.mxu1 %v7539_v30  ;;  %7092 = vmatprep.subr.bf16.mxu0 %v7540_v31 }
0x19da   : > { %7114 = vmatprep.subr.bf16.mxu1 %v7541_v34 }
0x19dc   : > { %7093 = vmatpush3.bf16.msra.mxu0 %v7542_v12 }
0x19dd   : > { %7115 = vmatpush3.bf16.msra.mxu1 %v7543_v32  ;;  %7094 = vmatprep.subr.bf16.mxu0 %v7544_v39 }
0x19de   : > { %7116 = vmatprep.subr.bf16.mxu1 %v7545_v40 }
0x19e0   : > { %7095 = vmatpush3.bf16.msra.mxu0 %v7546_v46 }
0x19e1   : > { %7117 = vmatpush3.bf16.msra.mxu1 %v7547_v13  ;;  %7096 = vmatprep.subr.bf16.mxu0 %v7548_v41 }
0x19e2   : > { %7118 = vmatprep.subr.bf16.mxu1 %v7549_v42 }
0x19e4   : > { %7097 = vmatpush3.bf16.msra.mxu0 %v7550_v10 }
0x19e5   : > { %7119 = vmatpush3.bf16.msra.mxu1 %v7551_v48  ;;  %7098 = vmatprep.subr.bf16.mxu0 %v7552_v61 }
0x19e6   : > { %7120 = vmatprep.subr.bf16.mxu1 %v7553_v21 }
0x19e8   : > { %7099 = vmatpush3.bf16.msra.mxu0 %v7554_v45 }
0x19e9   : > { %7121 = vmatpush3.bf16.msra.mxu1 %v7555_v27 }
0x19eb   : > { %6065 = vmatmul.mubr.bf16.vlgmr.msra.gmra.mxu0 %v4751_v8 }
0x19ec   : > { %6106 = vmatmul.mubr.bf16.vlgmr.msra.gmra.mxu1 %v4753_v38 }
0x1a4b   : > { %v6968_v20 = vpop.f32.mrf.mxu0  ;;  %v6990_v5 = vpop.f32.mrf.mxu1 }
0x1a4d   : > { %v6969_v23 = vpop.f32.mrf.mxu0  ;;  %v6991_v50 = vpop.f32.mrf.mxu1 }
0x1a4e   : > { %v6970_v58 = vadd.f32 %v6969_v23, %v6968_v20  ;;  %v6992_v16 = vadd.f32 %v6991_v50, %v6990_v5 }
0x1a4f   : > { %v6971_v51 = vpop.f32.mrf.mxu0  ;;  %v6993_v6 = vpop.f32.mrf.mxu1 }
0x1a50   : > { %v5821_v9 = vadd.f32 %v6970_v58, %v6666_v63 }
0x1a51   : > { %v6972_v52 = vpop.f32.mrf.mxu0  ;;  %v6994_v53 = vpop.f32.mrf.mxu1 }
0x1a52   : > { %v6973_v11 = vadd.f32 %v6972_v52, %v6971_v51  ;;  %v5862_v18 = vadd.f32 %v6992_v16, %v5821_v9  ;;  %v6995_v26 = vadd.f32 %v6994_v53, %v6993_v6 }
0x1a54   : > { %v5824_v22 = vadd.f32 %v6973_v11, %v6666_v63 }
0x1a56   : > { %v5865_v4 = vadd.f32 %v6995_v26, %v5824_v22 }
0x1a6b   : > { %v7012_v60 = vpop.f32.mrf.mxu0  ;;  %v7034_v54 = vpop.f32.mrf.mxu1 }
0x1a6d   : > { %v7013_v62 = vpop.f32.mrf.mxu0  ;;  %v7035_v55 = vpop.f32.mrf.mxu1 }
0x1a6e   : > { %v7014_v17 = vadd.f32 %v7013_v62, %v7012_v60  ;;  %v7036_v30 = vadd.f32 %v7035_v55, %v7034_v54 }
0x1a6f   : > { %v7015_v1 = vpop.f32.mrf.mxu0  ;;  %v7037_v56 = vpop.f32.mrf.mxu1 }
0x1a70   : > { %v5903_v28 = vadd.f32 %v7014_v17, %v5862_v18  ;;  %v6795_v18 = vld [vmem:[%s1079_s3] ss:$0 sm:$0xff] }
0x1a71   : > { %v7016_v57 = vpop.f32.mrf.mxu0  ;;  %v7038_v7 = vpop.f32.mrf.mxu1 }
0x1a72   : > { %v7017_v29 = vadd.f32 %v7016_v57, %v7015_v1  ;;  %v5944_v32 = vadd.f32 %v7036_v30, %v5903_v28  ;;  %v7039_v40 = vadd.f32 %v7038_v7, %v7037_v56 }
0x1a74   : > { %v5906_v39 = vadd.f32 %v7017_v29, %v5865_v4 }
0x1a76   : > { %v5947_v43 = vadd.f32 %v7039_v40, %v5906_v39 }
0x1a8b   : > { %v7056_v3 = vpop.f32.mrf.mxu0 }
0x1a8c   : > { %v7078_v14 = vpop.f32.mrf.mxu1 }
0x1a8d   : > { %v7057_v15 = vpop.f32.mrf.mxu0 }
0x1a8e   : > { %v7079_v24 = vpop.f32.mrf.mxu1  ;;  %v7058_v31 = vadd.f32 %v7057_v15, %v7056_v3 }
0x1a8f   : > { %v7059_v25 = vpop.f32.mrf.mxu0  ;;  %v7080_v33 = vadd.f32 %v7079_v24, %v7078_v14  ;;  %v6796_v24 = vld [vmem:[%s8811_s27] ss:$0 sm:$0xff] }
0x1a90   : > { %v7081_v34 = vpop.f32.mrf.mxu1  ;;  %v5985_v46 = vadd.f32 %v7058_v31, %v5944_v32 }
0x1a91   : > { %v7060_v12 = vpop.f32.mrf.mxu0 }
0x1a92   : > { %v7061_v13 = vadd.f32 %v7060_v12, %v7059_v25  ;;  %v7082_v41 = vpop.f32.mrf.mxu1  ;;  %v6026_v48 = vadd.f32 %v7080_v33, %v5985_v46 }
0x1a93   : > { %v7083_v2 = vadd.f32 %v7082_v41, %v7081_v34 }
0x1a94   : > { %v5988_v61 = vadd.f32 %v7061_v13, %v5947_v43 }
0x1a96   : > { %v6029_v35 = vadd.f32 %v7083_v2, %v5988_v61 }
0x1aab   : > { %v7100_v42 = vpop.f32.mrf.mxu0 }
0x1aac   : > { %v7122_v10 = vpop.f32.mrf.mxu1 }
0x1aad   : > { %v7101_v47 = vpop.f32.mrf.mxu0 }
0x1aae   : > { %v7102_v49 = vadd.f32 %v7101_v47, %v7100_v42  ;;  %v7123_v21 = vpop.f32.mrf.mxu1 }
0x1aaf   : > { %v7103_v44 = vpop.f32.mrf.mxu0  ;;  %v7124_v0 = vadd.f32 %v7123_v21, %v7122_v10 }
0x1ab0   : > { %v6067_v45 = vadd.f32 %v7102_v49, %v6026_v48  ;;  %v7125_v27 = vpop.f32.mrf.mxu1 }
0x1ab1   : > { %v7104_v19 = vpop.f32.mrf.mxu0 }
0x1ab2   : > { %v6108_v59 = vadd.f32 %v7124_v0, %v6067_v45  ;;  %v7105_v8 = vadd.f32 %v7104_v19, %v7103_v44  ;;  %v7126_v38 = vpop.f32.mrf.mxu1 }
0x1ab3   : > { %v7127_v23 = vadd.f32 %v7126_v38, %v7125_v27 }
0x1ab4   : > { %v6114_v20 = vadd.f32 %v6108_v59, %v8388_v36  ;;  %v6070_v5 = vadd.f32 %v7105_v8, %v6029_v35 }
0x1ab6   : > { %v6111_v50 = vadd.f32 %v7127_v23, %v6070_v5  ;;  %v6118_v51 = vsel %vm1368_vm1, %v6114_v20, 0.0  ;;  %v6126_v6 = vmul.f32 %v6114_v20, %v6114_v20 }
0x1ab7   : > { %6119 = vadd.xlane.f32.xlu1 %v6118_v51 }
0x1ab8   : > { %v6115_v52 = vadd.f32 %v6111_v50, %v8390_v37  ;;  %v6128_v53 = vsel %vm1368_vm1, %v6126_v6, 0.0 }
0x1aba   : > { %v6121_v60 = vsel %vm1368_vm1, %v6115_v52, 0.0  ;;  %v6127_v54 = vmul.f32 %v6115_v52, %v6115_v52 }
0x1abb   : > { %6122 = vadd.xlane.f32.xlu0 %v6121_v60  ;;  %6129 = vadd.xlane.f32.xlu1 %v6128_v53 }
0x1abc   : > { %v6131_v62 = vsel %vm1368_vm1, %v6127_v54, 0.0 }
0x1abf   : > { %6132 = vadd.xlane.f32.xlu0 %v6131_v62 }
0x1b40   : > { %v6120_v36 = vpop.xlane.xlu1 %6119 }
0x1b41   : > { %v6124_v55 = vmul.f32 0.03125, %v6120_v36 }
0x1b43   : > { %v6136_v57 = vmul.f32 %v6124_v55, %v6124_v55  ;;  %v6140_v16 = vsub.f32 %v6114_v20, %v6124_v55 }
0x1b44   : > { %v6123_v1 = vpop.xlane.xlu0 %6122  ;;  %v6130_v56 = vpop.xlane.xlu1 %6129 }
0x1b45   : > { %v6125_v58 = vmul.f32 0.03125, %v6123_v1  ;;  %v6134_v63 = vmul.f32 0.03125, %v6130_v56 }
0x1b47   : > { %v6138_v37 = vsub.f32 %v6134_v63, %v6136_v57  ;;  %v6137_v7 = vmul.f32 %v6125_v58, %v6125_v58  ;;  %v6141_v25 = vsub.f32 %v6115_v52, %v6125_v58 }
0x1b48   : > { %v6133_v3 = vpop.xlane.xlu0 %6132 }
0x1b49   : > { %v6142_v9 = vadd.f32 1e-05, %v6138_v37  ;;  %v6135_v11 = vmul.f32 0.03125, %v6133_v3 }
0x1b4b   : > { %7628 = vrsqrt.f32 %v6142_v9  ;;  %v6139_v14 = vsub.f32 %v6135_v11, %v6137_v7 }
0x1b4d   : > { %v6143_v15 = vadd.f32 1e-05, %v6139_v14 }
0x1b4f   : > { %7630 = vrsqrt.f32 %v6143_v15 }
0x1b58   : > { %v7629_v17 = vpop.eup %7628 }
0x1b59   : > { %v6146_v22 = vmul.f32 %v7629_v17, %v6140_v16 }
0x1b5b   : > { %v6154_v26 = vmul.f32 %v6795_v18, %v6146_v22 }
0x1b5c   : > { %v7631_v28 = vpop.eup %7630 }
0x1b5d   : > { %v6162_v29 = vadd.f32 %v6796_v24, %v6154_v26  ;;  %v6147_v4 = vmul.f32 %v7631_v28, %v6141_v25 }
0x1b5f   : > { %6164 = vst.msk [vmem:[#allocation2] sm:$0xff] %vm1368_vm1, %v6162_v29  ;;  %v6155_v30 = vmul.f32 %v6795_v18, %v6147_v4  ;;  %6169 = sbr.rel (%p6797_p5) target bundleno = 7219 (0x1c33), region = 132 }
0x1b61   : > { %v6163_v31 = vadd.f32 %v6796_v24, %v6155_v30 }
0x1b63   : > { %6165 = vst.msk [vmem:[#allocation2 + $0x8] sm:$0xff] %vm1368_vm1, %v6163_v31 }
0x1b64   : > { %v6173_v34 = vld [vmem:[%s8813_s4 + $0x18] sm:$0xff]  ;;  %v6172_v12 = vld [vmem:[%s8813_s4 + $0x10] sm:$0xff]  ;;  %7390 = vmatprep.mubr.msk.f32.mxu0 %vm1368_vm1, %v6162_v29  ;;  %v6171_v32 = vld [vmem:[%s8813_s4 + $0x8] sm:$0xff] }
0x1b65   : > { %7382 = vmatprep.subr.mxu0 %v6173_v34  ;;  %v6170_v39 = vld [vmem:[%s8813_s4] sm:$0xff] }
0x1b66   : > { %7383 = vmatpush3.msra.mxu0 %v6173_v34  ;;  %v6798_v40 = vld [vmem:[%s8814_s8] ss:$0 sm:$0xff] }
0x1b67   : > { %7384 = vmatprep.subr.mxu0 %v6172_v12 }
0x1b68   : > { %7385 = vmatpush3.msra.mxu0 %v6172_v12 }
0x1b69   : > { %7386 = vmatprep.subr.mxu0 %v6171_v32 }
0x1b6a   : > { %7387 = vmatpush3.msra.mxu0 %v6171_v32 }
0x1b6b   : > { %7388 = vmatprep.subr.mxu0 %v6170_v39 }
0x1b6c   : > { %7389 = vmatpush3.msra.mxu0 %v6170_v39 }
0x1b6d   : > { %7391 = vmatmul.mubr.msk.f32.vlgmr.msra.gmra.mxu0 %vm1368_vm1, %v6163_v31 }
0x1c2d   : > { %v7392_v46 = vpop.f32.mrf.mxu0 }
0x1c2e   : > { %v6259_v13 = vadd.f32 %v7392_v46, %v6798_v40 }
0x1c2f   : > { %v6253_v41 = vpop.f32.mrf.mxu0 }
0x1c30   : > { %6263 = vst [vmem:[#allocation4 + $0x8] sm:$0xff] %v6259_v13  ;;  %v6254_v42 = vadd.f32 %v6798_v40, %v6253_v41 }
0x1c32   : > { %6262 = vst [vmem:[#allocation4] sm:$0xff] %v6254_v42 }
0x1c33 PF: > { %s8815_s24 = sld [smem:[#allocation8_spill]]  ;;  %s7682_s30 = smov [#allocation4]  }
0x1c34   : > { %s6270_s2 = sshll.u32 %s7682_s30, 4  ;;  %s6271_s2 = int_to_ptr.vmem [resolvable:$true] %s6270_s2 }
0x1c35   : > { %s7634_s28 = scalar_lea.vmem %s6271_s2, 256  ;;  %p7641_p10 = scmp.lt.s32.totalorder %s6271_s2, %s6271_s2 }
0x1c36   : > { %p7635_p7 = scmp.ne.s32.totalorder %s6271_s2, %s7634_s28  ;;  %p7642_p11 = scmp.lt.s32.totalorder %s7634_s28, %s7634_s28 }
0x1c38   : > { %p7643_p12 = por %p7642_p11, %p7641_p10 }
0x1c39   : > { %p7401_p6 = scmp.eq.s32.totalorder %s8815_s24, 3 }
0x1c3b   : > { %p7636_p8 = pnand %p7635_p7, %p7401_p6 }
0x1c3d   : > { %p7637_p9 = pneg %p7636_p8 }
0x1c3f   : > { %p7644_p13 = pnand %p7643_p12, %p7637_p9 }
0x1c41   : > { %7647 = shalt.err (!%p7644_p13)
}
0x1c42   : > { %s7683_s0 = smov 128   ;;  %s7684_s14 = smov 8  }
0x1c43   : > { %s8816_s3 = sld [smem:[#allocation30_spill]] }
0x1c49   : > { %7398 = dma.vmem_to_hbm [thread:$0]  (%p7401_p6), %s6271_s2, 256, %s8816_s3, [#allocation5], %s7683_s0, %s7683_s0, %s7684_s14  }
0x1c4a   : > { %7663 = dma.done.wait (%p7401_p6), [#allocation5], 256  }
0x1c4b   : > { %7665 = vsyncadd (%p7401_p6), [#allocation5], 4294967040 }
0x1c4c PF: > { %s8817_s5 = sld [smem:[#allocation7_spill]] }
0x1c52   : > { %s37_s27 = sadd.s32 1, %s8817_s5  }
0x1c53   : > { %p34_p0 = scmp.ge.s32.totalorder %s37_s27, 6  }
0x1c55   :  { %36 = sbr.rel (!%p34_p0) target bundleno = 21 (0x15), region = 216 }
0x1c5a   :  { %6286 = vsyncpa [#allocation5], 1 }
0x1c5b   :  { %6288 = vsyncpa [#allocation5 + $0x1], 1 }

</bundles_post_ra>
